<compile_context>
chip_gen: v7x
topology: tpu7x:2x2x1
jax: 0.10.0
libtpu: 0.0.40
codegen_flags: <defaults>
</compile_context>

<pallas_src>
import functools

import jax
import jax.numpy as jnp
from jax.experimental import pallas as pl
from jax.experimental.pallas import tpu as pltpu


_VMEM = pl.BlockSpec(memory_space=pltpu.MemorySpace.VMEM)


def _round_up(x, m):
    return ((x + m - 1) // m) * m


# ----------------------------------------------------------------------------
# In-kernel helpers (traced inside the fused kernel)
# ----------------------------------------------------------------------------

def _layer_norm(x, g, b, eps):
    mu = jnp.mean(x, axis=-1, keepdims=True)
    xc = x - mu
    var = jnp.mean(xc * xc, axis=-1, keepdims=True)
    return xc * jax.lax.rsqrt(var + eps) * g + b


def _gelu(x):
    # tanh-approximation GELU.
    # TODO(synk): switch to exact erf GELU if bit-matching HF's default
    # hidden_act='gelu' is required.
    c = 0.7978845608028654  # sqrt(2/pi)
    return 0.5 * x * (1.0 + jnp.tanh(c * (x + 0.044715 * x * x * x)))


def _dot(a, b):
    return jnp.dot(a, b, preferred_element_type=jnp.float32)


def _dot_nt(a, b):
    # a @ b.T (contract last dims) without materializing the transpose.
    return jax.lax.dot_general(a, b, (((1,), (1,)), ((), ())),
                               preferred_element_type=jnp.float32)


# ----------------------------------------------------------------------------
# Fused forward kernel
# ----------------------------------------------------------------------------

def _fused_parser_kernel(
        ids_ref, tt_ref, lab_ref,
        emb_tab_ref, w_qkv_ref, b_qkv_ref, w_ao_ref,
        w_ff1b_ref, w_ff2v_ref, pool_head_ref, cls_wb_ref,
        out_ref,
        work_ref,
        *, batch, seq, hidden, num_heads, head_dim, inter,
        num_layers, num_classes, vocab, type_vocab, eps):
    H, I, nH, dH = hidden, inter, num_heads, head_dim
    BS = batch * seq
    scale = 1.0 / float(dH) ** 0.5

    # --- embeddings: word + token-type + position via ONE multi-hot matmul ---
    # (no attention_mask: BertModel default all-ones mask)
    # TODO(synk): add an attention mask if real inputs contain padding tokens.
    n_rows = vocab + type_vocab + seq
    col = jax.lax.broadcasted_iota(jnp.int32, (BS, n_rows), 1)
    pos = jax.lax.broadcasted_iota(jnp.int32, (BS, 1), 0) % seq
    hot = ((col == ids_ref[...])
           | (col == vocab + tt_ref[...])
           | (col == vocab + type_vocab + pos)).astype(jnp.float32)
    emb = _dot(hot, emb_tab_ref[0:n_rows, :])                        # [BS, H]

    ph = pool_head_ref[...]                                          # [H+3, H]
    x = _layer_norm(emb, ph[H + 1:H + 2, :], ph[H + 2:H + 3, :], eps)

    # --- encoder stack (statically unrolled, weights resident in VMEM) ---
    for l in range(num_layers):
        # attention: per-(batch, head) with pre-split per-head weight blocks
        # (leading-axis indexing only -> no lane slicing / concatenates).
        for b in range(batch):
            r0 = b * seq
            x_b = x[r0:r0 + seq, :]                                  # [S, H]
            attn_b = jnp.zeros((seq, H), jnp.float32)
            for h in range(nH):
                iq = (l * 3 + 0) * nH + h
                ik = (l * 3 + 1) * nH + h
                iv = (l * 3 + 2) * nH + h
                q = _dot(x_b, w_qkv_ref[iq]) + b_qkv_ref[iq:iq + 1, :]
                k = _dot(x_b, w_qkv_ref[ik]) + b_qkv_ref[ik:ik + 1, :]
                v = _dot(x_b, w_qkv_ref[iv]) + b_qkv_ref[iv:iv + 1, :]
                s = _dot_nt(q, k) * scale                            # [S, S]
                m = jnp.max(s, axis=-1, keepdims=True)
                e = jnp.exp(s - m)
                p = e * pl.reciprocal(jnp.sum(e, axis=-1, keepdims=True),
                                      approx=True)
                # fold the per-head context straight through the matching
                # row-block of the attention-output projection.
                attn_b = attn_b + _dot(_dot(p, v), w_ao_ref[l * nH + h])
            work_ref[r0:r0 + seq, :] = attn_b + x_b                  # residual

        v2 = w_ff2v_ref[l]          # [I+6, H]: ff2_w | ao_b ln1_g ln1_b ff2_b ln2_g ln2_b
        x = _layer_norm(work_ref[...] + v2[I + 0:I + 1, :],
                        v2[I + 1:I + 2, :], v2[I + 2:I + 3, :], eps)

        w1 = w_ff1b_ref[l]          # [H+1, I]: ff1_w | ff1_b
        ff = _gelu(_dot(x, w1[0:H, :]) + w1[H:H + 1, :])
        ff = _dot(ff, v2[0:I, :]) + v2[I + 3:I + 4, :]
        x = _layer_norm(ff + x, v2[I + 4:I + 5, :], v2[I + 5:I + 6, :], eps)

    # --- pooler: tanh(Linear(hidden[:, 0])) on the [CLS] row per sequence ---
    cls_rows = x.reshape(batch, seq, H)[:, 0, :]                     # [B, H]
    pooled = jnp.tanh(_dot(cls_rows, ph[0:H, :]) + ph[H:H + 1, :])

    # --- intent classifier (dropout == identity at inference) ---
    # TODO(synk): training-mode dropout via pltpu.prng_random_bits if required.
    cw = cls_wb_ref[...]                                             # [H+1, C]
    logits = _dot(pooled, cw[0:H, :]) + cw[H:H + 1, :]               # [B, C]

    # --- mean cross-entropy; one-hot built in-kernel from integer labels ---
    mx = jnp.max(logits, axis=-1, keepdims=True)
    lse = jnp.log(jnp.sum(jnp.exp(logits - mx), axis=-1, keepdims=True)) + mx
    ciota = jax.lax.broadcasted_iota(jnp.int32, (batch, num_classes), 1)
    onehot = (ciota == lab_ref[...]).astype(jnp.float32)
    nll = lse - jnp.sum(onehot * logits, axis=-1, keepdims=True)     # [B, 1]
    loss = jnp.mean(nll)

    # --- pack logits + loss into one (8,128)-padded output tile ---
    out_ref[...] = jnp.zeros_like(out_ref)
    out_ref[0:batch, 0:num_classes] = logits
    out_ref[batch:batch + 1, 0:1] = loss.reshape(1, 1)


# ----------------------------------------------------------------------------
# Model config / parameters (deterministic synthetic init)
# ----------------------------------------------------------------------------

CFG = dict(
    vocab_size=50,
    type_vocab_size=2,
    max_position=16,
    hidden=32,
    num_heads=2,
    intermediate=64,
    num_layers=2,
    num_intent_labels=5,
)


def init_params(key, cfg):
    std = 0.02
    keys = iter(jax.random.split(key, 128))

    def nrm(shape):
        return std * jax.random.normal(next(keys), shape, dtype=jnp.float32)

    H, I = cfg["hidden"], cfg["intermediate"]
    p = {
        "word_emb": nrm((cfg["vocab_size"], H)),
        "pos_emb": nrm((cfg["max_position"], H)),
        "type_emb": nrm((cfg["type_vocab_size"], H)),
        "emb_ln_g": jnp.ones((H,), jnp.float32),
        "emb_ln_b": jnp.zeros((H,), jnp.float32),
        "pooler_w": nrm((H, H)),
        "pooler_b": jnp.zeros((H,), jnp.float32),
        "cls_w": nrm((H, cfg["num_intent_labels"])),
        "cls_b": jnp.zeros((cfg["num_intent_labels"],), jnp.float32),
        "layers": [],
    }
    for _ in range(cfg["num_layers"]):
        p["layers"].append({
            "q_w": nrm((H, H)), "q_b": jnp.zeros((H,), jnp.float32),
            "k_w": nrm((H, H)), "k_b": jnp.zeros((H,), jnp.float32),
            "v_w": nrm((H, H)), "v_b": jnp.zeros((H,), jnp.float32),
            "ao_w": nrm((H, H)), "ao_b": jnp.zeros((H,), jnp.float32),
            "attn_ln_g": jnp.ones((H,), jnp.float32),
            "attn_ln_b": jnp.zeros((H,), jnp.float32),
            "ff1_w": nrm((H, I)), "ff1_b": jnp.zeros((I,), jnp.float32),
            "ff2_w": nrm((I, H)), "ff2_b": jnp.zeros((H,), jnp.float32),
            "out_ln_g": jnp.ones((H,), jnp.float32),
            "out_ln_b": jnp.zeros((H,), jnp.float32),
        })
    return p


def pack_params(params, cfg):
    """One-time weight packing (NOT on the per-call hot path)."""
    H, I = cfg["hidden"], cfg["intermediate"]
    nH = cfg["num_heads"]
    dH = H // nH
    C = cfg["num_intent_labels"]

    emb_tab = jnp.concatenate(
        [params["word_emb"], params["type_emb"], params["pos_emb"]], axis=0)

    w_qkv, b_qkv, w_ao, w_ff1b, w_ff2v = [], [], [], [], []
    for lp in params["layers"]:
        for wname, bname in (("q_w", "q_b"), ("k_w", "k_b"), ("v_w", "v_b")):
            for h in range(nH):
                w_qkv.append(lp[wname][:, h * dH:(h + 1) * dH])      # [H, dH]
                b_qkv.append(lp[bname][h * dH:(h + 1) * dH])         # [dH]
        for h in range(nH):
            w_ao.append(lp["ao_w"][h * dH:(h + 1) * dH, :])          # [dH, H]
        w_ff1b.append(jnp.concatenate(
            [lp["ff1_w"], lp["ff1_b"].reshape(1, I)], axis=0))       # [H+1, I]
        w_ff2v.append(jnp.concatenate(
            [lp["ff2_w"],
             lp["ao_b"].reshape(1, H), lp["attn_ln_g"].reshape(1, H),
             lp["attn_ln_b"].reshape(1, H), lp["ff2_b"].reshape(1, H),
             lp["out_ln_g"].reshape(1, H), lp["out_ln_b"].reshape(1, H)],
            axis=0))                                                 # [I+6, H]

    pool_head = jnp.concatenate(
        [params["pooler_w"], params["pooler_b"].reshape(1, H),
         params["emb_ln_g"].reshape(1, H), params["emb_ln_b"].reshape(1, H)],
        axis=0)                                                      # [H+3, H]
    cls_wb = jnp.concatenate(
        [params["cls_w"], params["cls_b"].reshape(1, C)], axis=0)    # [H+1, C]

    return dict(
        emb_tab=emb_tab,
        w_qkv=jnp.stack(w_qkv, 0),       # [L*3*nH, H, dH]
        b_qkv=jnp.stack(b_qkv, 0),       # [L*3*nH, dH]
        w_ao=jnp.stack(w_ao, 0),         # [L*nH, dH, H]
        w_ff1b=jnp.stack(w_ff1b, 0),     # [L, H+1, I]
        w_ff2v=jnp.stack(w_ff2v, 0),     # [L, I+6, H]
        pool_head=pool_head,
        cls_wb=cls_wb,
    )


# ----------------------------------------------------------------------------
# Forward pass: everything inside one gridless pallas_call
# ----------------------------------------------------------------------------

def parser_model_forward(packed, input_ids, token_type_ids, intent_label, cfg):
    batch, seq = input_ids.shape
    H = cfg["hidden"]
    nH = cfg["num_heads"]
    dH = H // nH
    L = cfg["num_layers"]
    I = cfg["intermediate"]
    C = cfg["num_intent_labels"]
    V = cfg["vocab_size"]
    T = cfg["type_vocab_size"]

    ids = input_ids.astype(jnp.int32).reshape(batch * seq, 1)
    tts = token_type_ids.astype(jnp.int32).reshape(batch * seq, 1)
    lab = intent_label.astype(jnp.int32).reshape(batch, 1)

    out_rows = max(8, _round_up(batch + 1, 8))
    out_cols = max(128, _round_up(C, 128))

    kernel = functools.partial(
        _fused_parser_kernel, batch=batch, seq=seq, hidden=H, num_heads=nH,
        head_dim=dH, inter=I, num_layers=L, num_classes=C, vocab=V,
        type_vocab=T, eps=1e-12)

    operands = (ids, tts, lab,
                packed["emb_tab"], packed["w_qkv"], packed["b_qkv"],
                packed["w_ao"], packed["w_ff1b"], packed["w_ff2v"],
                packed["pool_head"], packed["cls_wb"])

    out = pl.pallas_call(
        kernel,
        out_shape=jax.ShapeDtypeStruct((out_rows, out_cols), jnp.float32),
        in_specs=[_VMEM] * len(operands),
        out_specs=_VMEM,
        scratch_shapes=[pltpu.VMEM((batch * seq, H), jnp.float32)],
    )(*operands)

    logits = out[:batch, :C]
    loss = out[batch, 0]
    return logits, loss


# ----------------------------------------------------------------------------

if __name__ == "__main__":
    cfg = CFG
    batch, seq = 2, 8

    key = jax.random.PRNGKey(0)
    k_param, k_ids, k_lab = jax.random.split(key, 3)

    params = init_params(k_param, cfg)
    packed = pack_params(params, cfg)      # one-time packing, off the hot path

    input_ids = jax.random.randint(k_ids, (batch, seq), 0, cfg["vocab_size"],
                                   dtype=jnp.int32)
    token_type_ids = jnp.zeros((batch, seq), dtype=jnp.int32)
    intent_label = jax.random.randint(k_lab, (batch,), 0,
                                      cfg["num_intent_labels"],
                                      dtype=jnp.int32)

    fwd = jax.jit(lambda p, a, b, c: parser_model_forward(p, a, b, c, CFG))
    logits, loss = fwd(packed, input_ids, token_type_ids, intent_label)
    jax.block_until_ready((logits, loss))

    assert logits.shape == (batch, cfg["num_intent_labels"])
    assert loss.shape == ()
    assert bool(jnp.all(jnp.isfinite(logits)))
    assert bool(jnp.isfinite(loss))
    print("KERNEL_OK")
</pallas_src>

<mosaic_0001>
module attributes {stable_mosaic.version = 11 : i64} {
  func.func @_fused_parser_kernel(%arg0: memref<16x1xi32, #tpu.memory_space<vmem>>, %arg1: memref<16x1xi32, #tpu.memory_space<vmem>>, %arg2: memref<2x1xi32, #tpu.memory_space<vmem>>, %arg3: memref<68x32xf32, #tpu.memory_space<vmem>>, %arg4: memref<12x32x16xf32, #tpu.memory_space<vmem>>, %arg5: memref<12x16xf32, #tpu.memory_space<vmem>>, %arg6: memref<4x16x32xf32, #tpu.memory_space<vmem>>, %arg7: memref<2x33x64xf32, #tpu.memory_space<vmem>>, %arg8: memref<2x70x32xf32, #tpu.memory_space<vmem>>, %arg9: memref<35x32xf32, #tpu.memory_space<vmem>>, %arg10: memref<33x5xf32, #tpu.memory_space<vmem>>, %arg11: memref<8x128xf32, #tpu.memory_space<vmem>>, %arg12: memref<16x32xf32, #tpu.memory_space<vmem>>) attributes {dimension_semantics = [], scalar_prefetch = 0 : i64, scratch_operands = 1 : i64, tpu.core_type = #tpu.core_type<tc>} {
    %0 = tpu.iota {dimensions = array<i32: 1>} : vector<16x60xi32>
    %1 = tpu.iota {dimensions = array<i32: 0>} : vector<16x1xi32>
    %c8_i32 = arith.constant 8 : i32
    %c0_i32 = arith.constant 0 : i32
    %2 = arith.cmpi eq, %c8_i32, %c0_i32 : i32
    %c1_i32 = arith.constant 1 : i32
    %3 = arith.select %2, %c1_i32, %c8_i32 : i32
    %4 = vector.broadcast %3 : i32 to vector<16x1xi32>
    %5 = arith.remsi %1, %4 : vector<16x1xi32>
    %c0_i32_0 = arith.constant 0 : i32
    %6 = vector.broadcast %c0_i32_0 : i32 to vector<16x1xi32>
    %7 = arith.cmpi ne, %5, %6 : vector<16x1xi32>
    %c0_i32_1 = arith.constant 0 : i32
    %8 = vector.broadcast %c0_i32_1 : i32 to vector<16x1xi32>
    %9 = arith.cmpi slt, %5, %8 : vector<16x1xi32>
    %c0_i32_2 = arith.constant 0 : i32
    %10 = arith.cmpi slt, %3, %c0_i32_2 : i32
    %11 = vector.broadcast %10 : i1 to vector<16x1xi1>
    %12 = vector.broadcast %11 : vector<16x1xi1> to vector<16x1xi1>
    %13 = arith.xori %9, %12 : vector<16x1xi1>
    %14 = arith.andi %13, %7 : vector<16x1xi1>
    %15 = vector.broadcast %3 : i32 to vector<16x1xi32>
    %16 = arith.addi %5, %15 : vector<16x1xi32>
    %17 = arith.select %14, %16, %5 : vector<16x1xi1>, vector<16x1xi32>
    %c0 = arith.constant 0 : index
    %c0_3 = arith.constant 0 : index
    %18 = vector.load %arg0[%c0, %c0_3] : memref<16x1xi32, #tpu.memory_space<vmem>>, vector<16x1xi32>
    %19 = vector.broadcast %18 : vector<16x1xi32> to vector<16x60xi32>
    %20 = arith.cmpi eq, %0, %19 : vector<16x60xi32>
    %c0_4 = arith.constant 0 : index
    %c0_5 = arith.constant 0 : index
    %21 = vector.load %arg1[%c0_4, %c0_5] : memref<16x1xi32, #tpu.memory_space<vmem>>, vector<16x1xi32>
    %c50_i32 = arith.constant 50 : i32
    %22 = vector.broadcast %c50_i32 : i32 to vector<16x1xi32>
    %23 = arith.addi %22, %21 : vector<16x1xi32>
    %24 = vector.broadcast %23 : vector<16x1xi32> to vector<16x60xi32>
    %25 = arith.cmpi eq, %0, %24 : vector<16x60xi32>
    %26 = arith.ori %20, %25 : vector<16x60xi1>
    %c52_i32 = arith.constant 52 : i32
    %27 = vector.broadcast %c52_i32 : i32 to vector<16x1xi32>
    %28 = arith.addi %27, %17 : vector<16x1xi32>
    %29 = vector.broadcast %28 : vector<16x1xi32> to vector<16x60xi32>
    %30 = arith.cmpi eq, %0, %29 : vector<16x60xi32>
    %31 = arith.ori %26, %30 : vector<16x60xi1>
    %32 = arith.extui %31 : vector<16x60xi1> to vector<16x60xi32>
    %33 = arith.sitofp %32 : vector<16x60xi32> to vector<16x60xf32>
    %c0_6 = arith.constant 0 : index
    %c0_7 = arith.constant 0 : index
    %34 = vector.load %arg3[%c0_6, %c0_7] : memref<68x32xf32, #tpu.memory_space<vmem>>, vector<60x32xf32>
    %cst = arith.constant dense<0.000000e+00> : vector<16x32xf32>
    %35 = tpu.matmul %33, %34, %cst {dimension_numbers = #tpu.dot_dimension_numbers<[1], [0], [0], [1], [0, 0, 1, 1], [], []>} : vector<16x60xf32>, vector<60x32xf32>, vector<16x32xf32> -> vector<16x32xf32>
    %c0_8 = arith.constant 0 : index
    %c0_9 = arith.constant 0 : index
    %36 = vector.load %arg9[%c0_8, %c0_9] : memref<35x32xf32, #tpu.memory_space<vmem>>, vector<35x32xf32>
    %37 = vector.extract_strided_slice %36 {offsets = [33, 0], sizes = [1, 32], strides = [1, 1]} : vector<35x32xf32> to vector<1x32xf32>
    %38 = vector.extract_strided_slice %36 {offsets = [34, 0], sizes = [1, 32], strides = [1, 1]} : vector<35x32xf32> to vector<1x32xf32>
    %cst_10 = arith.constant dense<0.000000e+00> : vector<16xf32>
    %39 = vector.multi_reduction <add>, %35, %cst_10 [1] : vector<16x32xf32> to vector<16xf32>
    %40 = vector.shape_cast %39 : vector<16xf32> to vector<16x1xf32>
    %cst_11 = arith.constant 3.200000e+01 : f32
    %41 = vector.broadcast %cst_11 : f32 to vector<16x1xf32>
    %42 = arith.divf %40, %41 : vector<16x1xf32>
    %43 = vector.broadcast %42 : vector<16x1xf32> to vector<16x32xf32>
    %44 = arith.subf %35, %43 : vector<16x32xf32>
    %45 = arith.mulf %44, %44 : vector<16x32xf32>
    %cst_12 = arith.constant dense<0.000000e+00> : vector<16xf32>
    %46 = vector.multi_reduction <add>, %45, %cst_12 [1] : vector<16x32xf32> to vector<16xf32>
    %47 = vector.shape_cast %46 : vector<16xf32> to vector<16x1xf32>
    %cst_13 = arith.constant 3.200000e+01 : f32
    %48 = vector.broadcast %cst_13 : f32 to vector<16x1xf32>
    %49 = arith.divf %47, %48 : vector<16x1xf32>
    %cst_14 = arith.constant 9.99999996E-13 : f32
    %50 = vector.broadcast %cst_14 : f32 to vector<16x1xf32>
    %51 = arith.addf %49, %50 : vector<16x1xf32>
    %52 = math.rsqrt %51 : vector<16x1xf32>
    %53 = vector.broadcast %52 : vector<16x1xf32> to vector<16x32xf32>
    %54 = arith.mulf %44, %53 : vector<16x32xf32>
    %55 = vector.broadcast %37 : vector<1x32xf32> to vector<16x32xf32>
    %56 = arith.mulf %54, %55 : vector<16x32xf32>
    %57 = vector.broadcast %38 : vector<1x32xf32> to vector<16x32xf32>
    %58 = arith.addf %56, %57 : vector<16x32xf32>
    %59 = vector.extract_strided_slice %58 {offsets = [0, 0], sizes = [8, 32], strides = [1, 1]} : vector<16x32xf32> to vector<8x32xf32>
    %cst_15 = arith.constant 0.000000e+00 : f32
    %60 = vector.broadcast %cst_15 : f32 to vector<8x32xf32>
    %c0_16 = arith.constant 0 : index
    %c0_17 = arith.constant 0 : index
    %c0_18 = arith.constant 0 : index
    %61 = vector.load %arg4[%c0_16, %c0_17, %c0_18] : memref<12x32x16xf32, #tpu.memory_space<vmem>>, vector<1x32x16xf32>
    %62 = vector.shape_cast %61 : vector<1x32x16xf32> to vector<32x16xf32>
    %cst_19 = arith.constant dense<0.000000e+00> : vector<8x16xf32>
    %63 = tpu.matmul %59, %62, %cst_19 {dimension_numbers = #tpu.dot_dimension_numbers<[1], [0], [0], [1], [0, 0, 1, 1], [], []>} : vector<8x32xf32>, vector<32x16xf32>, vector<8x16xf32> -> vector<8x16xf32>
    %c0_20 = arith.constant 0 : index
    %c0_21 = arith.constant 0 : index
    %64 = vector.load %arg5[%c0_20, %c0_21] : memref<12x16xf32, #tpu.memory_space<vmem>>, vector<1x16xf32>
    %65 = vector.broadcast %64 : vector<1x16xf32> to vector<8x16xf32>
    %66 = arith.addf %63, %65 : vector<8x16xf32>
    %c2 = arith.constant 2 : index
    %c0_22 = arith.constant 0 : index
    %c0_23 = arith.constant 0 : index
    %67 = vector.load %arg4[%c2, %c0_22, %c0_23] : memref<12x32x16xf32, #tpu.memory_space<vmem>>, vector<1x32x16xf32>
    %68 = vector.shape_cast %67 : vector<1x32x16xf32> to vector<32x16xf32>
    %cst_24 = arith.constant dense<0.000000e+00> : vector<8x16xf32>
    %69 = tpu.matmul %59, %68, %cst_24 {dimension_numbers = #tpu.dot_dimension_numbers<[1], [0], [0], [1], [0, 0, 1, 1], [], []>} : vector<8x32xf32>, vector<32x16xf32>, vector<8x16xf32> -> vector<8x16xf32>
    %c2_25 = arith.constant 2 : index
    %c0_26 = arith.constant 0 : index
    %70 = vector.load %arg5[%c2_25, %c0_26] : memref<12x16xf32, #tpu.memory_space<vmem>>, vector<1x16xf32>
    %71 = vector.broadcast %70 : vector<1x16xf32> to vector<8x16xf32>
    %72 = arith.addf %69, %71 : vector<8x16xf32>
    %c4 = arith.constant 4 : index
    %c0_27 = arith.constant 0 : index
    %c0_28 = arith.constant 0 : index
    %73 = vector.load %arg4[%c4, %c0_27, %c0_28] : memref<12x32x16xf32, #tpu.memory_space<vmem>>, vector<1x32x16xf32>
    %74 = vector.shape_cast %73 : vector<1x32x16xf32> to vector<32x16xf32>
    %cst_29 = arith.constant dense<0.000000e+00> : vector<8x16xf32>
    %75 = tpu.matmul %59, %74, %cst_29 {dimension_numbers = #tpu.dot_dimension_numbers<[1], [0], [0], [1], [0, 0, 1, 1], [], []>} : vector<8x32xf32>, vector<32x16xf32>, vector<8x16xf32> -> vector<8x16xf32>
    %c4_30 = arith.constant 4 : index
    %c0_31 = arith.constant 0 : index
    %76 = vector.load %arg5[%c4_30, %c0_31] : memref<12x16xf32, #tpu.memory_space<vmem>>, vector<1x16xf32>
    %77 = vector.broadcast %76 : vector<1x16xf32> to vector<8x16xf32>
    %78 = arith.addf %75, %77 : vector<8x16xf32>
    %cst_32 = arith.constant dense<0.000000e+00> : vector<8x8xf32>
    %79 = tpu.matmul %66, %72, %cst_32 {dimension_numbers = #tpu.dot_dimension_numbers<[1], [1], [0], [0], [0, 0, 1, 0], [], []>} : vector<8x16xf32>, vector<8x16xf32>, vector<8x8xf32> -> vector<8x8xf32>
    %cst_33 = arith.constant 2.500000e-01 : f32
    %80 = vector.broadcast %cst_33 : f32 to vector<8x8xf32>
    %81 = arith.mulf %79, %80 : vector<8x8xf32>
    %cst_34 = arith.constant dense<0xFF800000> : vector<8xf32>
    %82 = vector.multi_reduction <maximumf>, %81, %cst_34 [1] : vector<8x8xf32> to vector<8xf32>
    %83 = vector.shape_cast %82 : vector<8xf32> to vector<8x1xf32>
    %84 = vector.broadcast %83 : vector<8x1xf32> to vector<8x8xf32>
    %85 = arith.subf %81, %84 : vector<8x8xf32>
    %86 = math.exp %85 : vector<8x8xf32>
    %cst_35 = arith.constant dense<0.000000e+00> : vector<8xf32>
    %87 = vector.multi_reduction <add>, %86, %cst_35 [1] : vector<8x8xf32> to vector<8xf32>
    %88 = vector.shape_cast %87 : vector<8xf32> to vector<8x1xf32>
    %89 = tpu.reciprocal %88 {approx = true} : vector<8x1xf32> -> vector<8x1xf32>
    %90 = vector.broadcast %89 : vector<8x1xf32> to vector<8x8xf32>
    %91 = arith.mulf %86, %90 : vector<8x8xf32>
    %cst_36 = arith.constant dense<0.000000e+00> : vector<8x16xf32>
    %92 = tpu.matmul %91, %78, %cst_36 {dimension_numbers = #tpu.dot_dimension_numbers<[1], [0], [0], [1], [0, 0, 1, 1], [], []>} : vector<8x8xf32>, vector<8x16xf32>, vector<8x16xf32> -> vector<8x16xf32>
    %c0_37 = arith.constant 0 : index
    %c0_38 = arith.constant 0 : index
    %c0_39 = arith.constant 0 : index
    %93 = vector.load %arg6[%c0_37, %c0_38, %c0_39] : memref<4x16x32xf32, #tpu.memory_space<vmem>>, vector<1x16x32xf32>
    %94 = vector.shape_cast %93 : vector<1x16x32xf32> to vector<16x32xf32>
    %cst_40 = arith.constant dense<0.000000e+00> : vector<8x32xf32>
    %95 = tpu.matmul %92, %94, %cst_40 {dimension_numbers = #tpu.dot_dimension_numbers<[1], [0], [0], [1], [0, 0, 1, 1], [], []>} : vector<8x16xf32>, vector<16x32xf32>, vector<8x32xf32> -> vector<8x32xf32>
    %96 = arith.addf %60, %95 : vector<8x32xf32>
    %c1 = arith.constant 1 : index
    %c0_41 = arith.constant 0 : index
    %c0_42 = arith.constant 0 : index
    %97 = vector.load %arg4[%c1, %c0_41, %c0_42] : memref<12x32x16xf32, #tpu.memory_space<vmem>>, vector<1x32x16xf32>
    %98 = vector.shape_cast %97 : vector<1x32x16xf32> to vector<32x16xf32>
    %cst_43 = arith.constant dense<0.000000e+00> : vector<8x16xf32>
    %99 = tpu.matmul %59, %98, %cst_43 {dimension_numbers = #tpu.dot_dimension_numbers<[1], [0], [0], [1], [0, 0, 1, 1], [], []>} : vector<8x32xf32>, vector<32x16xf32>, vector<8x16xf32> -> vector<8x16xf32>
    %c1_44 = arith.constant 1 : index
    %c0_45 = arith.constant 0 : index
    %100 = vector.load %arg5[%c1_44, %c0_45] : memref<12x16xf32, #tpu.memory_space<vmem>>, vector<1x16xf32>
    %101 = vector.broadcast %100 : vector<1x16xf32> to vector<8x16xf32>
    %102 = arith.addf %99, %101 : vector<8x16xf32>
    %c3 = arith.constant 3 : index
    %c0_46 = arith.constant 0 : index
    %c0_47 = arith.constant 0 : index
    %103 = vector.load %arg4[%c3, %c0_46, %c0_47] : memref<12x32x16xf32, #tpu.memory_space<vmem>>, vector<1x32x16xf32>
    %104 = vector.shape_cast %103 : vector<1x32x16xf32> to vector<32x16xf32>
    %cst_48 = arith.constant dense<0.000000e+00> : vector<8x16xf32>
    %105 = tpu.matmul %59, %104, %cst_48 {dimension_numbers = #tpu.dot_dimension_numbers<[1], [0], [0], [1], [0, 0, 1, 1], [], []>} : vector<8x32xf32>, vector<32x16xf32>, vector<8x16xf32> -> vector<8x16xf32>
    %c3_49 = arith.constant 3 : index
    %c0_50 = arith.constant 0 : index
    %106 = vector.load %arg5[%c3_49, %c0_50] : memref<12x16xf32, #tpu.memory_space<vmem>>, vector<1x16xf32>
    %107 = vector.broadcast %106 : vector<1x16xf32> to vector<8x16xf32>
    %108 = arith.addf %105, %107 : vector<8x16xf32>
    %c5 = arith.constant 5 : index
    %c0_51 = arith.constant 0 : index
    %c0_52 = arith.constant 0 : index
    %109 = vector.load %arg4[%c5, %c0_51, %c0_52] : memref<12x32x16xf32, #tpu.memory_space<vmem>>, vector<1x32x16xf32>
    %110 = vector.shape_cast %109 : vector<1x32x16xf32> to vector<32x16xf32>
    %cst_53 = arith.constant dense<0.000000e+00> : vector<8x16xf32>
    %111 = tpu.matmul %59, %110, %cst_53 {dimension_numbers = #tpu.dot_dimension_numbers<[1], [0], [0], [1], [0, 0, 1, 1], [], []>} : vector<8x32xf32>, vector<32x16xf32>, vector<8x16xf32> -> vector<8x16xf32>
    %c5_54 = arith.constant 5 : index
    %c0_55 = arith.constant 0 : index
    %112 = vector.load %arg5[%c5_54, %c0_55] : memref<12x16xf32, #tpu.memory_space<vmem>>, vector<1x16xf32>
    %113 = vector.broadcast %112 : vector<1x16xf32> to vector<8x16xf32>
    %114 = arith.addf %111, %113 : vector<8x16xf32>
    %cst_56 = arith.constant dense<0.000000e+00> : vector<8x8xf32>
    %115 = tpu.matmul %102, %108, %cst_56 {dimension_numbers = #tpu.dot_dimension_numbers<[1], [1], [0], [0], [0, 0, 1, 0], [], []>} : vector<8x16xf32>, vector<8x16xf32>, vector<8x8xf32> -> vector<8x8xf32>
    %cst_57 = arith.constant 2.500000e-01 : f32
    %116 = vector.broadcast %cst_57 : f32 to vector<8x8xf32>
    %117 = arith.mulf %115, %116 : vector<8x8xf32>
    %cst_58 = arith.constant dense<0xFF800000> : vector<8xf32>
    %118 = vector.multi_reduction <maximumf>, %117, %cst_58 [1] : vector<8x8xf32> to vector<8xf32>
    %119 = vector.shape_cast %118 : vector<8xf32> to vector<8x1xf32>
    %120 = vector.broadcast %119 : vector<8x1xf32> to vector<8x8xf32>
    %121 = arith.subf %117, %120 : vector<8x8xf32>
    %122 = math.exp %121 : vector<8x8xf32>
    %cst_59 = arith.constant dense<0.000000e+00> : vector<8xf32>
    %123 = vector.multi_reduction <add>, %122, %cst_59 [1] : vector<8x8xf32> to vector<8xf32>
    %124 = vector.shape_cast %123 : vector<8xf32> to vector<8x1xf32>
    %125 = tpu.reciprocal %124 {approx = true} : vector<8x1xf32> -> vector<8x1xf32>
    %126 = vector.broadcast %125 : vector<8x1xf32> to vector<8x8xf32>
    %127 = arith.mulf %122, %126 : vector<8x8xf32>
    %cst_60 = arith.constant dense<0.000000e+00> : vector<8x16xf32>
    %128 = tpu.matmul %127, %114, %cst_60 {dimension_numbers = #tpu.dot_dimension_numbers<[1], [0], [0], [1], [0, 0, 1, 1], [], []>} : vector<8x8xf32>, vector<8x16xf32>, vector<8x16xf32> -> vector<8x16xf32>
    %c1_61 = arith.constant 1 : index
    %c0_62 = arith.constant 0 : index
    %c0_63 = arith.constant 0 : index
    %129 = vector.load %arg6[%c1_61, %c0_62, %c0_63] : memref<4x16x32xf32, #tpu.memory_space<vmem>>, vector<1x16x32xf32>
    %130 = vector.shape_cast %129 : vector<1x16x32xf32> to vector<16x32xf32>
    %cst_64 = arith.constant dense<0.000000e+00> : vector<8x32xf32>
    %131 = tpu.matmul %128, %130, %cst_64 {dimension_numbers = #tpu.dot_dimension_numbers<[1], [0], [0], [1], [0, 0, 1, 1], [], []>} : vector<8x16xf32>, vector<16x32xf32>, vector<8x32xf32> -> vector<8x32xf32>
    %132 = arith.addf %96, %131 : vector<8x32xf32>
    %133 = arith.addf %132, %59 : vector<8x32xf32>
    %c0_65 = arith.constant 0 : index
    %c0_66 = arith.constant 0 : index
    %134 = vector.load %arg12[%c0_65, %c0_66] : memref<16x32xf32, #tpu.memory_space<vmem>>, vector<8x32xf32>
    tpu.vector_store %arg12[%c0_65, %c0_66], %133 {strides = array<i32>} : memref<16x32xf32, #tpu.memory_space<vmem>>, vector<8x32xf32>,
    %135 = vector.extract_strided_slice %58 {offsets = [8, 0], sizes = [8, 32], strides = [1, 1]} : vector<16x32xf32> to vector<8x32xf32>
    %cst_67 = arith.constant 0.000000e+00 : f32
    %136 = vector.broadcast %cst_67 : f32 to vector<8x32xf32>
    %c0_68 = arith.constant 0 : index
    %c0_69 = arith.constant 0 : index
    %c0_70 = arith.constant 0 : index
    %137 = vector.load %arg4[%c0_68, %c0_69, %c0_70] : memref<12x32x16xf32, #tpu.memory_space<vmem>>, vector<1x32x16xf32>
    %138 = vector.shape_cast %137 : vector<1x32x16xf32> to vector<32x16xf32>
    %cst_71 = arith.constant dense<0.000000e+00> : vector<8x16xf32>
    %139 = tpu.matmul %135, %138, %cst_71 {dimension_numbers = #tpu.dot_dimension_numbers<[1], [0], [0], [1], [0, 0, 1, 1], [], []>} : vector<8x32xf32>, vector<32x16xf32>, vector<8x16xf32> -> vector<8x16xf32>
    %c0_72 = arith.constant 0 : index
    %c0_73 = arith.constant 0 : index
    %140 = vector.load %arg5[%c0_72, %c0_73] : memref<12x16xf32, #tpu.memory_space<vmem>>, vector<1x16xf32>
    %141 = vector.broadcast %140 : vector<1x16xf32> to vector<8x16xf32>
    %142 = arith.addf %139, %141 : vector<8x16xf32>
    %c2_74 = arith.constant 2 : index
    %c0_75 = arith.constant 0 : index
    %c0_76 = arith.constant 0 : index
    %143 = vector.load %arg4[%c2_74, %c0_75, %c0_76] : memref<12x32x16xf32, #tpu.memory_space<vmem>>, vector<1x32x16xf32>
    %144 = vector.shape_cast %143 : vector<1x32x16xf32> to vector<32x16xf32>
    %cst_77 = arith.constant dense<0.000000e+00> : vector<8x16xf32>
    %145 = tpu.matmul %135, %144, %cst_77 {dimension_numbers = #tpu.dot_dimension_numbers<[1], [0], [0], [1], [0, 0, 1, 1], [], []>} : vector<8x32xf32>, vector<32x16xf32>, vector<8x16xf32> -> vector<8x16xf32>
    %c2_78 = arith.constant 2 : index
    %c0_79 = arith.constant 0 : index
    %146 = vector.load %arg5[%c2_78, %c0_79] : memref<12x16xf32, #tpu.memory_space<vmem>>, vector<1x16xf32>
    %147 = vector.broadcast %146 : vector<1x16xf32> to vector<8x16xf32>
    %148 = arith.addf %145, %147 : vector<8x16xf32>
    %c4_80 = arith.constant 4 : index
    %c0_81 = arith.constant 0 : index
    %c0_82 = arith.constant 0 : index
    %149 = vector.load %arg4[%c4_80, %c0_81, %c0_82] : memref<12x32x16xf32, #tpu.memory_space<vmem>>, vector<1x32x16xf32>
    %150 = vector.shape_cast %149 : vector<1x32x16xf32> to vector<32x16xf32>
    %cst_83 = arith.constant dense<0.000000e+00> : vector<8x16xf32>
    %151 = tpu.matmul %135, %150, %cst_83 {dimension_numbers = #tpu.dot_dimension_numbers<[1], [0], [0], [1], [0, 0, 1, 1], [], []>} : vector<8x32xf32>, vector<32x16xf32>, vector<8x16xf32> -> vector<8x16xf32>
    %c4_84 = arith.constant 4 : index
    %c0_85 = arith.constant 0 : index
    %152 = vector.load %arg5[%c4_84, %c0_85] : memref<12x16xf32, #tpu.memory_space<vmem>>, vector<1x16xf32>
    %153 = vector.broadcast %152 : vector<1x16xf32> to vector<8x16xf32>
    %154 = arith.addf %151, %153 : vector<8x16xf32>
    %cst_86 = arith.constant dense<0.000000e+00> : vector<8x8xf32>
    %155 = tpu.matmul %142, %148, %cst_86 {dimension_numbers = #tpu.dot_dimension_numbers<[1], [1], [0], [0], [0, 0, 1, 0], [], []>} : vector<8x16xf32>, vector<8x16xf32>, vector<8x8xf32> -> vector<8x8xf32>
    %cst_87 = arith.constant 2.500000e-01 : f32
    %156 = vector.broadcast %cst_87 : f32 to vector<8x8xf32>
    %157 = arith.mulf %155, %156 : vector<8x8xf32>
    %cst_88 = arith.constant dense<0xFF800000> : vector<8xf32>
    %158 = vector.multi_reduction <maximumf>, %157, %cst_88 [1] : vector<8x8xf32> to vector<8xf32>
    %159 = vector.shape_cast %158 : vector<8xf32> to vector<8x1xf32>
    %160 = vector.broadcast %159 : vector<8x1xf32> to vector<8x8xf32>
    %161 = arith.subf %157, %160 : vector<8x8xf32>
    %162 = math.exp %161 : vector<8x8xf32>
    %cst_89 = arith.constant dense<0.000000e+00> : vector<8xf32>
    %163 = vector.multi_reduction <add>, %162, %cst_89 [1] : vector<8x8xf32> to vector<8xf32>
    %164 = vector.shape_cast %163 : vector<8xf32> to vector<8x1xf32>
    %165 = tpu.reciprocal %164 {approx = true} : vector<8x1xf32> -> vector<8x1xf32>
    %166 = vector.broadcast %165 : vector<8x1xf32> to vector<8x8xf32>
    %167 = arith.mulf %162, %166 : vector<8x8xf32>
    %cst_90 = arith.constant dense<0.000000e+00> : vector<8x16xf32>
    %168 = tpu.matmul %167, %154, %cst_90 {dimension_numbers = #tpu.dot_dimension_numbers<[1], [0], [0], [1], [0, 0, 1, 1], [], []>} : vector<8x8xf32>, vector<8x16xf32>, vector<8x16xf32> -> vector<8x16xf32>
    %c0_91 = arith.constant 0 : index
    %c0_92 = arith.constant 0 : index
    %c0_93 = arith.constant 0 : index
    %169 = vector.load %arg6[%c0_91, %c0_92, %c0_93] : memref<4x16x32xf32, #tpu.memory_space<vmem>>, vector<1x16x32xf32>
    %170 = vector.shape_cast %169 : vector<1x16x32xf32> to vector<16x32xf32>
    %cst_94 = arith.constant dense<0.000000e+00> : vector<8x32xf32>
    %171 = tpu.matmul %168, %170, %cst_94 {dimension_numbers = #tpu.dot_dimension_numbers<[1], [0], [0], [1], [0, 0, 1, 1], [], []>} : vector<8x16xf32>, vector<16x32xf32>, vector<8x32xf32> -> vector<8x32xf32>
    %172 = arith.addf %136, %171 : vector<8x32xf32>
    %c1_95 = arith.constant 1 : index
    %c0_96 = arith.constant 0 : index
    %c0_97 = arith.constant 0 : index
    %173 = vector.load %arg4[%c1_95, %c0_96, %c0_97] : memref<12x32x16xf32, #tpu.memory_space<vmem>>, vector<1x32x16xf32>
    %174 = vector.shape_cast %173 : vector<1x32x16xf32> to vector<32x16xf32>
    %cst_98 = arith.constant dense<0.000000e+00> : vector<8x16xf32>
    %175 = tpu.matmul %135, %174, %cst_98 {dimension_numbers = #tpu.dot_dimension_numbers<[1], [0], [0], [1], [0, 0, 1, 1], [], []>} : vector<8x32xf32>, vector<32x16xf32>, vector<8x16xf32> -> vector<8x16xf32>
    %c1_99 = arith.constant 1 : index
    %c0_100 = arith.constant 0 : index
    %176 = vector.load %arg5[%c1_99, %c0_100] : memref<12x16xf32, #tpu.memory_space<vmem>>, vector<1x16xf32>
    %177 = vector.broadcast %176 : vector<1x16xf32> to vector<8x16xf32>
    %178 = arith.addf %175, %177 : vector<8x16xf32>
    %c3_101 = arith.constant 3 : index
    %c0_102 = arith.constant 0 : index
    %c0_103 = arith.constant 0 : index
    %179 = vector.load %arg4[%c3_101, %c0_102, %c0_103] : memref<12x32x16xf32, #tpu.memory_space<vmem>>, vector<1x32x16xf32>
    %180 = vector.shape_cast %179 : vector<1x32x16xf32> to vector<32x16xf32>
    %cst_104 = arith.constant dense<0.000000e+00> : vector<8x16xf32>
    %181 = tpu.matmul %135, %180, %cst_104 {dimension_numbers = #tpu.dot_dimension_numbers<[1], [0], [0], [1], [0, 0, 1, 1], [], []>} : vector<8x32xf32>, vector<32x16xf32>, vector<8x16xf32> -> vector<8x16xf32>
    %c3_105 = arith.constant 3 : index
    %c0_106 = arith.constant 0 : index
    %182 = vector.load %arg5[%c3_105, %c0_106] : memref<12x16xf32, #tpu.memory_space<vmem>>, vector<1x16xf32>
    %183 = vector.broadcast %182 : vector<1x16xf32> to vector<8x16xf32>
    %184 = arith.addf %181, %183 : vector<8x16xf32>
    %c5_107 = arith.constant 5 : index
    %c0_108 = arith.constant 0 : index
    %c0_109 = arith.constant 0 : index
    %185 = vector.load %arg4[%c5_107, %c0_108, %c0_109] : memref<12x32x16xf32, #tpu.memory_space<vmem>>, vector<1x32x16xf32>
    %186 = vector.shape_cast %185 : vector<1x32x16xf32> to vector<32x16xf32>
    %cst_110 = arith.constant dense<0.000000e+00> : vector<8x16xf32>
    %187 = tpu.matmul %135, %186, %cst_110 {dimension_numbers = #tpu.dot_dimension_numbers<[1], [0], [0], [1], [0, 0, 1, 1], [], []>} : vector<8x32xf32>, vector<32x16xf32>, vector<8x16xf32> -> vector<8x16xf32>
    %c5_111 = arith.constant 5 : index
    %c0_112 = arith.constant 0 : index
    %188 = vector.load %arg5[%c5_111, %c0_112] : memref<12x16xf32, #tpu.memory_space<vmem>>, vector<1x16xf32>
    %189 = vector.broadcast %188 : vector<1x16xf32> to vector<8x16xf32>
    %190 = arith.addf %187, %189 : vector<8x16xf32>
    %cst_113 = arith.constant dense<0.000000e+00> : vector<8x8xf32>
    %191 = tpu.matmul %178, %184, %cst_113 {dimension_numbers = #tpu.dot_dimension_numbers<[1], [1], [0], [0], [0, 0, 1, 0], [], []>} : vector<8x16xf32>, vector<8x16xf32>, vector<8x8xf32> -> vector<8x8xf32>
    %cst_114 = arith.constant 2.500000e-01 : f32
    %192 = vector.broadcast %cst_114 : f32 to vector<8x8xf32>
    %193 = arith.mulf %191, %192 : vector<8x8xf32>
    %cst_115 = arith.constant dense<0xFF800000> : vector<8xf32>
    %194 = vector.multi_reduction <maximumf>, %193, %cst_115 [1] : vector<8x8xf32> to vector<8xf32>
    %195 = vector.shape_cast %194 : vector<8xf32> to vector<8x1xf32>
    %196 = vector.broadcast %195 : vector<8x1xf32> to vector<8x8xf32>
    %197 = arith.subf %193, %196 : vector<8x8xf32>
    %198 = math.exp %197 : vector<8x8xf32>
    %cst_116 = arith.constant dense<0.000000e+00> : vector<8xf32>
    %199 = vector.multi_reduction <add>, %198, %cst_116 [1] : vector<8x8xf32> to vector<8xf32>
    %200 = vector.shape_cast %199 : vector<8xf32> to vector<8x1xf32>
    %201 = tpu.reciprocal %200 {approx = true} : vector<8x1xf32> -> vector<8x1xf32>
    %202 = vector.broadcast %201 : vector<8x1xf32> to vector<8x8xf32>
    %203 = arith.mulf %198, %202 : vector<8x8xf32>
    %cst_117 = arith.constant dense<0.000000e+00> : vector<8x16xf32>
    %204 = tpu.matmul %203, %190, %cst_117 {dimension_numbers = #tpu.dot_dimension_numbers<[1], [0], [0], [1], [0, 0, 1, 1], [], []>} : vector<8x8xf32>, vector<8x16xf32>, vector<8x16xf32> -> vector<8x16xf32>
    %c1_118 = arith.constant 1 : index
    %c0_119 = arith.constant 0 : index
    %c0_120 = arith.constant 0 : index
    %205 = vector.load %arg6[%c1_118, %c0_119, %c0_120] : memref<4x16x32xf32, #tpu.memory_space<vmem>>, vector<1x16x32xf32>
    %206 = vector.shape_cast %205 : vector<1x16x32xf32> to vector<16x32xf32>
    %cst_121 = arith.constant dense<0.000000e+00> : vector<8x32xf32>
    %207 = tpu.matmul %204, %206, %cst_121 {dimension_numbers = #tpu.dot_dimension_numbers<[1], [0], [0], [1], [0, 0, 1, 1], [], []>} : vector<8x16xf32>, vector<16x32xf32>, vector<8x32xf32> -> vector<8x32xf32>
    %208 = arith.addf %172, %207 : vector<8x32xf32>
    %209 = arith.addf %208, %135 : vector<8x32xf32>
    %c8 = arith.constant 8 : index
    %c0_122 = arith.constant 0 : index
    %210 = vector.load %arg12[%c8, %c0_122] : memref<16x32xf32, #tpu.memory_space<vmem>>, vector<8x32xf32>
    tpu.vector_store %arg12[%c8, %c0_122], %209 {strides = array<i32>} : memref<16x32xf32, #tpu.memory_space<vmem>>, vector<8x32xf32>,
    %c0_123 = arith.constant 0 : index
    %c0_124 = arith.constant 0 : index
    %c0_125 = arith.constant 0 : index
    %211 = vector.load %arg8[%c0_123, %c0_124, %c0_125] : memref<2x70x32xf32, #tpu.memory_space<vmem>>, vector<1x70x32xf32>
    %212 = vector.shape_cast %211 : vector<1x70x32xf32> to vector<70x32xf32>
    %c0_126 = arith.constant 0 : index
    %c0_127 = arith.constant 0 : index
    %213 = vector.load %arg12[%c0_126, %c0_127] : memref<16x32xf32, #tpu.memory_space<vmem>>, vector<16x32xf32>
    %214 = vector.extract_strided_slice %212 {offsets = [64, 0], sizes = [1, 32], strides = [1, 1]} : vector<70x32xf32> to vector<1x32xf32>
    %215 = vector.broadcast %214 : vector<1x32xf32> to vector<16x32xf32>
    %216 = arith.addf %213, %215 : vector<16x32xf32>
    %217 = vector.extract_strided_slice %212 {offsets = [65, 0], sizes = [1, 32], strides = [1, 1]} : vector<70x32xf32> to vector<1x32xf32>
    %218 = vector.extract_strided_slice %212 {offsets = [66, 0], sizes = [1, 32], strides = [1, 1]} : vector<70x32xf32> to vector<1x32xf32>
    %cst_128 = arith.constant dense<0.000000e+00> : vector<16xf32>
    %219 = vector.multi_reduction <add>, %216, %cst_128 [1] : vector<16x32xf32> to vector<16xf32>
    %220 = vector.shape_cast %219 : vector<16xf32> to vector<16x1xf32>
    %cst_129 = arith.constant 3.200000e+01 : f32
    %221 = vector.broadcast %cst_129 : f32 to vector<16x1xf32>
    %222 = arith.divf %220, %221 : vector<16x1xf32>
    %223 = vector.broadcast %222 : vector<16x1xf32> to vector<16x32xf32>
    %224 = arith.subf %216, %223 : vector<16x32xf32>
    %225 = arith.mulf %224, %224 : vector<16x32xf32>
    %cst_130 = arith.constant dense<0.000000e+00> : vector<16xf32>
    %226 = vector.multi_reduction <add>, %225, %cst_130 [1] : vector<16x32xf32> to vector<16xf32>
    %227 = vector.shape_cast %226 : vector<16xf32> to vector<16x1xf32>
    %cst_131 = arith.constant 3.200000e+01 : f32
    %228 = vector.broadcast %cst_131 : f32 to vector<16x1xf32>
    %229 = arith.divf %227, %228 : vector<16x1xf32>
    %cst_132 = arith.constant 9.99999996E-13 : f32
    %230 = vector.broadcast %cst_132 : f32 to vector<16x1xf32>
    %231 = arith.addf %229, %230 : vector<16x1xf32>
    %232 = math.rsqrt %231 : vector<16x1xf32>
    %233 = vector.broadcast %232 : vector<16x1xf32> to vector<16x32xf32>
    %234 = arith.mulf %224, %233 : vector<16x32xf32>
    %235 = vector.broadcast %217 : vector<1x32xf32> to vector<16x32xf32>
    %236 = arith.mulf %234, %235 : vector<16x32xf32>
    %237 = vector.broadcast %218 : vector<1x32xf32> to vector<16x32xf32>
    %238 = arith.addf %236, %237 : vector<16x32xf32>
    %c0_133 = arith.constant 0 : index
    %c0_134 = arith.constant 0 : index
    %c0_135 = arith.constant 0 : index
    %239 = vector.load %arg7[%c0_133, %c0_134, %c0_135] : memref<2x33x64xf32, #tpu.memory_space<vmem>>, vector<1x33x64xf32>
    %240 = vector.shape_cast %239 : vector<1x33x64xf32> to vector<33x64xf32>
    %241 = vector.extract_strided_slice %240 {offsets = [0, 0], sizes = [32, 64], strides = [1, 1]} : vector<33x64xf32> to vector<32x64xf32>
    %cst_136 = arith.constant dense<0.000000e+00> : vector<16x64xf32>
    %242 = tpu.matmul %238, %241, %cst_136 {dimension_numbers = #tpu.dot_dimension_numbers<[1], [0], [0], [1], [0, 0, 1, 1], [], []>} : vector<16x32xf32>, vector<32x64xf32>, vector<16x64xf32> -> vector<16x64xf32>
    %243 = vector.extract_strided_slice %240 {offsets = [32, 0], sizes = [1, 64], strides = [1, 1]} : vector<33x64xf32> to vector<1x64xf32>
    %244 = vector.broadcast %243 : vector<1x64xf32> to vector<16x64xf32>
    %245 = arith.addf %242, %244 : vector<16x64xf32>
    %cst_137 = arith.constant 5.000000e-01 : f32
    %246 = vector.broadcast %cst_137 : f32 to vector<16x64xf32>
    %247 = arith.mulf %246, %245 : vector<16x64xf32>
    %cst_138 = arith.constant 4.471500e-02 : f32
    %248 = vector.broadcast %cst_138 : f32 to vector<16x64xf32>
    %249 = arith.mulf %248, %245 : vector<16x64xf32>
    %250 = arith.mulf %249, %245 : vector<16x64xf32>
    %251 = arith.mulf %250, %245 : vector<16x64xf32>
    %252 = arith.addf %245, %251 : vector<16x64xf32>
    %cst_139 = arith.constant 0.797884583 : f32
    %253 = vector.broadcast %cst_139 : f32 to vector<16x64xf32>
    %254 = arith.mulf %253, %252 : vector<16x64xf32>
    %255 = math.tanh %254 : vector<16x64xf32>
    %cst_140 = arith.constant 1.000000e+00 : f32
    %256 = vector.broadcast %cst_140 : f32 to vector<16x64xf32>
    %257 = arith.addf %256, %255 : vector<16x64xf32>
    %258 = arith.mulf %247, %257 : vector<16x64xf32>
    %259 = vector.extract_strided_slice %212 {offsets = [0, 0], sizes = [64, 32], strides = [1, 1]} : vector<70x32xf32> to vector<64x32xf32>
    %cst_141 = arith.constant dense<0.000000e+00> : vector<16x32xf32>
    %260 = tpu.matmul %258, %259, %cst_141 {dimension_numbers = #tpu.dot_dimension_numbers<[1], [0], [0], [1], [0, 0, 1, 1], [], []>} : vector<16x64xf32>, vector<64x32xf32>, vector<16x32xf32> -> vector<16x32xf32>
    %261 = vector.extract_strided_slice %212 {offsets = [67, 0], sizes = [1, 32], strides = [1, 1]} : vector<70x32xf32> to vector<1x32xf32>
    %262 = vector.broadcast %261 : vector<1x32xf32> to vector<16x32xf32>
    %263 = arith.addf %260, %262 : vector<16x32xf32>
    %264 = arith.addf %263, %238 : vector<16x32xf32>
    %265 = vector.extract_strided_slice %212 {offsets = [68, 0], sizes = [1, 32], strides = [1, 1]} : vector<70x32xf32> to vector<1x32xf32>
    %266 = vector.extract_strided_slice %212 {offsets = [69, 0], sizes = [1, 32], strides = [1, 1]} : vector<70x32xf32> to vector<1x32xf32>
    %cst_142 = arith.constant dense<0.000000e+00> : vector<16xf32>
    %267 = vector.multi_reduction <add>, %264, %cst_142 [1] : vector<16x32xf32> to vector<16xf32>
    %268 = vector.shape_cast %267 : vector<16xf32> to vector<16x1xf32>
    %cst_143 = arith.constant 3.200000e+01 : f32
    %269 = vector.broadcast %cst_143 : f32 to vector<16x1xf32>
    %270 = arith.divf %268, %269 : vector<16x1xf32>
    %271 = vector.broadcast %270 : vector<16x1xf32> to vector<16x32xf32>
    %272 = arith.subf %264, %271 : vector<16x32xf32>
    %273 = arith.mulf %272, %272 : vector<16x32xf32>
    %cst_144 = arith.constant dense<0.000000e+00> : vector<16xf32>
    %274 = vector.multi_reduction <add>, %273, %cst_144 [1] : vector<16x32xf32> to vector<16xf32>
    %275 = vector.shape_cast %274 : vector<16xf32> to vector<16x1xf32>
    %cst_145 = arith.constant 3.200000e+01 : f32
    %276 = vector.broadcast %cst_145 : f32 to vector<16x1xf32>
    %277 = arith.divf %275, %276 : vector<16x1xf32>
    %cst_146 = arith.constant 9.99999996E-13 : f32
    %278 = vector.broadcast %cst_146 : f32 to vector<16x1xf32>
    %279 = arith.addf %277, %278 : vector<16x1xf32>
    %280 = math.rsqrt %279 : vector<16x1xf32>
    %281 = vector.broadcast %280 : vector<16x1xf32> to vector<16x32xf32>
    %282 = arith.mulf %272, %281 : vector<16x32xf32>
    %283 = vector.broadcast %265 : vector<1x32xf32> to vector<16x32xf32>
    %284 = arith.mulf %282, %283 : vector<16x32xf32>
    %285 = vector.broadcast %266 : vector<1x32xf32> to vector<16x32xf32>
    %286 = arith.addf %284, %285 : vector<16x32xf32>
    %287 = vector.extract_strided_slice %286 {offsets = [0, 0], sizes = [8, 32], strides = [1, 1]} : vector<16x32xf32> to vector<8x32xf32>
    %cst_147 = arith.constant 0.000000e+00 : f32
    %288 = vector.broadcast %cst_147 : f32 to vector<8x32xf32>
    %c6 = arith.constant 6 : index
    %c0_148 = arith.constant 0 : index
    %c0_149 = arith.constant 0 : index
    %289 = vector.load %arg4[%c6, %c0_148, %c0_149] : memref<12x32x16xf32, #tpu.memory_space<vmem>>, vector<1x32x16xf32>
    %290 = vector.shape_cast %289 : vector<1x32x16xf32> to vector<32x16xf32>
    %cst_150 = arith.constant dense<0.000000e+00> : vector<8x16xf32>
    %291 = tpu.matmul %287, %290, %cst_150 {dimension_numbers = #tpu.dot_dimension_numbers<[1], [0], [0], [1], [0, 0, 1, 1], [], []>} : vector<8x32xf32>, vector<32x16xf32>, vector<8x16xf32> -> vector<8x16xf32>
    %c6_151 = arith.constant 6 : index
    %c0_152 = arith.constant 0 : index
    %292 = vector.load %arg5[%c6_151, %c0_152] : memref<12x16xf32, #tpu.memory_space<vmem>>, vector<1x16xf32>
    %293 = vector.broadcast %292 : vector<1x16xf32> to vector<8x16xf32>
    %294 = arith.addf %291, %293 : vector<8x16xf32>
    %c8_153 = arith.constant 8 : index
    %c0_154 = arith.constant 0 : index
    %c0_155 = arith.constant 0 : index
    %295 = vector.load %arg4[%c8_153, %c0_154, %c0_155] : memref<12x32x16xf32, #tpu.memory_space<vmem>>, vector<1x32x16xf32>
    %296 = vector.shape_cast %295 : vector<1x32x16xf32> to vector<32x16xf32>
    %cst_156 = arith.constant dense<0.000000e+00> : vector<8x16xf32>
    %297 = tpu.matmul %287, %296, %cst_156 {dimension_numbers = #tpu.dot_dimension_numbers<[1], [0], [0], [1], [0, 0, 1, 1], [], []>} : vector<8x32xf32>, vector<32x16xf32>, vector<8x16xf32> -> vector<8x16xf32>
    %c8_157 = arith.constant 8 : index
    %c0_158 = arith.constant 0 : index
    %298 = vector.load %arg5[%c8_157, %c0_158] : memref<12x16xf32, #tpu.memory_space<vmem>>, vector<1x16xf32>
    %299 = vector.broadcast %298 : vector<1x16xf32> to vector<8x16xf32>
    %300 = arith.addf %297, %299 : vector<8x16xf32>
    %c10 = arith.constant 10 : index
    %c0_159 = arith.constant 0 : index
    %c0_160 = arith.constant 0 : index
    %301 = vector.load %arg4[%c10, %c0_159, %c0_160] : memref<12x32x16xf32, #tpu.memory_space<vmem>>, vector<1x32x16xf32>
    %302 = vector.shape_cast %301 : vector<1x32x16xf32> to vector<32x16xf32>
    %cst_161 = arith.constant dense<0.000000e+00> : vector<8x16xf32>
    %303 = tpu.matmul %287, %302, %cst_161 {dimension_numbers = #tpu.dot_dimension_numbers<[1], [0], [0], [1], [0, 0, 1, 1], [], []>} : vector<8x32xf32>, vector<32x16xf32>, vector<8x16xf32> -> vector<8x16xf32>
    %c10_162 = arith.constant 10 : index
    %c0_163 = arith.constant 0 : index
    %304 = vector.load %arg5[%c10_162, %c0_163] : memref<12x16xf32, #tpu.memory_space<vmem>>, vector<1x16xf32>
    %305 = vector.broadcast %304 : vector<1x16xf32> to vector<8x16xf32>
    %306 = arith.addf %303, %305 : vector<8x16xf32>
    %cst_164 = arith.constant dense<0.000000e+00> : vector<8x8xf32>
    %307 = tpu.matmul %294, %300, %cst_164 {dimension_numbers = #tpu.dot_dimension_numbers<[1], [1], [0], [0], [0, 0, 1, 0], [], []>} : vector<8x16xf32>, vector<8x16xf32>, vector<8x8xf32> -> vector<8x8xf32>
    %cst_165 = arith.constant 2.500000e-01 : f32
    %308 = vector.broadcast %cst_165 : f32 to vector<8x8xf32>
    %309 = arith.mulf %307, %308 : vector<8x8xf32>
    %cst_166 = arith.constant dense<0xFF800000> : vector<8xf32>
    %310 = vector.multi_reduction <maximumf>, %309, %cst_166 [1] : vector<8x8xf32> to vector<8xf32>
    %311 = vector.shape_cast %310 : vector<8xf32> to vector<8x1xf32>
    %312 = vector.broadcast %311 : vector<8x1xf32> to vector<8x8xf32>
    %313 = arith.subf %309, %312 : vector<8x8xf32>
    %314 = math.exp %313 : vector<8x8xf32>
    %cst_167 = arith.constant dense<0.000000e+00> : vector<8xf32>
    %315 = vector.multi_reduction <add>, %314, %cst_167 [1] : vector<8x8xf32> to vector<8xf32>
    %316 = vector.shape_cast %315 : vector<8xf32> to vector<8x1xf32>
    %317 = tpu.reciprocal %316 {approx = true} : vector<8x1xf32> -> vector<8x1xf32>
    %318 = vector.broadcast %317 : vector<8x1xf32> to vector<8x8xf32>
    %319 = arith.mulf %314, %318 : vector<8x8xf32>
    %cst_168 = arith.constant dense<0.000000e+00> : vector<8x16xf32>
    %320 = tpu.matmul %319, %306, %cst_168 {dimension_numbers = #tpu.dot_dimension_numbers<[1], [0], [0], [1], [0, 0, 1, 1], [], []>} : vector<8x8xf32>, vector<8x16xf32>, vector<8x16xf32> -> vector<8x16xf32>
    %c2_169 = arith.constant 2 : index
    %c0_170 = arith.constant 0 : index
    %c0_171 = arith.constant 0 : index
    %321 = vector.load %arg6[%c2_169, %c0_170, %c0_171] : memref<4x16x32xf32, #tpu.memory_space<vmem>>, vector<1x16x32xf32>
    %322 = vector.shape_cast %321 : vector<1x16x32xf32> to vector<16x32xf32>
    %cst_172 = arith.constant dense<0.000000e+00> : vector<8x32xf32>
    %323 = tpu.matmul %320, %322, %cst_172 {dimension_numbers = #tpu.dot_dimension_numbers<[1], [0], [0], [1], [0, 0, 1, 1], [], []>} : vector<8x16xf32>, vector<16x32xf32>, vector<8x32xf32> -> vector<8x32xf32>
    %324 = arith.addf %288, %323 : vector<8x32xf32>
    %c7 = arith.constant 7 : index
    %c0_173 = arith.constant 0 : index
    %c0_174 = arith.constant 0 : index
    %325 = vector.load %arg4[%c7, %c0_173, %c0_174] : memref<12x32x16xf32, #tpu.memory_space<vmem>>, vector<1x32x16xf32>
    %326 = vector.shape_cast %325 : vector<1x32x16xf32> to vector<32x16xf32>
    %cst_175 = arith.constant dense<0.000000e+00> : vector<8x16xf32>
    %327 = tpu.matmul %287, %326, %cst_175 {dimension_numbers = #tpu.dot_dimension_numbers<[1], [0], [0], [1], [0, 0, 1, 1], [], []>} : vector<8x32xf32>, vector<32x16xf32>, vector<8x16xf32> -> vector<8x16xf32>
    %c7_176 = arith.constant 7 : index
    %c0_177 = arith.constant 0 : index
    %328 = vector.load %arg5[%c7_176, %c0_177] : memref<12x16xf32, #tpu.memory_space<vmem>>, vector<1x16xf32>
    %329 = vector.broadcast %328 : vector<1x16xf32> to vector<8x16xf32>
    %330 = arith.addf %327, %329 : vector<8x16xf32>
    %c9 = arith.constant 9 : index
    %c0_178 = arith.constant 0 : index
    %c0_179 = arith.constant 0 : index
    %331 = vector.load %arg4[%c9, %c0_178, %c0_179] : memref<12x32x16xf32, #tpu.memory_space<vmem>>, vector<1x32x16xf32>
    %332 = vector.shape_cast %331 : vector<1x32x16xf32> to vector<32x16xf32>
    %cst_180 = arith.constant dense<0.000000e+00> : vector<8x16xf32>
    %333 = tpu.matmul %287, %332, %cst_180 {dimension_numbers = #tpu.dot_dimension_numbers<[1], [0], [0], [1], [0, 0, 1, 1], [], []>} : vector<8x32xf32>, vector<32x16xf32>, vector<8x16xf32> -> vector<8x16xf32>
    %c9_181 = arith.constant 9 : index
    %c0_182 = arith.constant 0 : index
    %334 = vector.load %arg5[%c9_181, %c0_182] : memref<12x16xf32, #tpu.memory_space<vmem>>, vector<1x16xf32>
    %335 = vector.broadcast %334 : vector<1x16xf32> to vector<8x16xf32>
    %336 = arith.addf %333, %335 : vector<8x16xf32>
    %c11 = arith.constant 11 : index
    %c0_183 = arith.constant 0 : index
    %c0_184 = arith.constant 0 : index
    %337 = vector.load %arg4[%c11, %c0_183, %c0_184] : memref<12x32x16xf32, #tpu.memory_space<vmem>>, vector<1x32x16xf32>
    %338 = vector.shape_cast %337 : vector<1x32x16xf32> to vector<32x16xf32>
    %cst_185 = arith.constant dense<0.000000e+00> : vector<8x16xf32>
    %339 = tpu.matmul %287, %338, %cst_185 {dimension_numbers = #tpu.dot_dimension_numbers<[1], [0], [0], [1], [0, 0, 1, 1], [], []>} : vector<8x32xf32>, vector<32x16xf32>, vector<8x16xf32> -> vector<8x16xf32>
    %c11_186 = arith.constant 11 : index
    %c0_187 = arith.constant 0 : index
    %340 = vector.load %arg5[%c11_186, %c0_187] : memref<12x16xf32, #tpu.memory_space<vmem>>, vector<1x16xf32>
    %341 = vector.broadcast %340 : vector<1x16xf32> to vector<8x16xf32>
    %342 = arith.addf %339, %341 : vector<8x16xf32>
    %cst_188 = arith.constant dense<0.000000e+00> : vector<8x8xf32>
    %343 = tpu.matmul %330, %336, %cst_188 {dimension_numbers = #tpu.dot_dimension_numbers<[1], [1], [0], [0], [0, 0, 1, 0], [], []>} : vector<8x16xf32>, vector<8x16xf32>, vector<8x8xf32> -> vector<8x8xf32>
    %cst_189 = arith.constant 2.500000e-01 : f32
    %344 = vector.broadcast %cst_189 : f32 to vector<8x8xf32>
    %345 = arith.mulf %343, %344 : vector<8x8xf32>
    %cst_190 = arith.constant dense<0xFF800000> : vector<8xf32>
    %346 = vector.multi_reduction <maximumf>, %345, %cst_190 [1] : vector<8x8xf32> to vector<8xf32>
    %347 = vector.shape_cast %346 : vector<8xf32> to vector<8x1xf32>
    %348 = vector.broadcast %347 : vector<8x1xf32> to vector<8x8xf32>
    %349 = arith.subf %345, %348 : vector<8x8xf32>
    %350 = math.exp %349 : vector<8x8xf32>
    %cst_191 = arith.constant dense<0.000000e+00> : vector<8xf32>
    %351 = vector.multi_reduction <add>, %350, %cst_191 [1] : vector<8x8xf32> to vector<8xf32>
    %352 = vector.shape_cast %351 : vector<8xf32> to vector<8x1xf32>
    %353 = tpu.reciprocal %352 {approx = true} : vector<8x1xf32> -> vector<8x1xf32>
    %354 = vector.broadcast %353 : vector<8x1xf32> to vector<8x8xf32>
    %355 = arith.mulf %350, %354 : vector<8x8xf32>
    %cst_192 = arith.constant dense<0.000000e+00> : vector<8x16xf32>
    %356 = tpu.matmul %355, %342, %cst_192 {dimension_numbers = #tpu.dot_dimension_numbers<[1], [0], [0], [1], [0, 0, 1, 1], [], []>} : vector<8x8xf32>, vector<8x16xf32>, vector<8x16xf32> -> vector<8x16xf32>
    %c3_193 = arith.constant 3 : index
    %c0_194 = arith.constant 0 : index
    %c0_195 = arith.constant 0 : index
    %357 = vector.load %arg6[%c3_193, %c0_194, %c0_195] : memref<4x16x32xf32, #tpu.memory_space<vmem>>, vector<1x16x32xf32>
    %358 = vector.shape_cast %357 : vector<1x16x32xf32> to vector<16x32xf32>
    %cst_196 = arith.constant dense<0.000000e+00> : vector<8x32xf32>
    %359 = tpu.matmul %356, %358, %cst_196 {dimension_numbers = #tpu.dot_dimension_numbers<[1], [0], [0], [1], [0, 0, 1, 1], [], []>} : vector<8x16xf32>, vector<16x32xf32>, vector<8x32xf32> -> vector<8x32xf32>
    %360 = arith.addf %324, %359 : vector<8x32xf32>
    %361 = arith.addf %360, %287 : vector<8x32xf32>
    %c0_197 = arith.constant 0 : index
    %c0_198 = arith.constant 0 : index
    %362 = vector.load %arg12[%c0_197, %c0_198] : memref<16x32xf32, #tpu.memory_space<vmem>>, vector<8x32xf32>
    tpu.vector_store %arg12[%c0_197, %c0_198], %361 {strides = array<i32>} : memref<16x32xf32, #tpu.memory_space<vmem>>, vector<8x32xf32>,
    %363 = vector.extract_strided_slice %286 {offsets = [8, 0], sizes = [8, 32], strides = [1, 1]} : vector<16x32xf32> to vector<8x32xf32>
    %cst_199 = arith.constant 0.000000e+00 : f32
    %364 = vector.broadcast %cst_199 : f32 to vector<8x32xf32>
    %c6_200 = arith.constant 6 : index
    %c0_201 = arith.constant 0 : index
    %c0_202 = arith.constant 0 : index
    %365 = vector.load %arg4[%c6_200, %c0_201, %c0_202] : memref<12x32x16xf32, #tpu.memory_space<vmem>>, vector<1x32x16xf32>
    %366 = vector.shape_cast %365 : vector<1x32x16xf32> to vector<32x16xf32>
    %cst_203 = arith.constant dense<0.000000e+00> : vector<8x16xf32>
    %367 = tpu.matmul %363, %366, %cst_203 {dimension_numbers = #tpu.dot_dimension_numbers<[1], [0], [0], [1], [0, 0, 1, 1], [], []>} : vector<8x32xf32>, vector<32x16xf32>, vector<8x16xf32> -> vector<8x16xf32>
    %c6_204 = arith.constant 6 : index
    %c0_205 = arith.constant 0 : index
    %368 = vector.load %arg5[%c6_204, %c0_205] : memref<12x16xf32, #tpu.memory_space<vmem>>, vector<1x16xf32>
    %369 = vector.broadcast %368 : vector<1x16xf32> to vector<8x16xf32>
    %370 = arith.addf %367, %369 : vector<8x16xf32>
    %c8_206 = arith.constant 8 : index
    %c0_207 = arith.constant 0 : index
    %c0_208 = arith.constant 0 : index
    %371 = vector.load %arg4[%c8_206, %c0_207, %c0_208] : memref<12x32x16xf32, #tpu.memory_space<vmem>>, vector<1x32x16xf32>
    %372 = vector.shape_cast %371 : vector<1x32x16xf32> to vector<32x16xf32>
    %cst_209 = arith.constant dense<0.000000e+00> : vector<8x16xf32>
    %373 = tpu.matmul %363, %372, %cst_209 {dimension_numbers = #tpu.dot_dimension_numbers<[1], [0], [0], [1], [0, 0, 1, 1], [], []>} : vector<8x32xf32>, vector<32x16xf32>, vector<8x16xf32> -> vector<8x16xf32>
    %c8_210 = arith.constant 8 : index
    %c0_211 = arith.constant 0 : index
    %374 = vector.load %arg5[%c8_210, %c0_211] : memref<12x16xf32, #tpu.memory_space<vmem>>, vector<1x16xf32>
    %375 = vector.broadcast %374 : vector<1x16xf32> to vector<8x16xf32>
    %376 = arith.addf %373, %375 : vector<8x16xf32>
    %c10_212 = arith.constant 10 : index
    %c0_213 = arith.constant 0 : index
    %c0_214 = arith.constant 0 : index
    %377 = vector.load %arg4[%c10_212, %c0_213, %c0_214] : memref<12x32x16xf32, #tpu.memory_space<vmem>>, vector<1x32x16xf32>
    %378 = vector.shape_cast %377 : vector<1x32x16xf32> to vector<32x16xf32>
    %cst_215 = arith.constant dense<0.000000e+00> : vector<8x16xf32>
    %379 = tpu.matmul %363, %378, %cst_215 {dimension_numbers = #tpu.dot_dimension_numbers<[1], [0], [0], [1], [0, 0, 1, 1], [], []>} : vector<8x32xf32>, vector<32x16xf32>, vector<8x16xf32> -> vector<8x16xf32>
    %c10_216 = arith.constant 10 : index
    %c0_217 = arith.constant 0 : index
    %380 = vector.load %arg5[%c10_216, %c0_217] : memref<12x16xf32, #tpu.memory_space<vmem>>, vector<1x16xf32>
    %381 = vector.broadcast %380 : vector<1x16xf32> to vector<8x16xf32>
    %382 = arith.addf %379, %381 : vector<8x16xf32>
    %cst_218 = arith.constant dense<0.000000e+00> : vector<8x8xf32>
    %383 = tpu.matmul %370, %376, %cst_218 {dimension_numbers = #tpu.dot_dimension_numbers<[1], [1], [0], [0], [0, 0, 1, 0], [], []>} : vector<8x16xf32>, vector<8x16xf32>, vector<8x8xf32> -> vector<8x8xf32>
    %cst_219 = arith.constant 2.500000e-01 : f32
    %384 = vector.broadcast %cst_219 : f32 to vector<8x8xf32>
    %385 = arith.mulf %383, %384 : vector<8x8xf32>
    %cst_220 = arith.constant dense<0xFF800000> : vector<8xf32>
    %386 = vector.multi_reduction <maximumf>, %385, %cst_220 [1] : vector<8x8xf32> to vector<8xf32>
    %387 = vector.shape_cast %386 : vector<8xf32> to vector<8x1xf32>
    %388 = vector.broadcast %387 : vector<8x1xf32> to vector<8x8xf32>
    %389 = arith.subf %385, %388 : vector<8x8xf32>
    %390 = math.exp %389 : vector<8x8xf32>
    %cst_221 = arith.constant dense<0.000000e+00> : vector<8xf32>
    %391 = vector.multi_reduction <add>, %390, %cst_221 [1] : vector<8x8xf32> to vector<8xf32>
    %392 = vector.shape_cast %391 : vector<8xf32> to vector<8x1xf32>
    %393 = tpu.reciprocal %392 {approx = true} : vector<8x1xf32> -> vector<8x1xf32>
    %394 = vector.broadcast %393 : vector<8x1xf32> to vector<8x8xf32>
    %395 = arith.mulf %390, %394 : vector<8x8xf32>
    %cst_222 = arith.constant dense<0.000000e+00> : vector<8x16xf32>
    %396 = tpu.matmul %395, %382, %cst_222 {dimension_numbers = #tpu.dot_dimension_numbers<[1], [0], [0], [1], [0, 0, 1, 1], [], []>} : vector<8x8xf32>, vector<8x16xf32>, vector<8x16xf32> -> vector<8x16xf32>
    %c2_223 = arith.constant 2 : index
    %c0_224 = arith.constant 0 : index
    %c0_225 = arith.constant 0 : index
    %397 = vector.load %arg6[%c2_223, %c0_224, %c0_225] : memref<4x16x32xf32, #tpu.memory_space<vmem>>, vector<1x16x32xf32>
    %398 = vector.shape_cast %397 : vector<1x16x32xf32> to vector<16x32xf32>
    %cst_226 = arith.constant dense<0.000000e+00> : vector<8x32xf32>
    %399 = tpu.matmul %396, %398, %cst_226 {dimension_numbers = #tpu.dot_dimension_numbers<[1], [0], [0], [1], [0, 0, 1, 1], [], []>} : vector<8x16xf32>, vector<16x32xf32>, vector<8x32xf32> -> vector<8x32xf32>
    %400 = arith.addf %364, %399 : vector<8x32xf32>
    %c7_227 = arith.constant 7 : index
    %c0_228 = arith.constant 0 : index
    %c0_229 = arith.constant 0 : index
    %401 = vector.load %arg4[%c7_227, %c0_228, %c0_229] : memref<12x32x16xf32, #tpu.memory_space<vmem>>, vector<1x32x16xf32>
    %402 = vector.shape_cast %401 : vector<1x32x16xf32> to vector<32x16xf32>
    %cst_230 = arith.constant dense<0.000000e+00> : vector<8x16xf32>
    %403 = tpu.matmul %363, %402, %cst_230 {dimension_numbers = #tpu.dot_dimension_numbers<[1], [0], [0], [1], [0, 0, 1, 1], [], []>} : vector<8x32xf32>, vector<32x16xf32>, vector<8x16xf32> -> vector<8x16xf32>
    %c7_231 = arith.constant 7 : index
    %c0_232 = arith.constant 0 : index
    %404 = vector.load %arg5[%c7_231, %c0_232] : memref<12x16xf32, #tpu.memory_space<vmem>>, vector<1x16xf32>
    %405 = vector.broadcast %404 : vector<1x16xf32> to vector<8x16xf32>
    %406 = arith.addf %403, %405 : vector<8x16xf32>
    %c9_233 = arith.constant 9 : index
    %c0_234 = arith.constant 0 : index
    %c0_235 = arith.constant 0 : index
    %407 = vector.load %arg4[%c9_233, %c0_234, %c0_235] : memref<12x32x16xf32, #tpu.memory_space<vmem>>, vector<1x32x16xf32>
    %408 = vector.shape_cast %407 : vector<1x32x16xf32> to vector<32x16xf32>
    %cst_236 = arith.constant dense<0.000000e+00> : vector<8x16xf32>
    %409 = tpu.matmul %363, %408, %cst_236 {dimension_numbers = #tpu.dot_dimension_numbers<[1], [0], [0], [1], [0, 0, 1, 1], [], []>} : vector<8x32xf32>, vector<32x16xf32>, vector<8x16xf32> -> vector<8x16xf32>
    %c9_237 = arith.constant 9 : index
    %c0_238 = arith.constant 0 : index
    %410 = vector.load %arg5[%c9_237, %c0_238] : memref<12x16xf32, #tpu.memory_space<vmem>>, vector<1x16xf32>
    %411 = vector.broadcast %410 : vector<1x16xf32> to vector<8x16xf32>
    %412 = arith.addf %409, %411 : vector<8x16xf32>
    %c11_239 = arith.constant 11 : index
    %c0_240 = arith.constant 0 : index
    %c0_241 = arith.constant 0 : index
    %413 = vector.load %arg4[%c11_239, %c0_240, %c0_241] : memref<12x32x16xf32, #tpu.memory_space<vmem>>, vector<1x32x16xf32>
    %414 = vector.shape_cast %413 : vector<1x32x16xf32> to vector<32x16xf32>
    %cst_242 = arith.constant dense<0.000000e+00> : vector<8x16xf32>
    %415 = tpu.matmul %363, %414, %cst_242 {dimension_numbers = #tpu.dot_dimension_numbers<[1], [0], [0], [1], [0, 0, 1, 1], [], []>} : vector<8x32xf32>, vector<32x16xf32>, vector<8x16xf32> -> vector<8x16xf32>
    %c11_243 = arith.constant 11 : index
    %c0_244 = arith.constant 0 : index
    %416 = vector.load %arg5[%c11_243, %c0_244] : memref<12x16xf32, #tpu.memory_space<vmem>>, vector<1x16xf32>
    %417 = vector.broadcast %416 : vector<1x16xf32> to vector<8x16xf32>
    %418 = arith.addf %415, %417 : vector<8x16xf32>
    %cst_245 = arith.constant dense<0.000000e+00> : vector<8x8xf32>
    %419 = tpu.matmul %406, %412, %cst_245 {dimension_numbers = #tpu.dot_dimension_numbers<[1], [1], [0], [0], [0, 0, 1, 0], [], []>} : vector<8x16xf32>, vector<8x16xf32>, vector<8x8xf32> -> vector<8x8xf32>
    %cst_246 = arith.constant 2.500000e-01 : f32
    %420 = vector.broadcast %cst_246 : f32 to vector<8x8xf32>
    %421 = arith.mulf %419, %420 : vector<8x8xf32>
    %cst_247 = arith.constant dense<0xFF800000> : vector<8xf32>
    %422 = vector.multi_reduction <maximumf>, %421, %cst_247 [1] : vector<8x8xf32> to vector<8xf32>
    %423 = vector.shape_cast %422 : vector<8xf32> to vector<8x1xf32>
    %424 = vector.broadcast %423 : vector<8x1xf32> to vector<8x8xf32>
    %425 = arith.subf %421, %424 : vector<8x8xf32>
    %426 = math.exp %425 : vector<8x8xf32>
    %cst_248 = arith.constant dense<0.000000e+00> : vector<8xf32>
    %427 = vector.multi_reduction <add>, %426, %cst_248 [1] : vector<8x8xf32> to vector<8xf32>
    %428 = vector.shape_cast %427 : vector<8xf32> to vector<8x1xf32>
    %429 = tpu.reciprocal %428 {approx = true} : vector<8x1xf32> -> vector<8x1xf32>
    %430 = vector.broadcast %429 : vector<8x1xf32> to vector<8x8xf32>
    %431 = arith.mulf %426, %430 : vector<8x8xf32>
    %cst_249 = arith.constant dense<0.000000e+00> : vector<8x16xf32>
    %432 = tpu.matmul %431, %418, %cst_249 {dimension_numbers = #tpu.dot_dimension_numbers<[1], [0], [0], [1], [0, 0, 1, 1], [], []>} : vector<8x8xf32>, vector<8x16xf32>, vector<8x16xf32> -> vector<8x16xf32>
    %c3_250 = arith.constant 3 : index
    %c0_251 = arith.constant 0 : index
    %c0_252 = arith.constant 0 : index
    %433 = vector.load %arg6[%c3_250, %c0_251, %c0_252] : memref<4x16x32xf32, #tpu.memory_space<vmem>>, vector<1x16x32xf32>
    %434 = vector.shape_cast %433 : vector<1x16x32xf32> to vector<16x32xf32>
    %cst_253 = arith.constant dense<0.000000e+00> : vector<8x32xf32>
    %435 = tpu.matmul %432, %434, %cst_253 {dimension_numbers = #tpu.dot_dimension_numbers<[1], [0], [0], [1], [0, 0, 1, 1], [], []>} : vector<8x16xf32>, vector<16x32xf32>, vector<8x32xf32> -> vector<8x32xf32>
    %436 = arith.addf %400, %435 : vector<8x32xf32>
    %437 = arith.addf %436, %363 : vector<8x32xf32>
    %c8_254 = arith.constant 8 : index
    %c0_255 = arith.constant 0 : index
    %438 = vector.load %arg12[%c8_254, %c0_255] : memref<16x32xf32, #tpu.memory_space<vmem>>, vector<8x32xf32>
    tpu.vector_store %arg12[%c8_254, %c0_255], %437 {strides = array<i32>} : memref<16x32xf32, #tpu.memory_space<vmem>>, vector<8x32xf32>,
    %c1_256 = arith.constant 1 : index
    %c0_257 = arith.constant 0 : index
    %c0_258 = arith.constant 0 : index
    %439 = vector.load %arg8[%c1_256, %c0_257, %c0_258] : memref<2x70x32xf32, #tpu.memory_space<vmem>>, vector<1x70x32xf32>
    %440 = vector.shape_cast %439 : vector<1x70x32xf32> to vector<70x32xf32>
    %c0_259 = arith.constant 0 : index
    %c0_260 = arith.constant 0 : index
    %441 = vector.load %arg12[%c0_259, %c0_260] : memref<16x32xf32, #tpu.memory_space<vmem>>, vector<16x32xf32>
    %442 = vector.extract_strided_slice %440 {offsets = [64, 0], sizes = [1, 32], strides = [1, 1]} : vector<70x32xf32> to vector<1x32xf32>
    %443 = vector.broadcast %442 : vector<1x32xf32> to vector<16x32xf32>
    %444 = arith.addf %441, %443 : vector<16x32xf32>
    %445 = vector.extract_strided_slice %440 {offsets = [65, 0], sizes = [1, 32], strides = [1, 1]} : vector<70x32xf32> to vector<1x32xf32>
    %446 = vector.extract_strided_slice %440 {offsets = [66, 0], sizes = [1, 32], strides = [1, 1]} : vector<70x32xf32> to vector<1x32xf32>
    %cst_261 = arith.constant dense<0.000000e+00> : vector<16xf32>
    %447 = vector.multi_reduction <add>, %444, %cst_261 [1] : vector<16x32xf32> to vector<16xf32>
    %448 = vector.shape_cast %447 : vector<16xf32> to vector<16x1xf32>
    %cst_262 = arith.constant 3.200000e+01 : f32
    %449 = vector.broadcast %cst_262 : f32 to vector<16x1xf32>
    %450 = arith.divf %448, %449 : vector<16x1xf32>
    %451 = vector.broadcast %450 : vector<16x1xf32> to vector<16x32xf32>
    %452 = arith.subf %444, %451 : vector<16x32xf32>
    %453 = arith.mulf %452, %452 : vector<16x32xf32>
    %cst_263 = arith.constant dense<0.000000e+00> : vector<16xf32>
    %454 = vector.multi_reduction <add>, %453, %cst_263 [1] : vector<16x32xf32> to vector<16xf32>
    %455 = vector.shape_cast %454 : vector<16xf32> to vector<16x1xf32>
    %cst_264 = arith.constant 3.200000e+01 : f32
    %456 = vector.broadcast %cst_264 : f32 to vector<16x1xf32>
    %457 = arith.divf %455, %456 : vector<16x1xf32>
    %cst_265 = arith.constant 9.99999996E-13 : f32
    %458 = vector.broadcast %cst_265 : f32 to vector<16x1xf32>
    %459 = arith.addf %457, %458 : vector<16x1xf32>
    %460 = math.rsqrt %459 : vector<16x1xf32>
    %461 = vector.broadcast %460 : vector<16x1xf32> to vector<16x32xf32>
    %462 = arith.mulf %452, %461 : vector<16x32xf32>
    %463 = vector.broadcast %445 : vector<1x32xf32> to vector<16x32xf32>
    %464 = arith.mulf %462, %463 : vector<16x32xf32>
    %465 = vector.broadcast %446 : vector<1x32xf32> to vector<16x32xf32>
    %466 = arith.addf %464, %465 : vector<16x32xf32>
    %c1_266 = arith.constant 1 : index
    %c0_267 = arith.constant 0 : index
    %c0_268 = arith.constant 0 : index
    %467 = vector.load %arg7[%c1_266, %c0_267, %c0_268] : memref<2x33x64xf32, #tpu.memory_space<vmem>>, vector<1x33x64xf32>
    %468 = vector.shape_cast %467 : vector<1x33x64xf32> to vector<33x64xf32>
    %469 = vector.extract_strided_slice %468 {offsets = [0, 0], sizes = [32, 64], strides = [1, 1]} : vector<33x64xf32> to vector<32x64xf32>
    %cst_269 = arith.constant dense<0.000000e+00> : vector<16x64xf32>
    %470 = tpu.matmul %466, %469, %cst_269 {dimension_numbers = #tpu.dot_dimension_numbers<[1], [0], [0], [1], [0, 0, 1, 1], [], []>} : vector<16x32xf32>, vector<32x64xf32>, vector<16x64xf32> -> vector<16x64xf32>
    %471 = vector.extract_strided_slice %468 {offsets = [32, 0], sizes = [1, 64], strides = [1, 1]} : vector<33x64xf32> to vector<1x64xf32>
    %472 = vector.broadcast %471 : vector<1x64xf32> to vector<16x64xf32>
    %473 = arith.addf %470, %472 : vector<16x64xf32>
    %cst_270 = arith.constant 5.000000e-01 : f32
    %474 = vector.broadcast %cst_270 : f32 to vector<16x64xf32>
    %475 = arith.mulf %474, %473 : vector<16x64xf32>
    %cst_271 = arith.constant 4.471500e-02 : f32
    %476 = vector.broadcast %cst_271 : f32 to vector<16x64xf32>
    %477 = arith.mulf %476, %473 : vector<16x64xf32>
    %478 = arith.mulf %477, %473 : vector<16x64xf32>
    %479 = arith.mulf %478, %473 : vector<16x64xf32>
    %480 = arith.addf %473, %479 : vector<16x64xf32>
    %cst_272 = arith.constant 0.797884583 : f32
    %481 = vector.broadcast %cst_272 : f32 to vector<16x64xf32>
    %482 = arith.mulf %481, %480 : vector<16x64xf32>
    %483 = math.tanh %482 : vector<16x64xf32>
    %cst_273 = arith.constant 1.000000e+00 : f32
    %484 = vector.broadcast %cst_273 : f32 to vector<16x64xf32>
    %485 = arith.addf %484, %483 : vector<16x64xf32>
    %486 = arith.mulf %475, %485 : vector<16x64xf32>
    %487 = vector.extract_strided_slice %440 {offsets = [0, 0], sizes = [64, 32], strides = [1, 1]} : vector<70x32xf32> to vector<64x32xf32>
    %cst_274 = arith.constant dense<0.000000e+00> : vector<16x32xf32>
    %488 = tpu.matmul %486, %487, %cst_274 {dimension_numbers = #tpu.dot_dimension_numbers<[1], [0], [0], [1], [0, 0, 1, 1], [], []>} : vector<16x64xf32>, vector<64x32xf32>, vector<16x32xf32> -> vector<16x32xf32>
    %489 = vector.extract_strided_slice %440 {offsets = [67, 0], sizes = [1, 32], strides = [1, 1]} : vector<70x32xf32> to vector<1x32xf32>
    %490 = vector.broadcast %489 : vector<1x32xf32> to vector<16x32xf32>
    %491 = arith.addf %488, %490 : vector<16x32xf32>
    %492 = arith.addf %491, %466 : vector<16x32xf32>
    %493 = vector.extract_strided_slice %440 {offsets = [68, 0], sizes = [1, 32], strides = [1, 1]} : vector<70x32xf32> to vector<1x32xf32>
    %494 = vector.extract_strided_slice %440 {offsets = [69, 0], sizes = [1, 32], strides = [1, 1]} : vector<70x32xf32> to vector<1x32xf32>
    %cst_275 = arith.constant dense<0.000000e+00> : vector<16xf32>
    %495 = vector.multi_reduction <add>, %492, %cst_275 [1] : vector<16x32xf32> to vector<16xf32>
    %496 = vector.shape_cast %495 : vector<16xf32> to vector<16x1xf32>
    %cst_276 = arith.constant 3.200000e+01 : f32
    %497 = vector.broadcast %cst_276 : f32 to vector<16x1xf32>
    %498 = arith.divf %496, %497 : vector<16x1xf32>
    %499 = vector.broadcast %498 : vector<16x1xf32> to vector<16x32xf32>
    %500 = arith.subf %492, %499 : vector<16x32xf32>
    %501 = arith.mulf %500, %500 : vector<16x32xf32>
    %cst_277 = arith.constant dense<0.000000e+00> : vector<16xf32>
    %502 = vector.multi_reduction <add>, %501, %cst_277 [1] : vector<16x32xf32> to vector<16xf32>
    %503 = vector.shape_cast %502 : vector<16xf32> to vector<16x1xf32>
    %cst_278 = arith.constant 3.200000e+01 : f32
    %504 = vector.broadcast %cst_278 : f32 to vector<16x1xf32>
    %505 = arith.divf %503, %504 : vector<16x1xf32>
    %cst_279 = arith.constant 9.99999996E-13 : f32
    %506 = vector.broadcast %cst_279 : f32 to vector<16x1xf32>
    %507 = arith.addf %505, %506 : vector<16x1xf32>
    %508 = math.rsqrt %507 : vector<16x1xf32>
    %509 = vector.broadcast %508 : vector<16x1xf32> to vector<16x32xf32>
    %510 = arith.mulf %500, %509 : vector<16x32xf32>
    %511 = vector.broadcast %493 : vector<1x32xf32> to vector<16x32xf32>
    %512 = arith.mulf %510, %511 : vector<16x32xf32>
    %513 = vector.broadcast %494 : vector<1x32xf32> to vector<16x32xf32>
    %514 = arith.addf %512, %513 : vector<16x32xf32>
    %515 = vector.shape_cast %514 : vector<16x32xf32> to vector<2x8x32xf32>
    %516 = vector.extract_strided_slice %515 {offsets = [0, 0, 0], sizes = [2, 1, 32], strides = [1, 1, 1]} : vector<2x8x32xf32> to vector<2x1x32xf32>
    %517 = vector.shape_cast %516 : vector<2x1x32xf32> to vector<2x32xf32>
    %518 = vector.extract_strided_slice %36 {offsets = [0, 0], sizes = [32, 32], strides = [1, 1]} : vector<35x32xf32> to vector<32x32xf32>
    %cst_280 = arith.constant dense<0.000000e+00> : vector<2x32xf32>
    %519 = tpu.matmul %517, %518, %cst_280 {dimension_numbers = #tpu.dot_dimension_numbers<[1], [0], [0], [1], [0, 0, 1, 1], [], []>} : vector<2x32xf32>, vector<32x32xf32>, vector<2x32xf32> -> vector<2x32xf32>
    %520 = vector.extract_strided_slice %36 {offsets = [32, 0], sizes = [1, 32], strides = [1, 1]} : vector<35x32xf32> to vector<1x32xf32>
    %521 = vector.broadcast %520 : vector<1x32xf32> to vector<2x32xf32>
    %522 = arith.addf %519, %521 : vector<2x32xf32>
    %523 = math.tanh %522 : vector<2x32xf32>
    %c0_281 = arith.constant 0 : index
    %c0_282 = arith.constant 0 : index
    %524 = vector.load %arg10[%c0_281, %c0_282] : memref<33x5xf32, #tpu.memory_space<vmem>>, vector<33x5xf32>
    %525 = vector.extract_strided_slice %524 {offsets = [0, 0], sizes = [32, 5], strides = [1, 1]} : vector<33x5xf32> to vector<32x5xf32>
    %cst_283 = arith.constant dense<0.000000e+00> : vector<2x5xf32>
    %526 = tpu.matmul %523, %525, %cst_283 {dimension_numbers = #tpu.dot_dimension_numbers<[1], [0], [0], [1], [0, 0, 1, 1], [], []>} : vector<2x32xf32>, vector<32x5xf32>, vector<2x5xf32> -> vector<2x5xf32>
    %527 = vector.extract_strided_slice %524 {offsets = [32, 0], sizes = [1, 5], strides = [1, 1]} : vector<33x5xf32> to vector<1x5xf32>
    %528 = vector.broadcast %527 : vector<1x5xf32> to vector<2x5xf32>
    %529 = arith.addf %526, %528 : vector<2x5xf32>
    %cst_284 = arith.constant dense<0xFF800000> : vector<2xf32>
    %530 = vector.multi_reduction <maximumf>, %529, %cst_284 [1] : vector<2x5xf32> to vector<2xf32>
    %531 = vector.shape_cast %530 : vector<2xf32> to vector<2x1xf32>
    %532 = vector.broadcast %531 : vector<2x1xf32> to vector<2x5xf32>
    %533 = arith.subf %529, %532 : vector<2x5xf32>
    %534 = math.exp %533 : vector<2x5xf32>
    %cst_285 = arith.constant dense<0.000000e+00> : vector<2xf32>
    %535 = vector.multi_reduction <add>, %534, %cst_285 [1] : vector<2x5xf32> to vector<2xf32>
    %536 = vector.shape_cast %535 : vector<2xf32> to vector<2x1xf32>
    %537 = math.log %536 : vector<2x1xf32>
    %538 = arith.addf %537, %531 : vector<2x1xf32>
    %539 = tpu.iota {dimensions = array<i32: 1>} : vector<2x5xi32>
    %c0_286 = arith.constant 0 : index
    %c0_287 = arith.constant 0 : index
    %540 = vector.load %arg2[%c0_286, %c0_287] : memref<2x1xi32, #tpu.memory_space<vmem>>, vector<2x1xi32>
    %541 = vector.broadcast %540 : vector<2x1xi32> to vector<2x5xi32>
    %542 = arith.cmpi eq, %539, %541 : vector<2x5xi32>
    %543 = arith.extui %542 : vector<2x5xi1> to vector<2x5xi32>
    %544 = arith.sitofp %543 : vector<2x5xi32> to vector<2x5xf32>
    %545 = arith.mulf %544, %529 : vector<2x5xf32>
    %cst_288 = arith.constant dense<0.000000e+00> : vector<2xf32>
    %546 = vector.multi_reduction <add>, %545, %cst_288 [1] : vector<2x5xf32> to vector<2xf32>
    %547 = vector.shape_cast %546 : vector<2xf32> to vector<2x1xf32>
    %548 = arith.subf %538, %547 : vector<2x1xf32>
    %549 = vector.shape_cast %548 : vector<2x1xf32> to vector<1x2x1xf32>
    %cst_289 = arith.constant dense<0.000000e+00> : vector<1xf32>
    %550 = vector.multi_reduction <add>, %549, %cst_289 [1, 2] : vector<1x2x1xf32> to vector<1xf32>
    %551 = vector.shape_cast %550 : vector<1xf32> to vector<1x1x1xf32>
    %552 = vector.extract %551[0, 0, 0] : f32 from vector<1x1x1xf32>
    %cst_290 = arith.constant 2.000000e+00 : f32
    %553 = arith.divf %552, %cst_290 : f32
    %cst_291 = arith.constant 0.000000e+00 : f32
    %554 = vector.broadcast %cst_291 : f32 to vector<8x128xf32>
    %c0_292 = arith.constant 0 : index
    %c0_293 = arith.constant 0 : index
    %555 = vector.load %arg11[%c0_292, %c0_293] : memref<8x128xf32, #tpu.memory_space<vmem>>, vector<8x128xf32>
    tpu.vector_store %arg11[%c0_292, %c0_293], %554 {strides = array<i32>} : memref<8x128xf32, #tpu.memory_space<vmem>>, vector<8x128xf32>,
    %c0_294 = arith.constant 0 : index
    %c0_295 = arith.constant 0 : index
    %556 = vector.load %arg11[%c0_294, %c0_295] : memref<8x128xf32, #tpu.memory_space<vmem>>, vector<2x5xf32>
    tpu.vector_store %arg11[%c0_294, %c0_295], %529 {strides = array<i32>} : memref<8x128xf32, #tpu.memory_space<vmem>>, vector<2x5xf32>,
    %557 = vector.broadcast %553 : f32 to vector<1x1xf32>
    %c2_296 = arith.constant 2 : index
    %c0_297 = arith.constant 0 : index
    %558 = vector.load %arg11[%c2_296, %c0_297] : memref<8x128xf32, #tpu.memory_space<vmem>>, vector<1x1xf32>
    tpu.vector_store %arg11[%c2_296, %c0_297], %557 {strides = array<i32>} : memref<8x128xf32, #tpu.memory_space<vmem>>, vector<1x1xf32>,
    return
  }
}

</mosaic_0001>

<bundles_post_ra>
// kernel: _lambda_.1
= control target key start
LH: loop header
LB: loop body
LE: loop exit
PB: predicated region body
PF: predicated region fallthrough
CT: control target
= control target key end

     0   :  { %v6115_v0 = vmov 0   ;;  %vm116_vm0 = vcmask 1043456   ;;  %vm6116_vm1 = vmmov 1   ;;  %v38_v19 = vlaneseq  ;;  %s7131_s0 = inlined_call_operand.vmem [shape: s32[16,1], index: 0, kind: input, shape index: {}]   ;;  %s7132_s1 = inlined_call_operand.vmem [shape: s32[16,1], index: 1, kind: input, shape index: {}]   ;;  %s7133_s3 = inlined_call_operand.vmem [shape: f32[68,32], index: 3, kind: input, shape index: {}]   ;;  %s7134_s4 = inlined_call_operand.vmem [shape: f32[12,32,16], index: 4, kind: input, shape index: {}]   ;;  %s7135_s9 = inlined_call_operand.vmem [shape: f32[35,32], index: 9, kind: input, shape index: {}]   ;;  %s7136_s5 = inlined_call_operand.vmem [shape: f32[12,16], index: 5, kind: input, shape index: {}]   ;;  %s7137_s6 = inlined_call_operand.vmem [shape: f32[4,16,32], index: 6, kind: input, shape index: {}]   ;;  %s7138_s8 = inlined_call_operand.vmem [shape: f32[2,70,32], index: 8, kind: input, shape index: {}]   ;;  %s7139_s7 = inlined_call_operand.vmem [shape: f32[2,33,64], index: 7, kind: input, shape index: {}]   ;;  %s7140_s2 = inlined_call_operand.vmem [shape: s32[2,1], index: 2, kind: input, shape index: {}]   ;;  %s7141_s10 = inlined_call_operand.vmem [shape: f32[33,5], index: 10, kind: input, shape index: {}]   ;;  %s7142_s11 = inlined_call_operand.vmem [shape: f32[8,128], index: 11, kind: output, shape index: {}]  }
   0x1   :  { %6047 = vset.pattern.permute.xlu1 %v6115_v0  ;;  %6046 = vset.pattern.permute.xlu0 %v6115_v0  ;;  %v68_v1 = vld [vmem:[%s7131_s0 + $0x8] sm:$0xff]  ;;  %v67_v2 = vld [vmem:[%s7131_s0] sm:$0xff]  ;;  %v103_v10 = vld [vmem:[%s7133_s3 + $0x10] sm:$0xff]  ;;  %vm109_vm12 = vcmask 490496   ;;  %v6117_v31 = vmov 0.0   ;;  %vm200_vm14 = vcmask 261120  }
   0x2   :  { %v78_v3 = vld [vmem:[%s7132_s1 + $0x8] sm:$0xff]  ;;  %73 = vperm.xlu1 %6047, %v68_v1   ;;  %70 = vperm.xlu0 %6046, %v67_v2   ;;  %v77_v5 = vld [vmem:[%s7132_s1] sm:$0xff]  ;;  %v104_v11 = vld [vmem:[%s7133_s3 + $0x18] sm:$0xff]  ;;  %v6216_v20 = vshrl.u32 %v38_v19, 7  ;;  %v6220_v27 = vand.u32 127, %v38_v19  ;;  %v6118_v47 = vmov 0.0|0.0   ;;  %4842 = vst [vmem:[%s7142_s11] sm:$0xff] %v6117_v31 }
   0x3   :  { %v80_v4 = vadd.s32 50, %v78_v3  ;;  %v101_v6 = vld [vmem:[%s7133_s3] sm:$0xff]  ;;  %v102_v7 = vld [vmem:[%s7133_s3 + $0x8] sm:$0xff]  ;;  %v79_v8 = vadd.s32 50, %v77_v5  ;;  %v5797_v12 = vpack.c.bf16 %v104_v11, %v103_v10  ;;  %v107_v16 = vld [vmem:[%s7133_s3 + $0x30] sm:$0xff]  ;;  %5811 = vmatprep.subr.bf16.mxu1 %v6118_v47  ;;  %vm6119_vm15 = vmmov 0  }
   0x4   :  { %v5793_v9 = vpack.c.bf16 %v102_v7, %v101_v6  ;;  %v105_v13 = vld [vmem:[%s7133_s3 + $0x20] sm:$0xff]  ;;  %v106_v14 = vld [vmem:[%s7133_s3 + $0x28] sm:$0xff]  ;;  %v108_v17 = vld [vmem:[%s7133_s3 + $0x38] sm:$0xf]  ;;  %v42_v21 = vadd.s32 8, %v6216_v20  ;;  %v47_v23 = vand.u32 7, %v6216_v20  ;;  %5319 = vmatprep.mubr.msk.f32.mxu1 %vm6119_vm15, %v6117_v31 }
   0x5   :  { %v5801_v15 = vpack.c.bf16 %v106_v14, %v105_v13  ;;  %v5805_v18 = vpack.c.bf16 %v108_v17, %v107_v16  ;;  %vm5806_vm2 = vmpackc.low %vm116_vm0, %vm6116_vm1  ;;  %v240_v42 = vld [vmem:[%s7134_s4] sm:$0xff]  ;;  %v241_v43 = vld [vmem:[%s7134_s4 + $0x8] sm:$0xff]  ;;  %v6281_v58 = vsub.s32 1, %v6216_v20  ;;  %v6287_v60 = vsub.s32 2, %v6216_v20 }
   0x6   :  { %5794 = vmatprep.subr.bf16.mxu0 %v5793_v9  ;;  %85 = vperm.xlu1 %6047, %v80_v4   ;;  %v54_v22 = vand.u32 7, %v42_v21  ;;  %v91_v28 = vadd.s32 52, %v47_v23  ;;  %v4864_v44 = vld [vmem:[%s7134_s4 + $0x80] sm:$0xff]  ;;  %v6243_v45 = vpack.c.bf16 %v241_v43, %v240_v42  ;;  %v4865_v46 = vld [vmem:[%s7134_s4 + $0x88] sm:$0xff]  ;;  %v242_v49 = vld [vmem:[%s7134_s4 + $0x10] sm:$0xff]  ;;  %vm482_vm0 = vcmask 130048  }
   0x7   :  { %82 = vperm.xlu0 %6046, %v79_v8   ;;  %5796 = vmatpush3.bf16.msra.mxu0 %v5793_v9  ;;  %v6250_v48 = vpack.c.bf16 %v4865_v46, %v4864_v44  ;;  %v243_v50 = vld [vmem:[%s7134_s4 + $0x18] sm:$0xff]  ;;  %v4866_v51 = vld [vmem:[%s7134_s4 + $0x90] sm:$0xff]  ;;  %v199_v59 = vld [vmem:[%s7135_s9 + $0x20] sm:$0x7]  ;;  %vm560_vm1 = vcmask 64512  }
   0x8   :  { %5798 = vmatprep.subr.bf16.mxu0 %v5797_v12  ;;  %v92_v26 = vadd.s32 52, %v54_v22  ;;  %vm93_vm8 = vcmp.eq.s32.totalorder %v6220_v27, %v91_v28  ;;  %5813 = vmatpush3.bf16.msra.mxu1 %v6243_v45  ;;  %v6265_v52 = vpack.c.bf16 %v243_v50, %v242_v49  ;;  %v4867_v53 = vld [vmem:[%s7134_s4 + $0x98] sm:$0xff]  ;;  %v6290_v61 = vrot.slane %v199_v59, %v6281_v58  ;;  %v4858_v63 = vld [vmem:[%s7134_s4 + $0x40] sm:$0xff]  ;;  %v4859_v2 = vld [vmem:[%s7134_s4 + $0x48] sm:$0xff] }
   0x9   :  { %5814 = vmatprep.subr.bf16.mxu1 %v6118_v47  ;;  %v6270_v54 = vpack.c.bf16 %v4867_v53, %v4866_v51  ;;  %v6296_v0 = vrot.slane %v199_v59, %v6287_v60  ;;  %v4873_v3 = vld [vmem:[%s7134_s4 + $0x20] sm:$0xff]  ;;  %v4874_v4 = vld [vmem:[%s7134_s4 + $0x28] sm:$0xff]  ;;  %v6308_v6 = vpack.c.bf16 %v4859_v2, %v4858_v63  ;;  %v4860_v8 = vld [vmem:[%s7134_s4 + $0x50] sm:$0xff] }
   0xa   :  { %vm94_vm3 = vcmp.eq.s32.totalorder %v6220_v27, %v92_v26  ;;  %v6310_v7 = vpack.c.bf16 %v4874_v4, %v4873_v3  ;;  %v4861_v10 = vld [vmem:[%s7134_s4 + $0x58] sm:$0xff]  ;;  %v4875_v11 = vld [vmem:[%s7134_s4 + $0x30] sm:$0xff]  ;;  %v4886_v16 = vld [vmem:[%s7134_s4 + $0xa8] sm:$0xff] }
   0xb   :  { %5800 = vmatpush3.bf16.msra.mxu0 %v5797_v12  ;;  %v4876_v12 = vld [vmem:[%s7134_s4 + $0x38] sm:$0xff]  ;;  %v6333_v13 = vpack.c.bf16 %v4861_v10, %v4860_v8  ;;  %v6386_v26 = vld [vmem:[%s7136_s5 + $0x2] ss:$0 sm:$0xff]  ;;  %v6441_v4 = vld [vmem:[%s7136_s5 + $0x3] ss:$0 sm:$0xff] }
   0xc   :  { %5802 = vmatprep.subr.bf16.mxu0 %v5801_v15  ;;  %5816 = vmatpush3.bf16.msra.mxu1 %v6265_v52  ;;  %v6335_v14 = vpack.c.bf16 %v4876_v12, %v4875_v11  ;;  %v4888_v19 = vld [vmem:[%s7134_s4 + $0xb8] sm:$0xff]  ;;  %v4879_v53 = vld [vmem:[%s7134_s4 + $0x60] sm:$0xff] }
   0xd   :  { %5817 = vmatprep.subr.bf16.mxu1 %v6118_v47  ;;  %v4882_v63 = vld [vmem:[%s7134_s4 + $0x78] sm:$0xff]  ;;  %v6446_v8 = vld [vmem:[%s7136_s5 + $0x1] ss:$0 sm:$0xff]  ;;  %v6452_v12 = vld [vmem:[%s7136_s5 + $0x5] ss:$0 sm:$0xff] }
   0xf   :  { %5804 = vmatpush3.bf16.msra.mxu0 %v5801_v15  ;;  %v4885_v15 = vld [vmem:[%s7134_s4 + $0xa0] sm:$0xff] }
  0x10   :  { %5807 = vmatprep.subr.msk.bf16.mxu0 %vm5806_vm2, %v5805_v18  ;;  %v6351_v17 = vpack.c.bf16 %v4886_v16, %v4885_v15 }
  0x13   :  { %5810 = vmatpush3.bf16.msk.msra.mxu0 %vm5806_vm2, %v5805_v18  ;;  %v4887_v18 = vld [vmem:[%s7134_s4 + $0xb0] sm:$0xff]  ;;  %vm2317_vm2 = vcmask 523264  }
  0x14   :  { %5823 = vmatprep.subr.bf16.mxu0 %v6118_v47  ;;  %v6366_v21 = vpack.c.bf16 %v4888_v19, %v4887_v18 }
  0x81   :  { %v74_v24 = vpop.permute.xlu1 %73  ;;  %v71_v25 = vpop.permute.xlu0 %70 }
  0x82   :  { %vm76_vm4 = vcmp.eq.s32.totalorder %v6220_v27, %v74_v24  ;;  %vm75_vm9 = vcmp.eq.s32.totalorder %v6220_v27, %v71_v25 }
  0x85   :  { %v86_v29 = vpop.permute.xlu1 %85 }
  0x86   :  { %v83_v30 = vpop.permute.xlu0 %82  ;;  %vm88_vm5 = vcmp.eq.s32.totalorder %v6220_v27, %v86_v29 }
  0x87   :  { %vm87_vm6 = vcmp.eq.s32.totalorder %v6220_v27, %v83_v30  ;;  %vm90_vm7 = vmor %vm76_vm4, %vm88_vm5  ;;  %v6391_v30 = vld [vmem:[%s7136_s5] ss:$0 sm:$0xff]  ;;  %vm4803_vm4 = vcmask 33792  }
  0x88   :  { %vm96_vm10 = vmor %vm90_vm7, %vm94_vm3  ;;  %vm4646_vm3 = vcmask 1041409   ;;  %vm4845_vm7 = vcmask 0  }
  0x89   :  { %vm89_vm11 = vmor %vm75_vm9, %vm87_vm6  ;;  %v4852_v32 = vsel %vm96_vm10, 1.0, %v6117_v31  ;;  %vm4828_vm6 = vcmask 1024  }
  0x8a   :  { %vm95_vm13 = vmor %vm89_vm11, %vm93_vm8 }
  0x8b   :  { %v4851_v33 = vsel %vm95_vm13, 1.0, %v6117_v31 }
  0x8c   :  { %5308 = vmatprep.mubr.msk.f32.mxu0 %vm109_vm12, %v4851_v33 }
  0x8d   :  { %5309 = vmatmul.mubr.msk.f32.vlgmr.msra.gmra.mrb[0].mxu0 %vm109_vm12, %v4852_v32 }
  0x8e   :  { %5825 = vmatpush3.bf16.msra.mxu0 %v6250_v48  ;;  %5341 = vmatprep.mubr.msk.f32.mxu0 %vm6119_vm15, %v6117_v31 }
  0x8f   :  { %5826 = vmatprep.subr.bf16.mxu0 %v6118_v47 }
  0x92   :  { %5828 = vmatpush3.bf16.msra.mxu0 %v6270_v54 }
  0x93   :  { %5829 = vmatprep.subr.bf16.mxu0 %v6118_v47 }
 0x160   :  { %v6230_v34 = vpop.f32.mrb[0].mxu0 }
 0x161   :  { %v186_v35 = vpop.f32.mrb[1].mxu0 }
 0x162   :  { %v201_v36 = vsel %vm200_vm14, %v186_v35, 0.0 }
 0x163   :  { %202 = vadd.xlane.f32.xlu0 %v201_v36  ;;  %v6397_v36 = vld [vmem:[%s7136_s5 + $0x4] ss:$0 sm:$0xff] }
 0x1f0   :  { %v203_v37 = vpop.xlane.xlu0 %202 }
 0x1f1   :  { %v208_v38 = vmul.f32 0.03125, %v203_v37 }
 0x1f3   :  { %v210_v39 = vsub.f32 %v186_v35, %v208_v38 }
 0x1f5   :  { %v212_v40 = vmul.f32 %v210_v39, %v210_v39 }
 0x1f7   :  { %v214_v41 = vsel %vm200_vm14, %v212_v40, 0.0 }
 0x1f8   :  { %215 = vadd.xlane.f32.xlu1 %v214_v41 }
 0x285   :  { %v216_v55 = vpop.xlane.xlu1 %215 }
 0x286   :  { %v220_v56 = vmul.f32 0.03125, %v216_v55  ;;  %v4880_v55 = vld [vmem:[%s7134_s4 + $0x68] sm:$0xff] }
 0x288   :  { %v222_v57 = vadd.f32 1e-12, %v220_v56 }
 0x28a   :  { %6048 = vrsqrt.f32 %v222_v57  ;;  %v6415_v57 = vpack.c.bf16 %v4880_v55, %v4879_v53 }
 0x294   :  { %v6049_v62 = vpop.eup %6048 }
 0x295   :  { %v226_v1 = vmul.f32 %v6049_v62, %v210_v39  ;;  %v4881_v62 = vld [vmem:[%s7134_s4 + $0x70] sm:$0xff] }
 0x297   :  { %v232_v5 = vmul.f32 %v6290_v61, %v226_v1  ;;  %v6425_v1 = vpack.c.bf16 %v4882_v63, %v4881_v62 }
 0x299   :  { %v6316_v9 = vadd.f32 %v6296_v0, %v232_v5 }
 0x29b   :  { %5320 = vmatmul.mubr.msk.f32.vlgmr.msra.gmra.mrb[0].mxu1 %vm200_vm14, %v6316_v9  ;;  %5342 = vmatmul.mubr.msk.f32.vlgmr.msra.gmra.mrb[2].mxu0 %vm200_vm14, %v6316_v9 }
 0x29c   :  { %5819 = vmatpush3.bf16.msra.mxu1 %v6308_v6  ;;  %5831 = vmatpush3.bf16.msra.mxu0 %v6310_v7 }
 0x29d   :  { %5820 = vmatprep.subr.bf16.mxu1 %v6118_v47  ;;  %5832 = vmatprep.subr.bf16.mxu0 %v6118_v47 }
 0x29e   :  { %5330 = vmatprep.mubr.msk.f32.mxu1 %vm6119_vm15, %v6117_v31  ;;  %5362 = vmatprep.mubr.msk.f32.mxu0 %vm6119_vm15, %v6117_v31 }
 0x2a0   :  { %5822 = vmatpush3.bf16.msra.mxu1 %v6333_v13  ;;  %5834 = vmatpush3.bf16.msra.mxu0 %v6335_v14 }
 0x2a1   :  { %5841 = vmatprep.subr.bf16.mxu0 %v6118_v47  ;;  %5344 = vmatprep.subr.mxu1 %v6117_v31 }
 0x2a3   :  { %5331 = vmatmul.mubr.msk.f32.vlgmr.msra.gmra.mrb[2].mxu1 %vm200_vm14, %v6316_v9  ;;  %5363 = vmatmul.mubr.msk.f32.vlgmr.msra.gmra.mrb[4].mxu0 %vm200_vm14, %v6316_v9 }
 0x2a4   :  { %5843 = vmatpush3.bf16.msra.mxu0 %v6351_v17  ;;  %5384 = vmatprep.mubr.msk.f32.mxu0 %vm6119_vm15, %v6117_v31 }
 0x2a5   :  { %5844 = vmatprep.subr.bf16.mxu0 %v6118_v47  ;;  %5346 = vmatprep.mubr.msk.f32.mxu1 %vm6119_vm15, %v6117_v31 }
 0x2a8   :  { %5846 = vmatpush3.bf16.msra.mxu0 %v6366_v21 }
 0x2a9   :  { %5853 = vmatprep.subr.bf16.mxu0 %v6118_v47 }
 0x2ab   :  { %5385 = vmatmul.mubr.msk.f32.vlgmr.msra.gmra.mrb[6].mxu0 %vm200_vm14, %v6316_v9 }
 0x2ac   :  { %5855 = vmatpush3.bf16.msra.mxu0 %v6243_v45  ;;  %5419 = vmatprep.mubr.msk.f32.mxu0 %vm6119_vm15, %v6117_v31 }
 0x2ad   :  { %5856 = vmatprep.subr.bf16.mxu0 %v6118_v47 }
 0x2b0   :  { %5858 = vmatpush3.bf16.msra.mxu0 %v6265_v52 }
 0x2b1   :  { %5865 = vmatprep.subr.bf16.mxu0 %v6118_v47 }
 0x36e   :  { %v318_v22 = vpop.f32.mrb[0].mxu1  ;;  %v478_v23 = vpop.f32.mrb[2].mxu0 }
 0x36f   :  { %v5321_v24 = vpop.f32.mrb[1].mxu1  ;;  %v5343_v25 = vpop.f32.mrb[3].mxu0  ;;  %v319_v37 = vadd.f32 %v6391_v30, %v318_v22  ;;  %v479_v38 = vadd.f32 %v6397_v36, %v478_v23 }
 0x370   :  { %v204_v24 = vsel %vm200_vm14, %v6230_v34, 0.0 }
 0x376   :  { %v398_v28 = vpop.f32.mrb[2].mxu1  ;;  %v723_v29 = vpop.f32.mrb[4].mxu0 }
 0x377   :  { %v399_v32 = vadd.f32 %v6386_v26, %v398_v28  ;;  %v5332_v33 = vpop.f32.mrb[3].mxu1  ;;  %v5364_v35 = vpop.f32.mrb[5].mxu0  ;;  %v724_v15 = vadd.f32 %v6446_v8, %v723_v29 }
 0x379   :  { %5345 = vmatpush3.xpose.msk.msra.mxu1 %vm482_vm0, %v399_v32 }
 0x37a   :  { %5349 = vmatprep.subr.mxu1 %v6117_v31 }
 0x37c   :  { %5347 = vmatmul.mubr.msk.f32.vlgmr.msra.gmra.mrb[4].mxu1 %vm482_vm0, %v319_v37 }
 0x37d   :  { %5350 = vmatpush3.msra.mxu1 %v479_v38  ;;  %5351 = vmatprep.mubr.msk.f32.mxu1 %vm6119_vm15, %v6117_v31 }
 0x37e   :  { %v883_v39 = vpop.f32.mrb[6].mxu0  ;;  %5835 = vmatprep.subr.bf16.mxu1 %v6118_v47 }
 0x37f   :  { %v5386_v40 = vpop.f32.mrb[7].mxu0  ;;  %v884_v16 = vadd.f32 %v6452_v12, %v883_v39 }
 0x44f   :  { %v555_v41 = vpop.f32.mrb[4].mxu1 }
 0x450   :  { %v559_v42 = vmul.f32 0.25, %v555_v41  ;;  %v5348_v43 = vpop.f32.mrb[5].mxu1 }
 0x452   :  { %v561_v44 = vsel %vm560_vm1, %v559_v42, -inf }
 0x453   :  { %562 = vmax.xlane.f32.xlu0 %v561_v44 }
 0x4e0   :  { %v563_v45 = vpop.xlane.xlu0 %562 }
 0x4e1   :  { %v564_v46 = vsub.f32 %v559_v42, %v563_v45  ;;  %v4894_v45 = vld [vmem:[%s7137_s6 + $0x10] sm:$0xff] }
 0x4e3   :  { %v565_v49 = vmul.f32 1.442695, %v564_v46 }
 0x4e5   :  { %6050 = vpow2.f32 %v565_v49 }
 0x4ef   :  { %v6051_v50 = vpop.eup %6050 }
 0x4f0   :  { %v567_v51 = vsel %vm560_vm1, %v6051_v50, 0.0 }
 0x4f1   :  { %568 = vadd.xlane.f32.xlu0 %v567_v51 }
 0x57e   :  { %v569_v52 = vpop.xlane.xlu0 %568 }
 0x57f   :  { %6052 = vrcp.f32 %v569_v52 }
 0x589   :  { %v6053_v56 = vpop.eup %6052 }
 0x58a   :  { %v571_v59 = vmul.f32 %v6053_v56, %v6051_v50 }
 0x58c   :  { %5352 = vmatmul.mubr.msk.f32.vlgmr.msra.gmra.mrb[6].mxu1 %vm560_vm1, %v571_v59 }
 0x58d   :  { %5837 = vmatpush3.bf16.msra.mxu1 %v6415_v57  ;;  %5373 = vmatprep.mubr.msk.f32.mxu1 %vm6119_vm15, %v6117_v31 }
 0x58e   :  { %5838 = vmatprep.subr.bf16.mxu1 %v6118_v47 }
 0x591   :  { %5840 = vmatpush3.bf16.msra.mxu1 %v6425_v1 }
 0x592   :  { %5387 = vmatprep.subr.mxu1 %v6117_v31 }
 0x594   :  { %5374 = vmatmul.mubr.msk.f32.vlgmr.msra.gmra.mrb[8].mxu1 %vm200_vm14, %v6316_v9 }
 0x595   :  { %5389 = vmatprep.mubr.msk.f32.mxu1 %vm6119_vm15, %v6117_v31 }
 0x65f   :  { %v6436_v2 = vpop.f32.mrb[6].mxu1 }
 0x660   :  { %v5353_v3 = vpop.f32.mrb[7].mxu1 }
 0x667   :  { %v803_v5 = vpop.f32.mrb[8].mxu1 }
 0x668   :  { %v804_v10 = vadd.f32 %v6441_v4, %v803_v5  ;;  %v5375_v11 = vpop.f32.mrb[9].mxu1 }
 0x66a   :  { %5388 = vmatpush3.xpose.msk.msra.mxu1 %vm482_vm0, %v804_v10 }
 0x66b   :  { %5392 = vmatprep.subr.mxu1 %v6117_v31 }
 0x66d   :  { %5390 = vmatmul.mubr.msk.f32.vlgmr.msra.gmra.mrb[10].mxu1 %vm482_vm0, %v724_v15 }
 0x66e   :  { %5393 = vmatpush3.msra.mxu1 %v884_v16  ;;  %5394 = vmatprep.mubr.msk.f32.mxu1 %vm6119_vm15, %v6117_v31 }
 0x66f   :  { %5847 = vmatprep.subr.bf16.mxu1 %v6118_v47 }
 0x740   :  { %v959_v18 = vpop.f32.mrb[10].mxu1 }
 0x741   :  { %v963_v19 = vmul.f32 0.25, %v959_v18  ;;  %v5391_v22 = vpop.f32.mrb[11].mxu1 }
 0x743   :  { %v964_v23 = vsel %vm560_vm1, %v963_v19, -inf }
 0x744   :  { %965 = vmax.xlane.f32.xlu1 %v964_v23 }
 0x748   :  { %205 = vadd.xlane.f32.xlu1 %v204_v24 }
 0x7d1   :  { %v966_v25 = vpop.xlane.xlu1 %965 }
 0x7d2   :  { %v967_v28 = vsub.f32 %v963_v19, %v966_v25 }
 0x7d4   :  { %v968_v29 = vmul.f32 1.442695, %v967_v28 }
 0x7d5   :  { %v206_v32 = vpop.xlane.xlu1 %205 }
 0x7d6   :  { %6054 = vpow2.f32 %v968_v29  ;;  %v209_v33 = vmul.f32 0.03125, %v206_v32 }
 0x7d8   :  { %v211_v35 = vsub.f32 %v6230_v34, %v209_v33  ;;  %v4895_v34 = vld [vmem:[%s7137_s6 + $0x18] sm:$0xff] }
 0x7d9   :  { %v5848_v49 = vpack.c.bf16 %v4895_v34, %v4894_v45 }
 0x7da   :  { %v213_v39 = vmul.f32 %v211_v35, %v211_v35 }
 0x7dc   :  { %v217_v40 = vsel %vm200_vm14, %v213_v39, 0.0 }
 0x7e0   :  { %v6055_v37 = vpop.eup %6054 }
 0x7e1   :  { %v970_v38 = vsel %vm560_vm1, %v6055_v37, 0.0 }
 0x7e2   :  { %971 = vadd.xlane.f32.xlu0 %v970_v38 }
 0x7e6   :  { %218 = vadd.xlane.f32.xlu0 %v217_v40 }
 0x86f   :  { %v972_v41 = vpop.xlane.xlu0 %971 }
 0x870   :  { %6056 = vrcp.f32 %v972_v41 }
 0x873   :  { %v219_v42 = vpop.xlane.xlu0 %218 }
 0x874   :  { %v221_v43 = vmul.f32 0.03125, %v219_v42  ;;  %v6569_v42 = vsub.s32 0, %v6216_v20 }
 0x876   :  { %v223_v44 = vadd.f32 1e-12, %v221_v43 }
 0x878   :  { %6058 = vrsqrt.f32 %v223_v44 }
 0x87a   :  { %v6057_v46 = vpop.eup %6056 }
 0x87b   :  { %v974_v50 = vmul.f32 %v6057_v46, %v6055_v37 }
 0x87d   :  { %5395 = vmatmul.mubr.msk.f32.vlgmr.msra.gmra.mrb[12].mxu1 %vm560_vm1, %v974_v50 }
 0x87e   :  { %5849 = vmatpush3.bf16.msra.mxu1 %v5848_v49  ;;  %5401 = vmatprep.mubr.msk.f32.mxu1 %vm6119_vm15, %v6117_v31 }
 0x87f   :  { %5850 = vmatprep.subr.bf16.mxu1 %v6118_v47 }
 0x882   :  { %v6059_v51 = vpop.eup %6058 }
 0x883   :  { %v227_v52 = vmul.f32 %v6059_v51, %v211_v35 }
 0x885   :  { %v233_v53 = vmul.f32 %v6290_v61, %v227_v52 }
 0x887   :  { %v6480_v55 = vadd.f32 %v6296_v0, %v233_v53 }
 0x889   :  { %5420 = vmatmul.mubr.msk.f32.vlgmr.msra.gmra.mrb[8].mxu0 %vm200_vm14, %v6480_v55 }
 0x88a   :  { %5867 = vmatpush3.bf16.msra.mxu0 %v6250_v48  ;;  %5441 = vmatprep.mubr.msk.f32.mxu0 %vm6119_vm15, %v6117_v31  ;;  %v645_v48 = vld [vmem:[%s7137_s6] sm:$0xff] }
 0x88b   :  { %5868 = vmatprep.subr.bf16.mxu0 %v6118_v47 }
 0x88e   :  { %5870 = vmatpush3.bf16.msra.mxu0 %v6270_v54  ;;  %v646_v54 = vld [vmem:[%s7137_s6 + $0x8] sm:$0xff] }
 0x88f   :  { %5871 = vmatprep.subr.bf16.mxu0 %v6118_v47  ;;  %v6516_v61 = vpack.c.bf16 %v646_v54, %v645_v48 }
 0x891   :  { %5442 = vmatmul.mubr.msk.f32.vlgmr.msra.gmra.mrb[10].mxu0 %vm200_vm14, %v6480_v55 }
 0x892   :  { %5873 = vmatpush3.bf16.msra.mxu0 %v6310_v7  ;;  %5462 = vmatprep.mubr.msk.f32.mxu0 %vm6119_vm15, %v6117_v31 }
 0x893   :  { %5874 = vmatprep.subr.bf16.mxu0 %v6118_v47 }
 0x896   :  { %5876 = vmatpush3.bf16.msra.mxu0 %v6335_v14 }
 0x897   :  { %5883 = vmatprep.subr.bf16.mxu0 %v6118_v47 }
 0x899   :  { %5463 = vmatmul.mubr.msk.f32.vlgmr.msra.gmra.mrb[12].mxu0 %vm200_vm14, %v6480_v55 }
 0x89a   :  { %5885 = vmatpush3.bf16.msra.mxu0 %v6351_v17  ;;  %5484 = vmatprep.mubr.msk.f32.mxu0 %vm6119_vm15, %v6117_v31 }
 0x89b   :  { %5886 = vmatprep.subr.bf16.mxu0 %v6118_v47 }
 0x89e   :  { %5888 = vmatpush3.bf16.msra.mxu0 %v6366_v21 }
 0x89f   :  { %5889 = vmatprep.subr.bf16.mxu0 %v6118_v47 }
 0x8a1   :  { %5485 = vmatmul.mubr.msk.f32.vlgmr.msra.gmra.mrb[14].mxu0 %vm200_vm14, %v6480_v55 }
 0x8a2   :  { %5891 = vmatpush3.bf16.msra.mxu0 %v5848_v49  ;;  %5501 = vmatprep.mubr.msk.f32.mxu0 %vm6119_vm15, %v6117_v31 }
 0x950   :  { %v1044_v0 = vpop.f32.mrb[12].mxu1 }
 0x951   :  { %v5396_v7 = vpop.f32.mrb[13].mxu1  ;;  %5402 = vmatmul.mubr.msk.f32.vlgmr.msra.gmra.mrb[14].mxu1 %vm482_vm0, %v1044_v0 }
 0x952   :  { %5852 = vmatpush3.bf16.msra.mxu1 %v6516_v61  ;;  %5408 = vmatprep.mubr.msk.f32.mxu1 %vm6119_vm15, %v6117_v31 }
 0x953   :  { %5859 = vmatprep.subr.bf16.mxu1 %v6118_v47 }
 0x955   :  { %5409 = vmatmul.mubr.msk.f32.vlgmr.msra.gmra.mrb[16].mxu1 %vm482_vm0, %v6436_v2 }
 0x956   :  { %5861 = vmatpush3.bf16.msra.mxu1 %v6308_v6  ;;  %5430 = vmatprep.mubr.msk.f32.mxu1 %vm6119_vm15, %v6117_v31 }
 0x957   :  { %5862 = vmatprep.subr.bf16.mxu1 %v6118_v47 }
 0x95a   :  { %5864 = vmatpush3.bf16.msra.mxu1 %v6333_v13 }
 0x95b   :  { %5444 = vmatprep.subr.mxu1 %v6117_v31 }
 0x95c   :  { %v1277_v14 = vpop.f32.mrb[8].mxu0 }
 0x95d   :  { %5431 = vmatmul.mubr.msk.f32.vlgmr.msra.gmra.mrb[18].mxu1 %vm200_vm14, %v6480_v55  ;;  %v5421_v17 = vpop.f32.mrb[9].mxu0  ;;  %v1278_v19 = vadd.f32 %v6391_v30, %v1277_v14 }
 0x95e   :  { %5446 = vmatprep.mubr.msk.f32.mxu1 %vm6119_vm15, %v6117_v31 }
 0x964   :  { %v1435_v21 = vpop.f32.mrb[10].mxu0 }
 0x965   :  { %v5443_v56 = vpop.f32.mrb[11].mxu0  ;;  %v1436_v22 = vadd.f32 %v6397_v36, %v1435_v21 }
 0x96c   :  { %v1677_v6 = vpop.f32.mrb[12].mxu0 }
 0x96d   :  { %v5464_v59 = vpop.f32.mrb[13].mxu0  ;;  %v1678_v41 = vadd.f32 %v6446_v8, %v1677_v6 }
 0x974   :  { %v1835_v62 = vpop.f32.mrb[14].mxu0 }
 0x975   :  { %v5486_v63 = vpop.f32.mrb[15].mxu0 }
 0xa24   :  { %v1120_v2 = vpop.f32.mrb[14].mxu1 }
 0xa25   :  { %v5403_v3 = vpop.f32.mrb[15].mxu1 }
 0xa28   :  { %v1193_v5 = vpop.f32.mrb[16].mxu1 }
 0xa29   :  { %v1194_v13 = vadd.f32 %v1193_v5, %v1120_v2  ;;  %v5410_v10 = vpop.f32.mrb[17].mxu1 }
 0xa2b   :  { %v1197_v11 = vadd.f32 %v1194_v13, %v6316_v9 }
 0xa2d   :  { %1198 = vst.msk [vmem:[#allocation2] sm:$0xff] %vm200_vm14, %v1197_v11 }
 0xa30   :  { %v1356_v15 = vpop.f32.mrb[18].mxu1 }
 0xa31   :  { %v1357_v16 = vadd.f32 %v6386_v26, %v1356_v15  ;;  %v5432_v18 = vpop.f32.mrb[19].mxu1 }
 0xa33   :  { %5445 = vmatpush3.xpose.msk.msra.mxu1 %vm482_vm0, %v1357_v16 }
 0xa34   :  { %5449 = vmatprep.subr.mxu1 %v6117_v31  ;;  %v2159_v43 = vld [vmem:[#allocation2] sm:$0xff] }
 0xa36   :  { %5447 = vmatmul.mubr.msk.f32.vlgmr.msra.gmra.mrb[20].mxu1 %vm482_vm0, %v1278_v19 }
 0xa37   :  { %5450 = vmatpush3.msra.mxu1 %v1436_v22  ;;  %5451 = vmatprep.mubr.msk.f32.mxu1 %vm6119_vm15, %v6117_v31 }
 0xa38   :  { %5877 = vmatprep.subr.bf16.mxu1 %v6118_v47 }
 0xb09   :  { %v1511_v9 = vpop.f32.mrb[20].mxu1 }
 0xb0a   :  { %v1515_v23 = vmul.f32 0.25, %v1511_v9  ;;  %v5448_v26 = vpop.f32.mrb[21].mxu1 }
 0xb0c   :  { %v1516_v24 = vsel %vm560_vm1, %v1515_v23, -inf }
 0xb0d   :  { %1517 = vmax.xlane.f32.xlu1 %v1516_v24 }
 0xb9a   :  { %v1518_v25 = vpop.xlane.xlu1 %1517 }
 0xb9b   :  { %v1519_v30 = vsub.f32 %v1515_v23, %v1518_v25 }
 0xb9d   :  { %v1520_v28 = vmul.f32 1.442695, %v1519_v30 }
 0xb9f   :  { %6060 = vpow2.f32 %v1520_v28 }
 0xba9   :  { %v6061_v29 = vpop.eup %6060 }
 0xbaa   :  { %v1522_v36 = vsel %vm560_vm1, %v6061_v29, 0.0 }
 0xbab   :  { %1523 = vadd.xlane.f32.xlu0 %v1522_v36 }
 0xc38   :  { %v1524_v32 = vpop.xlane.xlu0 %1523 }
 0xc39   :  { %6062 = vrcp.f32 %v1524_v32 }
 0xc43   :  { %v6063_v33 = vpop.eup %6062 }
 0xc44   :  { %v1526_v35 = vmul.f32 %v6063_v33, %v6061_v29  ;;  %v2205_v33 = vld [vmem:[%s7139_s7] sm:$0xff] }
 0xc46   :  { %5452 = vmatmul.mubr.msk.f32.vlgmr.msra.gmra.mrb[22].mxu1 %vm560_vm1, %v1526_v35 }
 0xc47   :  { %5879 = vmatpush3.bf16.msra.mxu1 %v6415_v57  ;;  %5473 = vmatprep.mubr.msk.f32.mxu1 %vm6119_vm15, %v6117_v31 }
 0xc48   :  { %5880 = vmatprep.subr.bf16.mxu1 %v6118_v47 }
 0xc4b   :  { %5882 = vmatpush3.bf16.msra.mxu1 %v6425_v1  ;;  %v1836_v1 = vadd.f32 %v6452_v12, %v1835_v62 }
 0xc4c   :  { %5487 = vmatprep.subr.mxu1 %v6117_v31 }
 0xc4e   :  { %5474 = vmatmul.mubr.msk.f32.vlgmr.msra.gmra.mrb[24].mxu1 %vm200_vm14, %v6480_v55 }
 0xc4f   :  { %5489 = vmatprep.mubr.msk.f32.mxu1 %vm6119_vm15, %v6117_v31 }
 0xd19   :  { %v1596_v37 = vpop.f32.mrb[22].mxu1 }
 0xd1a   :  { %v5453_v38 = vpop.f32.mrb[23].mxu1 }
 0xd1b   :  { %v2208_v38 = vld [vmem:[%s7139_s7 + $0x18] sm:$0xff] }
 0xd21   :  { %v1756_v39 = vpop.f32.mrb[24].mxu1 }
 0xd22   :  { %v1757_v57 = vadd.f32 %v6441_v4, %v1756_v39  ;;  %v5475_v40 = vpop.f32.mrb[25].mxu1  ;;  %v6574_v4 = vld [vmem:[%s7138_s8 + $0x40] sm:$0x3f] }
 0xd23   :  { %v2164_v8 = vrot.slane %v6574_v4, %v6569_v42  ;;  %v2196_v5 = vrot.slane %v6574_v4, %v6281_v58  ;;  %v2202_v10 = vrot.slane %v6574_v4, %v6287_v60 }
 0xd24   :  { %5488 = vmatpush3.xpose.msk.msra.mxu1 %vm482_vm0, %v1757_v57 }
 0xd25   :  { %5492 = vmatprep.subr.mxu1 %v6117_v31  ;;  %v2165_v46 = vadd.f32 %v2164_v8, %v2159_v43 }
 0xd27   :  { %5490 = vmatmul.mubr.msk.f32.vlgmr.msra.gmra.mrb[26].mxu1 %vm482_vm0, %v1678_v41  ;;  %v2167_v49 = vsel %vm200_vm14, %v2165_v46, 0.0 }
 0xd28   :  { %5493 = vmatpush3.msra.mxu1 %v1836_v1  ;;  %5494 = vmatprep.mubr.msk.f32.mxu1 %vm6119_vm15, %v6117_v31 }
 0xd29   :  { %5892 = vmatprep.subr.bf16.mxu1 %v6118_v47 }
 0xdfa   :  { %v1911_v12 = vpop.f32.mrb[26].mxu1 }
 0xdfb   :  { %v1915_v44 = vmul.f32 0.25, %v1911_v12  ;;  %v5491_v45 = vpop.f32.mrb[27].mxu1 }
 0xdfc   :  { %v2151_v45 = vld [vmem:[%s7138_s8 + $0x8] sm:$0xff] }
 0xdfd   :  { %v1916_v34 = vsel %vm560_vm1, %v1915_v44, -inf }
 0xdfe   :  { %1917 = vmax.xlane.f32.xlu1 %v1916_v34 }
 0xe02   :  { %2168 = vadd.xlane.f32.xlu1 %v2167_v49  ;;  %v2153_v49 = vld [vmem:[%s7138_s8 + $0x18] sm:$0xff] }
 0xe8b   :  { %v1918_v50 = vpop.xlane.xlu1 %1917 }
 0xe8c   :  { %v1919_v51 = vsub.f32 %v1915_v44, %v1918_v50  ;;  %v2150_v44 = vld [vmem:[%s7138_s8] sm:$0xff] }
 0xe8d   :  { %v5903_v34 = vpack.c.bf16 %v2151_v45, %v2150_v44  ;;  %v2154_v50 = vld [vmem:[%s7138_s8 + $0x20] sm:$0xff]  ;;  %v4948_v44 = vld [vmem:[%s7134_s4 + $0xd8] sm:$0xff] }
 0xe8e   :  { %v1920_v52 = vmul.f32 1.442695, %v1919_v51 }
 0xe8f   :  { %v2169_v53 = vpop.xlane.xlu1 %2168 }
 0xe90   :  { %6064 = vpow2.f32 %v1920_v52  ;;  %v2173_v48 = vmul.f32 0.03125, %v2169_v53  ;;  %v2155_v52 = vld [vmem:[%s7138_s8 + $0x28] sm:$0xff] }
 0xe91   :  { %v5911_v53 = vpack.c.bf16 %v2155_v52, %v2154_v50 }
 0xe92   :  { %v2175_v54 = vsub.f32 %v2165_v46, %v2173_v48  ;;  %v2152_v46 = vld [vmem:[%s7138_s8 + $0x10] sm:$0xff] }
 0xe93   :  { %v5907_v51 = vpack.c.bf16 %v2153_v49, %v2152_v46  ;;  %v2156_v48 = vld [vmem:[%s7138_s8 + $0x30] sm:$0xff]  ;;  %v4960_v46 = vld [vmem:[%s7134_s4 + $0x158] sm:$0xff] }
 0xe94   :  { %v2177_v0 = vmul.f32 %v2175_v54, %v2175_v54 }
 0xe96   :  { %v2179_v7 = vsel %vm200_vm14, %v2177_v0, 0.0 }
 0xe97   :  { %2180 = vadd.xlane.f32.xlu1 %v2179_v7  ;;  %v4940_v7 = vld [vmem:[%s7139_s7 + $0x20] ss:$0 sm:$0xff] }
 0xe9a   :  { %v6065_v14 = vpop.eup %6064 }
 0xe9b   :  { %v1922_v17 = vsel %vm560_vm1, %v6065_v14, 0.0 }
 0xe9c   :  { %1923 = vadd.xlane.f32.xlu0 %v1922_v17 }
 0xf24   :  { %v2181_v59 = vpop.xlane.xlu1 %2180 }
 0xf25   :  { %v2185_v62 = vmul.f32 0.03125, %v2181_v59 }
 0xf27   :  { %v2187_v63 = vadd.f32 1e-12, %v2185_v62 }
 0xf29   :  { %v1924_v21 = vpop.xlane.xlu0 %1923 }
 0xf2a   :  { %6066 = vrcp.f32 %v1924_v21 }
 0xf2b   :  { %6068 = vrsqrt.f32 %v2187_v63 }
 0xf34   :  { %v6067_v56 = vpop.eup %6066 }
 0xf35   :  { %v1926_v6 = vmul.f32 %v6067_v56, %v6065_v14  ;;  %v6069_v2 = vpop.eup %6068 }
 0xf36   :  { %v2191_v3 = vmul.f32 %v6069_v2, %v2175_v54  ;;  %v2157_v54 = vld [vmem:[%s7138_s8 + $0x38] sm:$0xff] }
 0xf37   :  { %5495 = vmatmul.mubr.msk.f32.vlgmr.msra.gmra.mrb[28].mxu1 %vm560_vm1, %v1926_v6  ;;  %v5915_v0 = vpack.c.bf16 %v2157_v54, %v2156_v48  ;;  %v2435_v48 = vsub.s32 5, %v6216_v20 }
 0xf38   :  { %5894 = vmatpush3.bf16.msra.mxu1 %v6516_v61  ;;  %5508 = vmatprep.mubr.msk.f32.mxu1 %vm6119_vm15, %v6117_v31  ;;  %v2197_v13 = vmul.f32 %v2196_v5, %v2191_v3 }
 0xf39   :  { %5904 = vmatprep.subr.bf16.mxu1 %v5903_v34 }
 0xf3a   :  { %v6591_v61 = vadd.f32 %v2202_v10, %v2197_v13 }
 0xf3b   :  { %5509 = vmatmul.mubr.msk.f32.vlgmr.msra.gmra.mrb[30].mxu1 %vm482_vm0, %v1596_v37  ;;  %v2207_v37 = vld [vmem:[%s7139_s7 + $0x10] sm:$0xff] }
 0xf3c   :  { %v5899_v39 = vpack.c.bf16 %v2208_v38, %v2207_v37  ;;  %5906 = vmatpush3.bf16.msra.mxu1 %v5903_v34  ;;  %v4959_v34 = vld [vmem:[%s7134_s4 + $0x150] sm:$0xff] }
 0xf3d   :  { %5908 = vmatprep.subr.bf16.mxu1 %v5907_v51  ;;  %v6694_v49 = vpack.c.bf16 %v4960_v46, %v4959_v34 }
 0xf40   :  { %5910 = vmatpush3.bf16.msra.mxu1 %v5907_v51 }
 0xf41   :  { %5912 = vmatprep.subr.bf16.mxu1 %v5911_v53 }
 0xf44   :  { %5914 = vmatpush3.bf16.msra.mxu1 %v5911_v53  ;;  %v2429_v53 = vsub.s32 4, %v6216_v20 }
 0xf45   :  { %5916 = vmatprep.subr.bf16.mxu1 %v5915_v0 }
 0xf46   :  { %v6705_v54 = vrot.slane %v6574_v4, %v2429_v53 }
 0xf48   :  { %5918 = vmatpush3.bf16.msra.mxu1 %v5915_v0 }
 0xf49   :  { %5931 = vmatprep.subr.bf16.mxu1 %v6118_v47 }
0x100a   :  { %v1996_v11 = vpop.f32.mrb[28].mxu1 }
0x100b   :  { %v5496_v15 = vpop.f32.mrb[29].mxu1  ;;  %5502 = vmatmul.mubr.msk.f32.vlgmr.msra.gmra.mrb[16].mxu0 %vm482_vm0, %v1996_v11 }
0x100c   :  { %5519 = vmatprep.mubr.msk.f32.mxu0 %vm200_vm14, %v6591_v61 }
0x100e   :  { %v2144_v16 = vpop.f32.mrb[30].mxu1 }
0x100f   :  { %v5510_v18 = vpop.f32.mrb[31].mxu1 }
0x10de   :  { %v2071_v19 = vpop.f32.mrb[16].mxu0 }
0x10df   :  { %v2145_v22 = vadd.f32 %v2144_v16, %v2071_v19  ;;  %v5503_v9 = vpop.f32.mrb[17].mxu0 }
0x10e1   :  { %v2148_v23 = vadd.f32 %v2145_v22, %v6480_v55  ;;  %v2206_v55 = vld [vmem:[%s7139_s7 + $0x8] sm:$0xff] }
0x10e2   :  { %v5895_v35 = vpack.c.bf16 %v2206_v55, %v2205_v33 }
0x10e3   :  { %2149 = vst.msk [vmem:[#allocation2 + $0x8] sm:$0xff] %vm200_vm14, %v2148_v23 }
0x10e4   :  { %5896 = vmatprep.subr.bf16.mxu0 %v5895_v35 }
0x10e5   :  { %5898 = vmatpush3.bf16.msra.mxu0 %v5895_v35 }
0x10e6   :  { %5900 = vmatprep.subr.bf16.mxu0 %v5899_v39 }
0x10e9   :  { %5902 = vmatpush3.bf16.msra.mxu0 %v5899_v39 }
0x10ea   :  { %v2160_v26 = vld [vmem:[#allocation2 + $0x8] sm:$0xff]  ;;  %5919 = vmatprep.subr.bf16.mxu0 %v6118_v47 }
0x10eb   :  { %v2166_v24 = vadd.f32 %v2164_v8, %v2160_v26 }
0x10ed   :  { %v2170_v25 = vsel %vm200_vm14, %v2166_v24, 0.0 }
0x10ee   :  { %2171 = vadd.xlane.f32.xlu0 %v2170_v25 }
0x117b   :  { %v2172_v30 = vpop.xlane.xlu0 %2171 }
0x117c   :  { %v2174_v28 = vmul.f32 0.03125, %v2172_v30 }
0x117e   :  { %v2176_v29 = vsub.f32 %v2166_v24, %v2174_v28  ;;  %v2315_v24 = vsub.s32 3, %v6216_v20  ;;  %v4722_v20 = vld [vmem:[%s7141_s10 + $0x8] sm:$0xff] }
0x1180   :  { %v2178_v36 = vmul.f32 %v2176_v29, %v2176_v29  ;;  %v2316_v25 = vrot.slane %v6574_v4, %v2315_v24 }
0x1182   :  { %v2182_v32 = vsel %vm200_vm14, %v2178_v36, 0.0 }
0x1183   :  { %2183 = vadd.xlane.f32.xlu0 %v2182_v32 }
0x1210   :  { %v2184_v57 = vpop.xlane.xlu0 %2183 }
0x1211   :  { %v2186_v40 = vmul.f32 0.03125, %v2184_v57  ;;  %v4945_v57 = vld [vmem:[%s7134_s4 + $0xc0] sm:$0xff] }
0x1213   :  { %v2188_v41 = vadd.f32 1e-12, %v2186_v40  ;;  %v4946_v40 = vld [vmem:[%s7134_s4 + $0xc8] sm:$0xff] }
0x1215   :  { %6070 = vrsqrt.f32 %v2188_v41  ;;  %v6666_v41 = vpack.c.bf16 %v4946_v40, %v4945_v57 }
0x121f   :  { %v6071_v1 = vpop.eup %6070 }
0x1220   :  { %v2192_v8 = vmul.f32 %v6071_v1, %v2176_v29  ;;  %v4958_v1 = vld [vmem:[%s7134_s4 + $0x148] sm:$0xff] }
0x1222   :  { %v2198_v12 = vmul.f32 %v2196_v5, %v2192_v8 }
0x1224   :  { %v6613_v43 = vadd.f32 %v2202_v10, %v2198_v12  ;;  %v4947_v12 = vld [vmem:[%s7134_s4 + $0xd0] sm:$0xff] }
0x1225   :  { %v6685_v45 = vpack.c.bf16 %v4948_v44, %v4947_v12 }
0x1226   :  { %5520 = vmatmul.mubr.msk.f32.vlgmr.msra.gmra.mrb[18].mxu0 %vm200_vm14, %v6613_v43 }
0x1227   :  { %5549 = vmatprep.mubr.msk.f32.mxu0 %vm6119_vm15, %v6117_v31  ;;  %5921 = vmatpush3.bf16.msra.mxu0 %v6666_v41 }
0x1228   :  { %5922 = vmatprep.subr.bf16.mxu0 %v6118_v47 }
0x122b   :  { %5924 = vmatpush3.bf16.msra.mxu0 %v6685_v45 }
0x122c   :  { %5925 = vmatprep.subr.bf16.mxu0 %v6118_v47 }
0x12f9   :  { %v5521_v14 = vpop.f32.mrb[18].mxu0 }
0x12fa   :  { %v2292_v17 = vadd.f32 %v5521_v14, %v4940_v7  ;;  %v2286_v21 = vpop.f32.mrb[19].mxu0 }
0x12fb   :  { %v2287_v56 = vadd.f32 %v4940_v7, %v2286_v21  ;;  %v6710_v7 = vrot.slane %v6574_v4, %v2435_v48  ;;  %v4952_v21 = vld [vmem:[%s7134_s4 + $0x108] sm:$0xff]  ;;  %v4953_v4 = vld [vmem:[%s7134_s4 + $0x110] sm:$0xff] }
0x12fc   :  { %v2298_v6 = vmul.f32 0.044715, %v2292_v17  ;;  %v2296_v9 = vmul.f32 0.5, %v2292_v17 }
0x12fd   :  { %v2297_v59 = vmul.f32 0.044715, %v2287_v56  ;;  %v2295_v19 = vmul.f32 0.5, %v2287_v56 }
0x12fe   :  { %v2300_v62 = vmul.f32 %v2298_v6, %v2292_v17 }
0x12ff   :  { %v2299_v63 = vmul.f32 %v2297_v59, %v2287_v56 }
0x1300   :  { %v2302_v2 = vmul.f32 %v2300_v62, %v2292_v17  ;;  %v4954_v62 = vld [vmem:[%s7134_s4 + $0x118] sm:$0xff] }
0x1301   :  { %v2301_v3 = vmul.f32 %v2299_v63, %v2287_v56  ;;  %v6735_v63 = vpack.c.bf16 %v4954_v62, %v4953_v4 }
0x1302   :  { %v2304_v5 = vadd.f32 %v2302_v2, %v2292_v17  ;;  %v4951_v17 = vld [vmem:[%s7134_s4 + $0x100] sm:$0xff]  ;;  %v6751_v2 = vld [vmem:[%s7136_s5 + $0xa] ss:$0 sm:$0xff] }
0x1303   :  { %v2303_v13 = vadd.f32 %v2301_v3, %v2287_v56  ;;  %v6719_v6 = vpack.c.bf16 %v4952_v21, %v4951_v17  ;;  %v4974_v17 = vld [vmem:[%s7134_s4 + $0x120] sm:$0xff]  ;;  %v4975_v21 = vld [vmem:[%s7134_s4 + $0x128] sm:$0xff] }
0x1304   :  { %v2306_v10 = vmul.f32 0.7978846, %v2304_v5  ;;  %v6828_v4 = vpack.c.bf16 %v4975_v21, %v4974_v17 }
0x1305   :  { %v2305_v11 = vmul.f32 0.7978846, %v2303_v13 }
0x1306   :  { %6072 = vtanh.f32 %v2306_v10 }
0x1307   :  { %6074 = vtanh.f32 %v2305_v11 }
0x1310   :  { %v6073_v15 = vpop.eup %6072 }
0x1311   :  { %v6075_v16 = vpop.eup %6074  ;;  %v2310_v18 = vadd.f32 1.0, %v6073_v15  ;;  %v6758_v15 = vld [vmem:[%s7136_s5 + $0x8] ss:$0 sm:$0xff] }
0x1312   :  { %v2309_v22 = vadd.f32 1.0, %v6075_v16 }
0x1313   :  { %v2312_v26 = vmul.f32 %v2310_v18, %v2296_v9  ;;  %v4968_v18 = vld [vmem:[%s7134_s4 + $0xe0] sm:$0xff] }
0x1314   :  { %v2311_v23 = vmul.f32 %v2309_v22, %v2295_v19  ;;  %v4969_v19 = vld [vmem:[%s7134_s4 + $0xe8] sm:$0xff]  ;;  %v6769_v22 = vld [vmem:[%s7136_s5 + $0x6] ss:$0 sm:$0xff] }
0x1316   :  { %5538 = vmatprep.mubr.msk.f32.mxu1 %vm2317_vm2, %v2311_v23 }
0x1317   :  { %5539 = vmatmul.mubr.msk.f32.vlgmr.msra.gmra.mrb[32].mxu1 %vm2317_vm2, %v2312_v26  ;;  %v6773_v26 = vpack.c.bf16 %v4969_v19, %v4968_v18  ;;  %v6857_v19 = vld [vmem:[%s7136_s5 + $0x7] ss:$0 sm:$0xff] }
0x1318   :  { %5571 = vmatprep.mubr.msk.f32.mxu1 %vm6119_vm15, %v6117_v31 }
0x13ea   :  { %v5540_v30 = vpop.f32.mrb[32].mxu1 }
0x13eb   :  { %v6655_v28 = vadd.f32 %v5540_v30, %v2316_v25  ;;  %v2390_v29 = vpop.f32.mrb[33].mxu1  ;;  %v4970_v30 = vld [vmem:[%s7134_s4 + $0xf0] sm:$0xff] }
0x13ec   :  { %v2391_v36 = vadd.f32 %v2390_v29, %v2316_v25  ;;  %v4971_v29 = vld [vmem:[%s7134_s4 + $0xf8] sm:$0xff] }
0x13ee   :  { %v2399_v32 = vadd.f32 %v2391_v36, %v6591_v61  ;;  %v4957_v61 = vld [vmem:[%s7134_s4 + $0x140] sm:$0xff]  ;;  %v6785_v36 = vpack.c.bf16 %v4971_v29, %v4970_v30 }
0x13ef   :  { %v6674_v8 = vpack.c.bf16 %v4958_v1, %v4957_v61 }
0x13f0   :  { %v2401_v33 = vsel %vm200_vm14, %v2399_v32, 0.0 }
0x13f1   :  { %2402 = vadd.xlane.f32.xlu1 %v2401_v33  ;;  %5933 = vmatpush3.bf16.msra.mxu1 %v6674_v8  ;;  %v4981_v33 = vld [vmem:[%s7134_s4 + $0x168] sm:$0xff] }
0x13f2   :  { %5934 = vmatprep.subr.bf16.mxu1 %v6118_v47 }
0x13f5   :  { %5936 = vmatpush3.bf16.msra.mxu1 %v6694_v49 }
0x13f6   :  { %5579 = vmatprep.subr.mxu1 %v6117_v31 }
0x147e   :  { %v2403_v55 = vpop.xlane.xlu1 %2402 }
0x147f   :  { %v2407_v35 = vmul.f32 0.03125, %v2403_v55 }
0x1481   :  { %v2409_v37 = vsub.f32 %v2399_v32, %v2407_v35  ;;  %v4980_v32 = vld [vmem:[%s7134_s4 + $0x160] sm:$0xff]  ;;  %v4982_v35 = vld [vmem:[%s7134_s4 + $0x170] sm:$0xff] }
0x1482   :  { %v6797_v55 = vpack.c.bf16 %v4981_v33, %v4980_v32 }
0x1483   :  { %v2411_v38 = vmul.f32 %v2409_v37, %v2409_v37 }
0x1485   :  { %v2413_v39 = vsel %vm200_vm14, %v2411_v38, 0.0 }
0x1486   :  { %2414 = vadd.xlane.f32.xlu0 %v2413_v39 }
0x1513   :  { %v2415_v50 = vpop.xlane.xlu0 %2414 }
0x1514   :  { %v2419_v51 = vmul.f32 0.03125, %v2415_v50 }
0x1516   :  { %v2421_v52 = vadd.f32 1e-12, %v2419_v51 }
0x1518   :  { %6076 = vrsqrt.f32 %v2421_v52 }
0x1522   :  { %v6077_v0 = vpop.eup %6076 }
0x1523   :  { %v2425_v14 = vmul.f32 %v6077_v0, %v2409_v37  ;;  %v4983_v37 = vld [vmem:[%s7134_s4 + $0x178] sm:$0xff] }
0x1524   :  { %v6809_v38 = vpack.c.bf16 %v4983_v37, %v4982_v35 }
0x1525   :  { %v2431_v56 = vmul.f32 %v6705_v54, %v2425_v14 }
0x1527   :  { %v6722_v59 = vadd.f32 %v6710_v7, %v2431_v56 }
0x1529   :  { %5550 = vmatmul.mubr.msk.f32.vlgmr.msra.gmra.mrb[20].mxu0 %vm200_vm14, %v6722_v59  ;;  %5572 = vmatmul.mubr.msk.f32.vlgmr.msra.gmra.mrb[34].mxu1 %vm200_vm14, %v6722_v59 }
0x152a   :  { %5927 = vmatpush3.bf16.msra.mxu0 %v6719_v6  ;;  %5560 = vmatprep.mubr.msk.f32.mxu0 %vm6119_vm15, %v6117_v31 }
0x152b   :  { %5928 = vmatprep.subr.bf16.mxu0 %v6118_v47  ;;  %5581 = vmatprep.mubr.msk.f32.mxu1 %vm6119_vm15, %v6117_v31 }
0x152e   :  { %5930 = vmatpush3.bf16.msra.mxu0 %v6735_v63 }
0x152f   :  { %5574 = vmatprep.subr.mxu0 %v6117_v31 }
0x1531   :  { %5561 = vmatmul.mubr.msk.f32.vlgmr.msra.gmra.mrb[22].mxu0 %vm200_vm14, %v6722_v59 }
0x1532   :  { %5576 = vmatprep.mubr.msk.f32.mxu0 %vm6119_vm15, %v6117_v31 }
0x15fc   :  { %v2518_v3 = vpop.f32.mrb[20].mxu0  ;;  %v2678_v5 = vpop.f32.mrb[34].mxu1 }
0x15fd   :  { %v2679_v13 = vadd.f32 %v6751_v2, %v2678_v5  ;;  %v5551_v10 = vpop.f32.mrb[21].mxu0  ;;  %v5573_v11 = vpop.f32.mrb[35].mxu1  ;;  %v2519_v25 = vadd.f32 %v6769_v22, %v2518_v3  ;;  %v4976_v3 = vld [vmem:[%s7134_s4 + $0x130] sm:$0xff]  ;;  %v4977_v5 = vld [vmem:[%s7134_s4 + $0x138] sm:$0xff] }
0x15ff   :  { %5580 = vmatpush3.msra.mxu1 %v2679_v13  ;;  %v6838_v13 = vpack.c.bf16 %v4977_v5, %v4976_v3  ;;  %v4967_v3 = vld [vmem:[%s7137_s6 + $0x28] sm:$0xff] }
0x1600   :  { %5943 = vmatprep.subr.bf16.mxu1 %v6118_v47 }
0x1604   :  { %v2598_v16 = vpop.f32.mrb[22].mxu0 }
0x1605   :  { %v2599_v9 = vadd.f32 %v6758_v15, %v2598_v16  ;;  %v5562_v23 = vpop.f32.mrb[23].mxu0  ;;  %v6852_v16 = vld [vmem:[%s7136_s5 + $0x9] ss:$0 sm:$0xff] }
0x1607   :  { %5575 = vmatpush3.xpose.msk.msra.mxu0 %vm482_vm0, %v2599_v9 }
0x1608   :  { %5937 = vmatprep.subr.bf16.mxu0 %v6118_v47 }
0x160a   :  { %5577 = vmatmul.mubr.msk.f32.vlgmr.msra.gmra.mrb[24].mxu0 %vm482_vm0, %v2519_v25  ;;  %v6863_v25 = vld [vmem:[%s7136_s5 + $0xb] ss:$0 sm:$0xff] }
0x160b   :  { %5939 = vmatpush3.bf16.msra.mxu0 %v6773_v26  ;;  %5592 = vmatprep.mubr.msk.f32.mxu0 %vm6119_vm15, %v6117_v31 }
0x160c   :  { %5940 = vmatprep.subr.bf16.mxu0 %v6118_v47 }
0x160f   :  { %5942 = vmatpush3.bf16.msra.mxu0 %v6785_v36 }
0x1610   :  { %5949 = vmatprep.subr.bf16.mxu0 %v6118_v47 }
0x1612   :  { %5593 = vmatmul.mubr.msk.f32.vlgmr.msra.gmra.mrb[26].mxu0 %vm200_vm14, %v6722_v59 }
0x1613   :  { %5951 = vmatpush3.bf16.msra.mxu0 %v6797_v55  ;;  %5614 = vmatprep.mubr.msk.f32.mxu0 %vm6119_vm15, %v6117_v31 }
0x1614   :  { %5952 = vmatprep.subr.bf16.mxu0 %v6118_v47 }
0x1617   :  { %5954 = vmatpush3.bf16.msra.mxu0 %v6809_v38 }
0x1618   :  { %5955 = vmatprep.subr.bf16.mxu0 %v6118_v47 }
0x161a   :  { %5615 = vmatmul.mubr.msk.f32.vlgmr.msra.gmra.mrb[28].mxu0 %vm200_vm14, %v6722_v59 }
0x161b   :  { %5631 = vmatprep.mubr.msk.f32.mxu0 %vm6119_vm15, %v6117_v31 }
0x16dd   :  { %v2754_v39 = vpop.f32.mrb[24].mxu0 }
0x16de   :  { %v2758_v57 = vmul.f32 0.25, %v2754_v39  ;;  %v5578_v40 = vpop.f32.mrb[25].mxu0  ;;  %v2400_v39 = vadd.f32 %v6655_v28, %v6613_v43  ;;  %v4989_v43 = vld [vmem:[%s7137_s6 + $0x30] sm:$0xff]  ;;  %v4990_v28 = vld [vmem:[%s7137_s6 + $0x38] sm:$0xff] }
0x16e0   :  { %v2759_v61 = vsel %vm560_vm1, %v2758_v57, -inf }
0x16e1   :  { %2760 = vmax.xlane.f32.xlu1 %v2759_v61 }
0x16e5   :  { %v2922_v1 = vpop.f32.mrb[26].mxu0 }
0x16e6   :  { %v5594_v12 = vpop.f32.mrb[27].mxu0  ;;  %v2923_v30 = vadd.f32 %v6857_v19, %v2922_v1 }
0x16ed   :  { %v3082_v44 = vpop.f32.mrb[28].mxu0 }
0x16ee   :  { %v5616_v34 = vpop.f32.mrb[29].mxu0  ;;  %v3083_v29 = vadd.f32 %v6863_v25, %v3082_v44 }
0x176e   :  { %v2761_v46 = vpop.xlane.xlu1 %2760 }
0x176f   :  { %v2762_v50 = vsub.f32 %v2758_v57, %v2761_v46  ;;  %v2404_v57 = vsel %vm200_vm14, %v2400_v39, 0.0 }
0x1771   :  { %v2763_v51 = vmul.f32 1.442695, %v2762_v50 }
0x1773   :  { %6078 = vpow2.f32 %v2763_v51 }
0x177d   :  { %v6079_v52 = vpop.eup %6078 }
0x177e   :  { %v2765_v0 = vsel %vm560_vm1, %v6079_v52, 0.0 }
0x177f   :  { %2766 = vadd.xlane.f32.xlu0 %v2765_v0  ;;  %v6885_v0 = vpack.c.bf16 %v4990_v28, %v4989_v43 }
0x1781   :  { %5957 = vmatpush3.bf16.msra.mxu0 %v6885_v0 }
0x1782   :  { %5961 = vmatprep.subr.bf16.mxu0 %v6118_v47 }
0x180c   :  { %v2767_v14 = vpop.xlane.xlu0 %2766 }
0x180d   :  { %6080 = vrcp.f32 %v2767_v14 }
0x1817   :  { %v6081_v56 = vpop.eup %6080 }
0x1818   :  { %v2769_v62 = vmul.f32 %v6081_v56, %v6079_v52 }
0x181a   :  { %5582 = vmatmul.mubr.msk.f32.vlgmr.msra.gmra.mrb[36].mxu1 %vm560_vm1, %v2769_v62  ;;  %v4966_v62 = vld [vmem:[%s7137_s6 + $0x20] sm:$0xff] }
0x181b   :  { %5945 = vmatpush3.bf16.msra.mxu1 %v6828_v4  ;;  %5603 = vmatprep.mubr.msk.f32.mxu1 %vm6119_vm15, %v6117_v31 }
0x181c   :  { %5946 = vmatprep.subr.bf16.mxu1 %v6118_v47 }
0x181f   :  { %5948 = vmatpush3.bf16.msra.mxu1 %v6838_v13 }
0x1820   :  { %5617 = vmatprep.subr.mxu1 %v6117_v31 }
0x1822   :  { %5604 = vmatmul.mubr.msk.f32.vlgmr.msra.gmra.mrb[38].mxu1 %vm200_vm14, %v6722_v59 }
0x1823   :  { %5619 = vmatprep.mubr.msk.f32.mxu1 %vm6119_vm15, %v6117_v31 }
0x18ed   :  { %v2839_v10 = vpop.f32.mrb[36].mxu1 }
0x18ee   :  { %v5583_v11 = vpop.f32.mrb[37].mxu1 }
0x18ef   :  { %v6895_v11 = vpack.c.bf16 %v4967_v3, %v4966_v62 }
0x18f5   :  { %v3002_v18 = vpop.f32.mrb[38].mxu1 }
0x18f6   :  { %v3003_v9 = vadd.f32 %v6852_v16, %v3002_v18  ;;  %v5605_v23 = vpop.f32.mrb[39].mxu1 }
0x18f8   :  { %5618 = vmatpush3.xpose.msk.msra.mxu1 %vm482_vm0, %v3003_v9 }
0x18f9   :  { %5622 = vmatprep.subr.mxu1 %v6117_v31 }
0x18fb   :  { %5620 = vmatmul.mubr.msk.f32.vlgmr.msra.gmra.mrb[40].mxu1 %vm482_vm0, %v2923_v30 }
0x18fc   :  { %5623 = vmatpush3.msra.mxu1 %v3083_v29  ;;  %5624 = vmatprep.mubr.msk.f32.mxu1 %vm6119_vm15, %v6117_v31 }
0x18fd   :  { %5958 = vmatprep.subr.bf16.mxu1 %v6118_v47 }
0x19ce   :  { %v3158_v32 = vpop.f32.mrb[40].mxu1 }
0x19cf   :  { %v3162_v33 = vmul.f32 0.25, %v3158_v32  ;;  %v5621_v35 = vpop.f32.mrb[41].mxu1 }
0x19d1   :  { %v3163_v37 = vsel %vm560_vm1, %v3162_v33, -inf }
0x19d2   :  { %3164 = vmax.xlane.f32.xlu1 %v3163_v37 }
0x19d6   :  { %2405 = vadd.xlane.f32.xlu1 %v2404_v57 }
0x1a5f   :  { %v3165_v40 = vpop.xlane.xlu1 %3164 }
0x1a60   :  { %v3166_v61 = vsub.f32 %v3162_v33, %v3165_v40 }
0x1a62   :  { %v3167_v1 = vmul.f32 1.442695, %v3166_v61 }
0x1a63   :  { %v2406_v12 = vpop.xlane.xlu1 %2405 }
0x1a64   :  { %6082 = vpow2.f32 %v3167_v1  ;;  %v2408_v44 = vmul.f32 0.03125, %v2406_v12 }
0x1a66   :  { %v2410_v34 = vsub.f32 %v2400_v39, %v2408_v44 }
0x1a68   :  { %v2412_v51 = vmul.f32 %v2410_v34, %v2410_v34 }
0x1a6a   :  { %v2416_v52 = vsel %vm200_vm14, %v2412_v51, 0.0 }
0x1a6e   :  { %v6083_v46 = vpop.eup %6082 }
0x1a6f   :  { %v3169_v50 = vsel %vm560_vm1, %v6083_v46, 0.0 }
0x1a70   :  { %3170 = vadd.xlane.f32.xlu0 %v3169_v50 }
0x1a74   :  { %2417 = vadd.xlane.f32.xlu0 %v2416_v52 }
0x1afd   :  { %v3171_v14 = vpop.xlane.xlu0 %3170 }
0x1afe   :  { %6084 = vrcp.f32 %v3171_v14 }
0x1b01   :  { %v2418_v17 = vpop.xlane.xlu0 %2417 }
0x1b02   :  { %v2420_v21 = vmul.f32 0.03125, %v2418_v17 }
0x1b04   :  { %v2422_v56 = vadd.f32 1e-12, %v2420_v21 }
0x1b06   :  { %6086 = vrsqrt.f32 %v2422_v56 }
0x1b08   :  { %v6085_v5 = vpop.eup %6084 }
0x1b09   :  { %v3173_v18 = vmul.f32 %v6085_v5, %v6083_v46 }
0x1b0b   :  { %5625 = vmatmul.mubr.msk.f32.vlgmr.msra.gmra.mrb[42].mxu1 %vm560_vm1, %v3173_v18 }
0x1b0c   :  { %5960 = vmatpush3.bf16.msra.mxu1 %v6895_v11  ;;  %5638 = vmatprep.mubr.msk.f32.mxu1 %vm6119_vm15, %v6117_v31 }
0x1b0d   :  { %5967 = vmatprep.subr.bf16.mxu1 %v6118_v47 }
0x1b0f   :  { %5639 = vmatmul.mubr.msk.f32.vlgmr.msra.gmra.mrb[44].mxu1 %vm482_vm0, %v2839_v10 }
0x1b10   :  { %v6087_v9 = vpop.eup %6086  ;;  %5969 = vmatpush3.bf16.msra.mxu1 %v6719_v6  ;;  %5660 = vmatprep.mubr.msk.f32.mxu1 %vm6119_vm15, %v6117_v31 }
0x1b11   :  { %v2426_v23 = vmul.f32 %v6087_v9, %v2410_v34  ;;  %5970 = vmatprep.subr.bf16.mxu1 %v6118_v47 }
0x1b13   :  { %v2432_v30 = vmul.f32 %v6705_v54, %v2426_v23 }
0x1b14   :  { %5972 = vmatpush3.bf16.msra.mxu1 %v6735_v63 }
0x1b15   :  { %v6910_v29 = vadd.f32 %v6710_v7, %v2432_v30  ;;  %5674 = vmatprep.subr.mxu1 %v6117_v31 }
0x1b17   :  { %5661 = vmatmul.mubr.msk.f32.vlgmr.msra.gmra.mrb[46].mxu1 %vm200_vm14, %v6910_v29 }
0x1b18   :  { %5676 = vmatprep.mubr.msk.f32.mxu1 %vm6119_vm15, %v6117_v31 }
0x1bde   :  { %v3243_v6 = vpop.f32.mrb[42].mxu1 }
0x1bdf   :  { %v5626_v10 = vpop.f32.mrb[43].mxu1  ;;  %5632 = vmatmul.mubr.msk.f32.vlgmr.msra.gmra.mrb[30].mxu0 %vm482_vm0, %v3243_v6 }
0x1be0   :  { %5963 = vmatpush3.bf16.msra.mxu0 %v6666_v41  ;;  %5649 = vmatprep.mubr.msk.f32.mxu0 %vm6119_vm15, %v6117_v31 }
0x1be1   :  { %5964 = vmatprep.subr.bf16.mxu0 %v6118_v47 }
0x1be2   :  { %v3392_v54 = vpop.f32.mrb[44].mxu1 }
0x1be3   :  { %v5640_v7 = vpop.f32.mrb[45].mxu1 }
0x1be4   :  { %5966 = vmatpush3.bf16.msra.mxu0 %v6685_v45 }
0x1be5   :  { %5973 = vmatprep.subr.bf16.mxu0 %v6118_v47 }
0x1be7   :  { %5650 = vmatmul.mubr.msk.f32.vlgmr.msra.gmra.mrb[32].mxu0 %vm200_vm14, %v6910_v29 }
0x1be8   :  { %5975 = vmatpush3.bf16.msra.mxu0 %v6674_v8  ;;  %5671 = vmatprep.mubr.msk.f32.mxu0 %vm6119_vm15, %v6117_v31 }
0x1be9   :  { %5976 = vmatprep.subr.bf16.mxu0 %v6118_v47 }
0x1bea   :  { %v3555_v41 = vpop.f32.mrb[46].mxu1 }
0x1beb   :  { %v3556_v63 = vadd.f32 %v6758_v15, %v3555_v41  ;;  %v5662_v32 = vpop.f32.mrb[47].mxu1 }
0x1bec   :  { %5978 = vmatpush3.bf16.msra.mxu0 %v6694_v49 }
0x1bed   :  { %5675 = vmatpush3.xpose.msk.msra.mxu1 %vm482_vm0, %v3556_v63  ;;  %5979 = vmatprep.subr.bf16.mxu0 %v6118_v47 }
0x1bee   :  { %5679 = vmatprep.subr.mxu1 %v6117_v31 }
0x1bef   :  { %5672 = vmatmul.mubr.msk.f32.vlgmr.msra.gmra.mrb[34].mxu0 %vm200_vm14, %v6910_v29 }
0x1bf0   :  { %5981 = vmatpush3.bf16.msra.mxu0 %v6773_v26  ;;  %5692 = vmatprep.mubr.msk.f32.mxu0 %vm6119_vm15, %v6117_v31 }
0x1bf1   :  { %5982 = vmatprep.subr.bf16.mxu0 %v6118_v47 }
0x1bf4   :  { %5984 = vmatpush3.bf16.msra.mxu0 %v6785_v36 }
0x1bf5   :  { %5991 = vmatprep.subr.bf16.mxu0 %v6118_v47 }
0x1bf7   :  { %5693 = vmatmul.mubr.msk.f32.vlgmr.msra.gmra.mrb[36].mxu0 %vm200_vm14, %v6910_v29 }
0x1bf8   :  { %5993 = vmatpush3.bf16.msra.mxu0 %v6797_v55  ;;  %5714 = vmatprep.mubr.msk.f32.mxu0 %vm6119_vm15, %v6117_v31 }
0x1bf9   :  { %5994 = vmatprep.subr.bf16.mxu0 %v6118_v47 }
0x1bfc   :  { %5996 = vmatpush3.bf16.msra.mxu0 %v6809_v38 }
0x1bfd   :  { %5997 = vmatprep.subr.bf16.mxu0 %v6118_v47 }
0x1bff   :  { %5715 = vmatmul.mubr.msk.f32.vlgmr.msra.gmra.mrb[38].mxu0 %vm200_vm14, %v6910_v29 }
0x1c00   :  { %5999 = vmatpush3.bf16.msra.mxu0 %v6885_v0  ;;  %5731 = vmatprep.mubr.msk.f32.mxu0 %vm6119_vm15, %v6117_v31 }
0x1cb2   :  { %v3319_v8 = vpop.f32.mrb[30].mxu0 }
0x1cb3   :  { %v3393_v45 = vadd.f32 %v3392_v54, %v3319_v8  ;;  %v5633_v49 = vpop.f32.mrb[31].mxu0 }
0x1cb5   :  { %v3396_v15 = vadd.f32 %v3393_v45, %v6722_v59 }
0x1cb7   :  { %3397 = vst.msk [vmem:[#allocation2] sm:$0xff] %vm200_vm14, %v3396_v15 }
0x1cba   :  { %v3476_v26 = vpop.f32.mrb[32].mxu0 }
0x1cbb   :  { %v3477_v36 = vadd.f32 %v6769_v22, %v3476_v26  ;;  %v5651_v55 = vpop.f32.mrb[33].mxu0 }
0x1cbd   :  { %5677 = vmatmul.mubr.msk.f32.vlgmr.msra.gmra.mrb[48].mxu1 %vm482_vm0, %v3477_v36 }
0x1cbe   :  { %5681 = vmatprep.mubr.msk.f32.mxu1 %vm6119_vm15, %v6117_v31  ;;  %v4359_v56 = vld [vmem:[#allocation2] sm:$0xff] }
0x1cc2   :  { %v3634_v38 = vpop.f32.mrb[34].mxu0 }
0x1cc3   :  { %v3635_v33 = vadd.f32 %v6751_v2, %v3634_v38  ;;  %v5673_v35 = vpop.f32.mrb[35].mxu0 }
0x1cc5   :  { %5680 = vmatpush3.msra.mxu1 %v3635_v33 }
0x1cc6   :  { %5985 = vmatprep.subr.bf16.mxu1 %v6118_v47 }
0x1cca   :  { %v3876_v37 = vpop.f32.mrb[36].mxu0 }
0x1ccb   :  { %v5694_v59 = vpop.f32.mrb[37].mxu0  ;;  %v3877_v17 = vadd.f32 %v6857_v19, %v3876_v37 }
0x1cd2   :  { %v4034_v39 = vpop.f32.mrb[38].mxu0 }
0x1cd3   :  { %v5716_v57 = vpop.f32.mrb[39].mxu0 }
0x1d90   :  { %v3710_v40 = vpop.f32.mrb[48].mxu1 }
0x1d91   :  { %v3714_v61 = vmul.f32 0.25, %v3710_v40  ;;  %v5678_v22 = vpop.f32.mrb[49].mxu1 }
0x1d93   :  { %v3715_v1 = vsel %vm560_vm1, %v3714_v61, -inf }
0x1d94   :  { %3716 = vmax.xlane.f32.xlu1 %v3715_v1 }
0x1e21   :  { %v3717_v12 = vpop.xlane.xlu1 %3716 }
0x1e22   :  { %v3718_v44 = vsub.f32 %v3714_v61, %v3717_v12 }
0x1e24   :  { %v3719_v34 = vmul.f32 1.442695, %v3718_v44 }
0x1e26   :  { %6088 = vpow2.f32 %v3719_v34 }
0x1e30   :  { %v6089_v46 = vpop.eup %6088 }
0x1e31   :  { %v3721_v2 = vsel %vm560_vm1, %v6089_v46, 0.0 }
0x1e32   :  { %3722 = vadd.xlane.f32.xlu0 %v3721_v2 }
0x1ebf   :  { %v3723_v50 = vpop.xlane.xlu0 %3722 }
0x1ec0   :  { %6090 = vrcp.f32 %v3723_v50 }
0x1eca   :  { %v6091_v51 = vpop.eup %6090 }
0x1ecb   :  { %v3725_v52 = vmul.f32 %v6091_v51, %v6089_v46 }
0x1ecd   :  { %5682 = vmatmul.mubr.msk.f32.vlgmr.msra.gmra.mrb[50].mxu1 %vm560_vm1, %v3725_v52  ;;  %v5050_v52 = vld [vmem:[%s7139_s7 + $0x28] sm:$0xff] }
0x1ece   :  { %5987 = vmatpush3.bf16.msra.mxu1 %v6828_v4  ;;  %5703 = vmatprep.mubr.msk.f32.mxu1 %vm6119_vm15, %v6117_v31 }
0x1ecf   :  { %5988 = vmatprep.subr.bf16.mxu1 %v6118_v47 }
0x1ed2   :  { %5990 = vmatpush3.bf16.msra.mxu1 %v6838_v13  ;;  %v4035_v13 = vadd.f32 %v6863_v25, %v4034_v39 }
0x1ed3   :  { %5717 = vmatprep.subr.mxu1 %v6117_v31 }
0x1ed5   :  { %5704 = vmatmul.mubr.msk.f32.vlgmr.msra.gmra.mrb[52].mxu1 %vm200_vm14, %v6910_v29 }
0x1ed6   :  { %5719 = vmatprep.mubr.msk.f32.mxu1 %vm6119_vm15, %v6117_v31 }
0x1fa0   :  { %v3795_v43 = vpop.f32.mrb[50].mxu1 }
0x1fa1   :  { %v5683_v28 = vpop.f32.mrb[51].mxu1 }
0x1fa2   :  { %v5052_v28 = vld [vmem:[%s7139_s7 + $0x38] sm:$0xff] }
0x1fa8   :  { %v3955_v0 = vpop.f32.mrb[52].mxu1 }
0x1fa9   :  { %v3956_v4 = vadd.f32 %v6852_v16, %v3955_v0  ;;  %v5705_v14 = vpop.f32.mrb[53].mxu1  ;;  %v6989_v16 = vld [vmem:[%s7138_s8 + $0x88] sm:$0x3f]  ;;  %v5053_v0 = vld [vmem:[%s7139_s7 + $0x40] sm:$0xff] }
0x1faa   :  { %v4364_v19 = vrot.slane %v6989_v16, %v6569_v42  ;;  %v4396_v33 = vrot.slane %v6989_v16, %v6281_v58  ;;  %v4402_v37 = vrot.slane %v6989_v16, %v6287_v60 }
0x1fab   :  { %5718 = vmatpush3.xpose.msk.msra.mxu1 %vm482_vm0, %v3956_v4  ;;  %v6007_v4 = vpack.c.bf16 %v5053_v0, %v5052_v28 }
0x1fac   :  { %5722 = vmatprep.subr.mxu1 %v6117_v31  ;;  %v4365_v5 = vadd.f32 %v4364_v19, %v4359_v56 }
0x1fae   :  { %5720 = vmatmul.mubr.msk.f32.vlgmr.msra.gmra.mrb[54].mxu1 %vm482_vm0, %v3877_v17  ;;  %v4367_v18 = vsel %vm200_vm14, %v4365_v5, 0.0 }
0x1faf   :  { %5723 = vmatpush3.msra.mxu1 %v4035_v13  ;;  %5724 = vmatprep.mubr.msk.f32.mxu1 %vm6119_vm15, %v6117_v31 }
0x1fb0   :  { %6000 = vmatprep.subr.bf16.mxu1 %v6118_v47 }
0x2081   :  { %v4110_v21 = vpop.f32.mrb[54].mxu1 }
0x2082   :  { %v4114_v62 = vmul.f32 0.25, %v4110_v21  ;;  %v5721_v25 = vpop.f32.mrb[55].mxu1 }
0x2083   :  { %v5041_v25 = vld [vmem:[%s7138_s8 + $0x48] sm:$0xff] }
0x2084   :  { %v4115_v3 = vsel %vm560_vm1, %v4114_v62, -inf }
0x2085   :  { %4116 = vmax.xlane.f32.xlu1 %v4115_v3  ;;  %v5042_v3 = vld [vmem:[%s7138_s8 + $0x50] sm:$0xff] }
0x2089   :  { %4368 = vadd.xlane.f32.xlu1 %v4367_v18  ;;  %v5043_v18 = vld [vmem:[%s7138_s8 + $0x58] sm:$0xff] }
0x2112   :  { %v4117_v9 = vpop.xlane.xlu1 %4116 }
0x2113   :  { %v4118_v23 = vsub.f32 %v4114_v62, %v4117_v9  ;;  %v5044_v9 = vld [vmem:[%s7138_s8 + $0x60] sm:$0xff] }
0x2115   :  { %v4119_v30 = vmul.f32 1.442695, %v4118_v23  ;;  %v5045_v23 = vld [vmem:[%s7138_s8 + $0x68] sm:$0xff] }
0x2116   :  { %v4369_v6 = vpop.xlane.xlu1 %4368 }
0x2117   :  { %6092 = vpow2.f32 %v4119_v30  ;;  %v4373_v10 = vmul.f32 0.03125, %v4369_v6  ;;  %v6015_v30 = vpack.c.bf16 %v5044_v9, %v5043_v18  ;;  %v5046_v6 = vld [vmem:[%s7138_s8 + $0x70] sm:$0xff]  ;;  %v198_v18 = vld [vmem:[%s7135_s9 + $0x18] sm:$0xff] }
0x2119   :  { %v4375_v54 = vsub.f32 %v4365_v5, %v4373_v10  ;;  %v6011_v5 = vpack.c.bf16 %v5042_v3, %v5041_v25  ;;  %v6019_v10 = vpack.c.bf16 %v5046_v6, %v5045_v23  ;;  %v196_v25 = vld [vmem:[%s7135_s9 + $0x8] sm:$0xff] }
0x211b   :  { %v4377_v7 = vmul.f32 %v4375_v54, %v4375_v54 }
0x211d   :  { %v4379_v41 = vsel %vm200_vm14, %v4377_v7, 0.0  ;;  %v5048_v7 = vld [vmem:[%s7138_s8 + $0x80] sm:$0xff] }
0x211e   :  { %4380 = vadd.xlane.f32.xlu1 %v4379_v41 }
0x2121   :  { %v6093_v63 = vpop.eup %6092 }
0x2122   :  { %v4121_v32 = vsel %vm560_vm1, %v6093_v63, 0.0 }
0x2123   :  { %4122 = vadd.xlane.f32.xlu0 %v4121_v32 }
0x21ab   :  { %v4381_v15 = vpop.xlane.xlu1 %4380 }
0x21ac   :  { %v4385_v26 = vmul.f32 0.03125, %v4381_v15 }
0x21ae   :  { %v4387_v36 = vadd.f32 1e-12, %v4385_v26 }
0x21b0   :  { %v4123_v8 = vpop.xlane.xlu0 %4122 }
0x21b1   :  { %6094 = vrcp.f32 %v4123_v8 }
0x21b2   :  { %6096 = vrsqrt.f32 %v4387_v36 }
0x21bb   :  { %v6095_v45 = vpop.eup %6094 }
0x21bc   :  { %v4125_v49 = vmul.f32 %v6095_v45, %v6093_v63  ;;  %v6097_v55 = vpop.eup %6096  ;;  %v5055_v63 = vld [vmem:[%s7139_s7 + $0x48] ss:$0 sm:$0xff] }
0x21bd   :  { %v4391_v38 = vmul.f32 %v6097_v55, %v4375_v54  ;;  %v5047_v54 = vld [vmem:[%s7138_s8 + $0x78] sm:$0xff] }
0x21be   :  { %5725 = vmatmul.mubr.msk.f32.vlgmr.msra.gmra.mrb[56].mxu1 %vm560_vm1, %v4125_v49  ;;  %v6023_v41 = vpack.c.bf16 %v5048_v7, %v5047_v54 }
0x21bf   :  { %6002 = vmatpush3.bf16.msra.mxu1 %v6895_v11  ;;  %5738 = vmatprep.mubr.msk.f32.mxu1 %vm6119_vm15, %v6117_v31  ;;  %v4397_v35 = vmul.f32 %v4396_v33, %v4391_v38 }
0x21c0   :  { %6012 = vmatprep.subr.bf16.mxu1 %v6011_v5 }
0x21c1   :  { %v7006_v11 = vadd.f32 %v4402_v37, %v4397_v35 }
0x21c2   :  { %5739 = vmatmul.mubr.msk.f32.vlgmr.msra.gmra.mrb[58].mxu1 %vm482_vm0, %v3795_v43 }
0x21c3   :  { %6014 = vmatpush3.bf16.msra.mxu1 %v6011_v5  ;;  %v197_v5 = vld [vmem:[%s7135_s9 + $0x10] sm:$0xff] }
0x21c4   :  { %6016 = vmatprep.subr.bf16.mxu1 %v6015_v30  ;;  %v6031_v9 = vpack.c.bf16 %v198_v18, %v197_v5 }
0x21c7   :  { %6018 = vmatpush3.bf16.msra.mxu1 %v6015_v30 }
0x21c8   :  { %6020 = vmatprep.subr.bf16.mxu1 %v6019_v10 }
0x21cb   :  { %6022 = vmatpush3.bf16.msra.mxu1 %v6019_v10 }
0x21cc   :  { %6024 = vmatprep.subr.bf16.mxu1 %v6023_v41 }
0x21cf   :  { %6026 = vmatpush3.bf16.msra.mxu1 %v6023_v41  ;;  %v4630_v41 = vrot.slane %v6989_v16, %v2429_v53  ;;  %v4721_v53 = vld [vmem:[%s7141_s10] sm:$0xff] }
0x2291   :  { %v4195_v59 = vpop.f32.mrb[56].mxu1 }
0x2292   :  { %v5726_v39 = vpop.f32.mrb[57].mxu1  ;;  %5732 = vmatmul.mubr.msk.f32.vlgmr.msra.gmra.mrb[40].mxu0 %vm482_vm0, %v4195_v59 }
0x2293   :  { %5749 = vmatprep.mubr.msk.f32.mxu0 %vm200_vm14, %v7006_v11 }
0x2295   :  { %v4343_v57 = vpop.f32.mrb[58].mxu1 }
0x2296   :  { %v5740_v40 = vpop.f32.mrb[59].mxu1 }
0x2365   :  { %v4270_v61 = vpop.f32.mrb[40].mxu0 }
0x2366   :  { %v4344_v22 = vadd.f32 %v4343_v57, %v4270_v61  ;;  %v5733_v1 = vpop.f32.mrb[41].mxu0 }
0x2368   :  { %v4347_v58 = vadd.f32 %v4344_v22, %v6910_v29  ;;  %v5051_v29 = vld [vmem:[%s7139_s7 + $0x30] sm:$0xff] }
0x2369   :  { %v6003_v43 = vpack.c.bf16 %v5051_v29, %v5050_v52 }
0x236a   :  { %4348 = vst.msk [vmem:[#allocation2 + $0x8] sm:$0xff] %vm200_vm14, %v4347_v58 }
0x236b   :  { %6004 = vmatprep.subr.bf16.mxu0 %v6003_v43 }
0x236c   :  { %6006 = vmatpush3.bf16.msra.mxu0 %v6003_v43 }
0x236d   :  { %6008 = vmatprep.subr.bf16.mxu0 %v6007_v4 }
0x2370   :  { %6010 = vmatpush3.bf16.msra.mxu0 %v6007_v4 }
0x2371   :  { %v4360_v12 = vld [vmem:[#allocation2 + $0x8] sm:$0xff]  ;;  %6027 = vmatprep.subr.bf16.mxu0 %v6118_v47 }
0x2372   :  { %v4366_v60 = vadd.f32 %v4364_v19, %v4360_v12 }
0x2374   :  { %v4370_v44 = vsel %vm200_vm14, %v4366_v60, 0.0 }
0x2375   :  { %4371 = vadd.xlane.f32.xlu0 %v4370_v44  ;;  %v4517_v44 = vrot.slane %v6989_v16, %v2315_v24 }
0x2402   :  { %v4372_v34 = vpop.xlane.xlu0 %4371 }
0x2403   :  { %v4374_v46 = vmul.f32 0.03125, %v4372_v34 }
0x2405   :  { %v4376_v2 = vsub.f32 %v4366_v60, %v4374_v46 }
0x2407   :  { %v4378_v50 = vmul.f32 %v4376_v2, %v4376_v2 }
0x2409   :  { %v4382_v51 = vsel %vm200_vm14, %v4378_v50, 0.0 }
0x240a   :  { %4383 = vadd.xlane.f32.xlu0 %v4382_v51 }
0x2497   :  { %v4384_v14 = vpop.xlane.xlu0 %4383 }
0x2498   :  { %v4386_v17 = vmul.f32 0.03125, %v4384_v14 }
0x249a   :  { %v4388_v13 = vadd.f32 1e-12, %v4386_v17 }
0x249c   :  { %6098 = vrsqrt.f32 %v4388_v13 }
0x24a6   :  { %v6099_v19 = vpop.eup %6098 }
0x24a7   :  { %v4392_v21 = vmul.f32 %v6099_v19, %v4376_v2 }
0x24a9   :  { %v4398_v56 = vmul.f32 %v4396_v33, %v4392_v21 }
0x24ab   :  { %v4404_v62 = vadd.f32 %v4402_v37, %v4398_v56 }
0x24ad   :  { %5750 = vmatmul.mubr.msk.f32.vlgmr.msra.gmra.mrb[42].mxu0 %vm200_vm14, %v4404_v62 }
0x24ae   :  { %5779 = vmatprep.mubr.msk.f32.mxu0 %vm6119_vm15, %v6117_v31 }
0x2580   :  { %v5751_v32 = vpop.f32.mrb[42].mxu0 }
0x2581   :  { %v4493_v8 = vadd.f32 %v5751_v32, %v5055_v63  ;;  %v4487_v45 = vpop.f32.mrb[43].mxu0 }
0x2582   :  { %v4488_v49 = vadd.f32 %v5055_v63, %v4487_v45  ;;  %v4636_v45 = vrot.slane %v6989_v16, %v2435_v48  ;;  %v4723_v48 = vld [vmem:[%s7141_s10 + $0x10] sm:$0xff]  ;;  %v6034_v16 = vpack.c.bf16 %v4722_v20, %v4721_v53 }
0x2583   :  { %v4499_v15 = vmul.f32 0.044715, %v4493_v8  ;;  %v4497_v58 = vmul.f32 0.5, %v4493_v8 }
0x2584   :  { %v4498_v26 = vmul.f32 0.044715, %v4488_v49  ;;  %v4496_v22 = vmul.f32 0.5, %v4488_v49 }
0x2585   :  { %v4501_v36 = vmul.f32 %v4499_v15, %v4493_v8 }
0x2586   :  { %v4500_v55 = vmul.f32 %v4498_v26, %v4488_v49 }
0x2587   :  { %v4503_v38 = vmul.f32 %v4501_v36, %v4493_v8 }
0x2588   :  { %v4502_v33 = vmul.f32 %v4500_v55, %v4488_v49 }
0x2589   :  { %v4505_v35 = vadd.f32 %v4503_v38, %v4493_v8 }
0x258a   :  { %v4504_v37 = vadd.f32 %v4502_v33, %v4488_v49 }
0x258b   :  { %v4507_v59 = vmul.f32 0.7978846, %v4505_v35  ;;  %v4724_v35 = vld [vmem:[%s7141_s10 + $0x18] sm:$0xff] }
0x258c   :  { %v4506_v39 = vmul.f32 0.7978846, %v4504_v37  ;;  %v6037_v37 = vpack.c.bf16 %v4724_v35, %v4723_v48 }
0x258d   :  { %6100 = vtanh.f32 %v4507_v59  ;;  %v6114_v59 = vld [vmem:[%s7135_s9 + $0x20] sm:$0x7] }
0x258e   :  { %6102 = vtanh.f32 %v4506_v39  ;;  %v4642_v39 = vrot.slane %v6114_v59, %v6569_v42 }
0x2597   :  { %v6101_v57 = vpop.eup %6100 }
0x2598   :  { %v6103_v40 = vpop.eup %6102  ;;  %v4511_v61 = vadd.f32 1.0, %v6101_v57 }
0x2599   :  { %v4510_v1 = vadd.f32 1.0, %v6103_v40 }
0x259a   :  { %v4513_v60 = vmul.f32 %v4511_v61, %v4497_v58 }
0x259b   :  { %v4512_v12 = vmul.f32 %v4510_v1, %v4496_v22 }
0x259d   :  { %5768 = vmatprep.mubr.msk.f32.mxu1 %vm2317_vm2, %v4512_v12 }
0x259e   :  { %5769 = vmatmul.mubr.msk.f32.vlgmr.msra.gmra.mrb[60].mxu1 %vm2317_vm2, %v4513_v60 }
0x2671   :  { %v5770_v34 = vpop.f32.mrb[60].mxu1 }
0x2672   :  { %v4596_v46 = vadd.f32 %v5770_v34, %v4517_v44  ;;  %v4590_v2 = vpop.f32.mrb[61].mxu1 }
0x2673   :  { %v4591_v50 = vadd.f32 %v4590_v2, %v4517_v44 }
0x2674   :  { %v4600_v51 = vadd.f32 %v4596_v46, %v4404_v62  ;;  %v195_v62 = vld [vmem:[%s7135_s9] sm:$0xff] }
0x2675   :  { %v4599_v52 = vadd.f32 %v4591_v50, %v7006_v11  ;;  %v4816_v11 = vld [vmem:[%s7140_s2] sm:$0x3]  ;;  %v6028_v3 = vpack.c.bf16 %v196_v25, %v195_v62 }
0x2676   :  { %v4604_v29 = vsel %vm200_vm14, %v4600_v51, 0.0 }
0x2677   :  { %4605 = vadd.xlane.f32.xlu1 %v4604_v29  ;;  %v4601_v43 = vsel %vm200_vm14, %v4599_v52, 0.0  ;;  %6029 = vmatpush3.bf16.msra.mxu0 %v6028_v3 }
0x2678   :  { %4602 = vadd.xlane.f32.xlu0 %v4601_v43  ;;  %6030 = vmatprep.subr.bf16.mxu0 %v6118_v47 }
0x267b   :  { %6032 = vmatpush3.bf16.msra.mxu0 %v6031_v9 }
0x267c   :  { %6033 = vmatprep.subr.bf16.mxu0 %v6118_v47 }
0x2704   :  { %v4606_v28 = vpop.xlane.xlu1 %4605 }
0x2705   :  { %v4608_v0 = vmul.f32 0.03125, %v4606_v28  ;;  %v4603_v4 = vpop.xlane.xlu0 %4602 }
0x2706   :  { %v4607_v14 = vmul.f32 0.03125, %v4603_v4 }
0x2707   :  { %v4610_v17 = vsub.f32 %v4600_v51, %v4608_v0 }
0x2708   :  { %v4609_v13 = vsub.f32 %v4599_v52, %v4607_v14 }
0x2709   :  { %v4612_v24 = vmul.f32 %v4610_v17, %v4610_v17 }
0x270a   :  { %v4611_v19 = vmul.f32 %v4609_v13, %v4609_v13 }
0x270b   :  { %v4616_v21 = vsel %vm200_vm14, %v4612_v24, 0.0 }
0x270c   :  { %4617 = vadd.xlane.f32.xlu1 %v4616_v21  ;;  %v4613_v56 = vsel %vm200_vm14, %v4611_v19, 0.0 }
0x270d   :  { %4614 = vadd.xlane.f32.xlu0 %v4613_v56 }
0x2723   :  { %4818 = vperm.xlu0 %6046, %v4816_v11  }
0x2799   :  { %v4618_v23 = vpop.xlane.xlu1 %4617 }
0x279a   :  { %v4620_v30 = vmul.f32 0.03125, %v4618_v23  ;;  %v4615_v6 = vpop.xlane.xlu0 %4614 }
0x279b   :  { %v4619_v10 = vmul.f32 0.03125, %v4615_v6 }
0x279c   :  { %v4622_v54 = vadd.f32 1e-12, %v4620_v30 }
0x279d   :  { %v4621_v7 = vadd.f32 1e-12, %v4619_v10 }
0x279e   :  { %6104 = vrsqrt.f32 %v4622_v54 }
0x279f   :  { %6106 = vrsqrt.f32 %v4621_v7 }
0x27a2   :  { %v4819_v46 = vpop.permute.xlu0 %4818 }
0x27a3   :  { %vm4820_vm5 = vcmp.eq.s32.totalorder %v6220_v27, %v4819_v46 }
0x27a4   :  { %v5063_v50 = vsel %vm4820_vm5, 1.0, %v6117_v31 }
0x27a8   :  { %v6105_v63 = vpop.eup %6104 }
0x27a9   :  { %v6107_v32 = vpop.eup %6106  ;;  %v4626_v8 = vmul.f32 %v6105_v63, %v4610_v17 }
0x27aa   :  { %v4625_v49 = vmul.f32 %v6107_v32, %v4609_v13 }
0x27ab   :  { %v4632_v15 = vmul.f32 %v4630_v41, %v4626_v8 }
0x27ac   :  { %v4631_v26 = vmul.f32 %v4630_v41, %v4625_v49 }
0x27ad   :  { %v4638_v36 = vadd.f32 %v4636_v45, %v4632_v15 }
0x27ae   :  { %v4637_v55 = vadd.f32 %v4636_v45, %v4631_v26 }
0x27af   :  { %v4645_v38 = vrot.slane %v4638_v36, 7 }
0x27b1   :  { %v4647_v33 = vsel %vm4646_vm3, %v4645_v38, %v4637_v55 }
0x27b2   :  { %5780 = vmatmul.mubr.msk.f32.vlgmr.msra.gmra.mrb[44].mxu0 %vm200_vm14, %v4647_v33 }
0x27b3   :  { %5790 = vmatprep.mubr.msk.f32.mxu0 %vm6119_vm15, %v6117_v31  ;;  %6035 = vmatpush3.bf16.msra.mxu0 %v6034_v16 }
0x27b4   :  { %6036 = vmatprep.subr.bf16.mxu0 %v6118_v47  ;;  %v5061_v47 = vld [vmem:[%s7141_s10 + $0x20] ss:$0 sm:$0xff] }
0x27b7   :  { %6038 = vmatpush3.bf16.msra.mxu0 %v6037_v37 }
0x2885   :  { %v4716_v57 = vpop.f32.mrb[44].mxu0 }
0x2886   :  { %v4717_v40 = vadd.f32 %v4716_v57, %v4642_v39  ;;  %v5781_v61 = vpop.f32.mrb[45].mxu0 }
0x2888   :  { %6108 = vtanh.f32 %v4717_v40 }
0x2892   :  { %v6109_v22 = vpop.eup %6108 }
0x2893   :  { %5791 = vmatmul.mubr.msk.f32.vlgmr.msra.gmra.mrb[46].mxu0 %vm200_vm14, %v6109_v22 }
0x2966   :  { %v4799_v1 = vpop.f32.mrb[46].mxu0 }
0x2967   :  { %v4800_v58 = vadd.f32 %v5061_v47, %v4799_v1  ;;  %v5792_v42 = vpop.f32.mrb[47].mxu0 }
0x2969   :  { %v4804_v12 = vsel %vm4803_vm4, %v4800_v58, -inf  ;;  %4843 = vst.msk [vmem:[%s7142_s11] sm:$0x3] %vm4803_vm4, %v4800_v58  ;;  %v4823_v52 = vmul.f32 %v5063_v50, %v4800_v58 }
0x296a   :  { %4805 = vmax.xlane.f32.xlu1 %v4804_v12 }
0x296b   :  { %v4824_v29 = vsel %vm4803_vm4, %v4823_v52, 0.0 }
0x29f7   :  { %v4806_v60 = vpop.xlane.xlu1 %4805 }
0x29f8   :  { %v4807_v44 = vsub.f32 %v4800_v58, %v4806_v60 }
0x29fa   :  { %v4808_v34 = vmul.f32 1.442695, %v4807_v44 }
0x29fc   :  { %6110 = vpow2.f32 %v4808_v34 }
0x2a06   :  { %v6111_v2 = vpop.eup %6110 }
0x2a07   :  { %v4810_v51 = vsel %vm4803_vm4, %v6111_v2, 0.0 }
0x2a08   :  { %4811 = vadd.xlane.f32.xlu1 %v4810_v51 }
0x2a0c   :  { %4825 = vadd.xlane.f32.xlu1 %v4824_v29 }
0x2a95   :  { %v4812_v43 = vpop.xlane.xlu1 %4811 }
0x2a96   :  { %6112 = vlog2.f32 %v4812_v43 }
0x2a99   :  { %v4826_v14 = vpop.xlane.xlu1 %4825 }
0x2aa0   :  { %v6113_v28 = vpop.eup %6112 }
0x2aa1   :  { %v4814_v0 = vmul.f32 0.6931472, %v6113_v28 }
0x2aa3   :  { %v4815_v4 = vadd.f32 %v4814_v0, %v4806_v60 }
0x2aa5   :  { %v4827_v17 = vsub.f32 %v4815_v4, %v4826_v14 }
0x2aa7   :  { %v4829_v13 = vsel %vm4828_vm6, %v4827_v17, 0.0 }
0x2aa8   :  { %4830 = vadd.xlane.f32.xlu1 %v4829_v13 }
0x2b35   :  { %v4831_v27 = vpop.xlane.xlu1 %4830 }
0x2b36   :  { %v4832_v24 = vrot.slane %v4831_v27, 4 }
0x2b38   :  { %v4833_v31 = vadd.f32 %v4832_v24, %v4831_v27 }
0x2b3a   :  { %v4834_v19 = vrot.slane %v4833_v31, 2 }
0x2b3c   :  { %v4835_v21 = vadd.f32 %v4834_v19, %v4833_v31 }
0x2b3e   :  { %v4836_v56 = vrot.slane %v4835_v21, 1 }
0x2b40   :  { %v4837_v11 = vadd.f32 %v4836_v56, %v4835_v21 }
0x2b42   :  { %6039 = vpush %v4837_v11 }
0x2b73   :  { %s6040_s10 = spop %6039 }
0x2b74   :  { %s4841_s6 = smul.f32 0.5, %s6040_s10 }
0x2b76   :  { %v4844_v62 = vstv %s4841_s6 }
0x2b77   :  { %4846 = vst.msk [vmem:[%s7142_s11 + $0x2] sm:$0x1] %vm4845_vm7, %v4844_v62 }

</bundles_post_ra>
